<compile_context>
chip_gen: v5e
topology: v5e:2x2
jax: 0.10.0
libtpu: 0.0.40
codegen_flags: <defaults>
</compile_context>

<pallas_src>
import functools

import jax
import jax.numpy as jnp
from jax.experimental import pallas as pl
from jax.experimental.pallas import tpu as pltpu

_CPAD = 8            # conv1 input channels zero-padded 3 -> 8
_K1 = 9 * _CPAD      # conv1 im2col contraction depth (3*3 taps * CPAD channels)


def _round_up(x, m):
    return (x + m - 1) // m * m


def _pick_row_tile(H, Wo):
    """Largest power-of-two row tile that divides H, gives >=2 tiles and keeps
    the per-tile f32 feature block modest (bounds VMEM / vreg pressure)."""
    th = H
    for t in (128, 64, 32, 16, 8, 4, 2, 1):
        if H % t == 0 and t < H and t * Wo * 64 * 4 <= (2 << 20):
            th = t
            break
    return th


# ---------------------------------------------------------------------------
# Fused kernel: one (batch, row-tile) step of
#     conv1 -> relu -> conv2 -> |.|-sum     for a, p, n simultaneously.
# ---------------------------------------------------------------------------
def _fused_contrast_kernel(a_ref, p_ref, n_ref, w1_ref, b1_ref, w2_ref, b2_ref,
                           out_ref, f1a_ref, *, th, W, Wo, W1, R):
    # a/p/n_ref : (1, 1, th+2, W1, 72) f32  conv1 im2col windows (built in wrapper)
    # w1_ref    : (72, 64) bf16             conv1 weights, 3x3 taps folded into K
    # w2_ref    : (3, 3, 64, 64) bf16       conv2 weights (kh, kw, cin, cout)
    # b1/b2_ref : (1, 64) f32
    # out_ref   : (1, 1, 8, 128) f32        partial sums at [0,0,0,0:4]
    # f1a_ref   : (th+2, W1, 64) f32 VMEM   anchor conv1 tile (never leaves VMEM)
    r = pl.program_id(1)

    # Border mask (built once, shared by the three branches): positions outside
    # the real image and the lane-alignment junk columns are forced to exactly
    # zero, which (a) realises conv2's zero padding at tile/image borders and
    # (b) keeps the full-width L1 sums below exact.
    ri = jax.lax.broadcasted_iota(jnp.int32, (th + 2, W1, 64), 0)
    ci = jax.lax.broadcasted_iota(jnp.int32, (th + 2, W1, 64), 1)
    row_ok = jnp.logical_and(jnp.logical_or(ri >= 1, r > 0),
                             jnp.logical_or(ri <= th, r < R - 1))
    mask1 = jnp.logical_and(row_ok, jnp.logical_and(ci >= 1, ci <= W))

    def conv1(x_ref):
        # Single K=72 MXU pass: taps already folded into the channel dim.
        lhs = x_ref[0, 0].reshape((th + 2) * W1, _K1).astype(jnp.bfloat16)
        f1 = jnp.dot(lhs, w1_ref[...], preferred_element_type=jnp.float32)
        f1 = (f1 + b1_ref[...]).reshape(th + 2, W1, 64)
        return jnp.where(mask1, f1, 0.0)

    def conv2(f1):
        g = jnp.maximum(f1, 0.0)                       # relu in f32 (VPU, v5e-safe)
        acc = jnp.zeros((th * Wo, 64), jnp.float32)
        for dy in range(3):
            for dx in range(3):
                tap = g[dy:dy + th, dx:dx + Wo, :].reshape(th * Wo, 64)
                acc = acc + jnp.dot(tap.astype(jnp.bfloat16), w2_ref[dy, dx],
                                    preferred_element_type=jnp.float32)
        f3 = acc + b2_ref[...]
        if Wo > W:                                     # zero alignment-junk cols
            f3 = f3.reshape(th, Wo, 64)
            cc = jax.lax.broadcasted_iota(jnp.int32, (th, Wo, 64), 1)
            f3 = jnp.where(cc < W, f3, 0.0).reshape(th * Wo, 64)
        return f3

    # Anchor features: computed once, kept on-chip, reused for both distances.
    f1a_ref[...] = conv1(a_ref)
    f3a = conv2(f1a_ref[...])

    # Positive branch (features are transient values, freed after their sums).
    # f1 halo rows (0 and th+1) belong to neighbouring tiles and are excluded;
    # masked / padded columns are exactly zero in every branch, so full-width
    # sums are safe.
    f1p = conv1(p_ref)
    s1_ap = jnp.sum(jnp.abs(f1a_ref[1:th + 1] - f1p[1:th + 1]))
    s3_ap = jnp.sum(jnp.abs(f3a - conv2(f1p)))

    # Negative branch.
    f1n = conv1(n_ref)
    s1_an = jnp.sum(jnp.abs(f1a_ref[1:th + 1] - f1n[1:th + 1]))
    s3_an = jnp.sum(jnp.abs(f3a - conv2(f1n)))

    # Lane-dense (8,128) partial-sum slab; 4 scalars at [0,0,0,0:4].
    lane = jax.lax.broadcasted_iota(jnp.int32, (1, 1, 8, 128), 3)
    sub = jax.lax.broadcasted_iota(jnp.int32, (1, 1, 8, 128), 2)
    row0 = sub == 0
    out = jnp.where(jnp.logical_and(row0, lane == 0), s1_ap,
          jnp.where(jnp.logical_and(row0, lane == 1), s3_ap,
          jnp.where(jnp.logical_and(row0, lane == 2), s1_an,
          jnp.where(jnp.logical_and(row0, lane == 3), s3_an, 0.0))))
    out_ref[...] = out


def _fused_contrast_sums(a, p, n, w1, b1, w2, b2, *, W, th):
    """a/p/n: (B, R, th+2, W1, 72) pre-windowed conv1-im2col inputs -> (4,) sums."""
    B, R = a.shape[0], a.shape[1]
    Wo = _round_up(W, 8)
    W1 = Wo + 8
    kernel = functools.partial(_fused_contrast_kernel,
                               th=th, W=W, Wo=Wo, W1=W1, R=R)
    tile_spec = pl.BlockSpec((1, 1, th + 2, W1, _K1),
                             lambda b, r: (b, r, 0, 0, 0))
    part = pl.pallas_call(
        kernel,
        out_shape=jax.ShapeDtypeStruct((B, R, 8, 128), jnp.float32),
        grid=(B, R),
        in_specs=[
            tile_spec, tile_spec, tile_spec,
            pl.BlockSpec((_K1, 64), lambda b, r: (0, 0)),
            pl.BlockSpec((1, 64), lambda b, r: (0, 0)),
            pl.BlockSpec((3, 3, 64, 64), lambda b, r: (0, 0, 0, 0)),
            pl.BlockSpec((1, 64), lambda b, r: (0, 0)),
        ],
        out_specs=pl.BlockSpec((1, 1, 8, 128), lambda b, r: (b, r, 0, 0)),
        scratch_shapes=[pltpu.VMEM((th + 2, W1, 64), jnp.float32)],
        compiler_params=pltpu.CompilerParams(
            dimension_semantics=("parallel", "parallel"),
            vmem_limit_bytes=48 * 1024 * 1024),
    )(a, p, n, w1, b1, w2, b2)
    return jnp.sum(part[:, :, 0, :4], axis=(0, 1))              # (4,)


# ---------------------------------------------------------------------------
# ContrastLoss wrapper (layout prep in plain JAX — only on the 3-channel input).
# ---------------------------------------------------------------------------
def contrast_loss(a_nchw, p_nchw, n_nchw, params):
    # p / n are .detach()'ed and the VGG weights are frozen in the reference.
    p_nchw = jax.lax.stop_gradient(p_nchw)
    n_nchw = jax.lax.stop_gradient(n_nchw)
    params = jax.tree_util.tree_map(jax.lax.stop_gradient, params)

    B, C, H, W = a_nchw.shape
    assert C <= _CPAD
    Wo = _round_up(W, 8)
    W1 = Wo + 8
    th = _pick_row_tile(H, Wo)
    R = H // th

    def prep(x):
        x = jnp.transpose(x, (0, 2, 3, 1)).astype(jnp.float32)        # NHWC
        # halo of 2 for the two stacked pad-1 convs + lane-alignment columns +
        # zero channels up to CPAD (this is the cheap 3-channel input).
        x = jnp.pad(x, ((0, 0), (2, 2), (2, W1 - W), (0, _CPAD - C)))
        # conv1 im2col: fold the 3x3 taps into the channel dim -> one K=72
        # matmul inside the kernel instead of 9 degenerate K=8 matmuls.
        taps = [x[:, dy:dy + H + 2, dx:dx + W1, :]
                for dy in range(3) for dx in range(3)]
        col = jnp.concatenate(taps, axis=-1)                          # (B,H+2,W1,72)
        # overlapping row windows, one per row tile (1 f1-halo row each side)
        return jnp.stack([col[:, r * th:r * th + th + 2] for r in range(R)],
                         axis=1)                                      # (B,R,th+2,W1,72)

    a = prep(a_nchw)
    p = prep(p_nchw)
    n = prep(n_nchw)

    # weights: torch (Cout, Cin, kh, kw) -> matmul-ready, bf16 MXU operands
    w1 = jnp.transpose(params["w1"], (2, 3, 1, 0))                    # (3,3,Cin,64)
    w1 = jnp.pad(w1, ((0, 0), (0, 0), (0, _CPAD - C), (0, 0)))
    w1 = w1.reshape(_K1, 64).astype(jnp.bfloat16)                     # tap-major K
    w2 = jnp.transpose(params["w2"], (2, 3, 1, 0)).astype(jnp.bfloat16)
    b1 = params["b1"].reshape(1, 64).astype(jnp.float32)
    b2 = params["b2"].reshape(1, 64).astype(jnp.float32)

    sums = _fused_contrast_sums(a, p, n, w1, b1, w2, b2, W=W, th=th)
    n_feat = jnp.float32(B * H * W * 64)
    d_ap = 0.5 * (sums[0] + sums[1]) / n_feat
    d_an = 0.5 * (sums[2] + sums[3]) / n_feat
    return d_ap / (d_an + 1e-7)


# ---------------------------------------------------------------------------
# Pure-JAX reference (f32) and synthetic weights.
# ---------------------------------------------------------------------------
def _reference_contrast_loss(a, p, n, params):
    def conv(x, w, b):
        y = jax.lax.conv_general_dilated(
            x, w, window_strides=(1, 1), padding=((1, 1), (1, 1)),
            dimension_numbers=("NCHW", "OIHW", "NCHW"))
        return y + b.reshape(1, -1, 1, 1)

    def perceptual(x, y):
        f1x = conv(x, params["w1"], params["b1"])
        f1y = conv(y, params["w1"], params["b1"])
        f3x = conv(jax.nn.relu(f1x), params["w2"], params["b2"])
        f3y = conv(jax.nn.relu(f1y), params["w2"], params["b2"])
        return (0.5 * jnp.mean(jnp.abs(f1x - f1y))
                + 0.5 * jnp.mean(jnp.abs(f3x - f3y)))

    return perceptual(a, p) / (perceptual(a, n) + 1e-7)


def init_params(key):
    # TODO(synk): synthetic deterministic weights stand in for pretrained VGG19.
    k1, k2, k3, k4 = jax.random.split(key, 4)
    return {
        "w1": jax.random.normal(k1, (64, 3, 3, 3), jnp.float32) * 0.05,
        "b1": jax.random.normal(k2, (64,), jnp.float32) * 0.01,
        "w2": jax.random.normal(k3, (64, 64, 3, 3), jnp.float32) * 0.02,
        "b2": jax.random.normal(k4, (64,), jnp.float32) * 0.01,
    }


if __name__ == "__main__":
    key = jax.random.PRNGKey(0)
    kp, ka, kb, kc = jax.random.split(key, 4)
    params = init_params(kp)

    B, C, H, W = 2, 3, 16, 16                 # NCHW, matching the PyTorch module
    a = jax.random.uniform(ka, (B, C, H, W), jnp.float32)
    p = jax.random.uniform(kb, (B, C, H, W), jnp.float32)
    n = jax.random.uniform(kc, (B, C, H, W), jnp.float32)

    loss = jax.jit(contrast_loss)(a, p, n, params)
    jax.block_until_ready(loss)

    ref = _reference_contrast_loss(a, p, n, params)
    err = abs(float(loss) - float(ref))
    assert err <= 5e-2 * abs(float(ref)) + 1e-4, (float(loss), float(ref))
    print("KERNEL_OK")
</pallas_src>

<mosaic_0001>
module attributes {stable_mosaic.version = 11 : i64} {
  func.func @_fused_contrast_kernel(%arg0: i32, %arg1: i32, %arg2: memref<1x1x10x24x72xf32, #tpu.memory_space<vmem>>, %arg3: memref<1x1x10x24x72xf32, #tpu.memory_space<vmem>>, %arg4: memref<1x1x10x24x72xf32, #tpu.memory_space<vmem>>, %arg5: memref<72x64xbf16, #tpu.memory_space<vmem>>, %arg6: memref<1x64xf32, #tpu.memory_space<vmem>>, %arg7: memref<3x3x64x64xbf16, #tpu.memory_space<vmem>>, %arg8: memref<1x64xf32, #tpu.memory_space<vmem>>, %arg9: memref<1x1x8x128xf32, #tpu.memory_space<vmem>>, %arg10: memref<10x24x64xf32, #tpu.memory_space<vmem>>) attributes {dimension_semantics = [#tpu.dimension_semantics<parallel>, #tpu.dimension_semantics<parallel>], iteration_bounds = array<i64: 2, 2>, scalar_prefetch = 0 : i64, scratch_operands = 1 : i64, tpu.core_type = #tpu.core_type<tc>, window_params = [{transform_indices = @transform_0, window_bounds = array<i64: 1, 1, 10, 24, 72>}, {transform_indices = @transform_1, window_bounds = array<i64: 1, 1, 10, 24, 72>}, {transform_indices = @transform_2, window_bounds = array<i64: 1, 1, 10, 24, 72>}, {pipeline_mode = #tpu.pipeline_mode<synchronous>, transform_indices = @transform_3, window_bounds = array<i64: 72, 64>}, {pipeline_mode = #tpu.pipeline_mode<synchronous>, transform_indices = @transform_4, window_bounds = array<i64: 1, 64>}, {pipeline_mode = #tpu.pipeline_mode<synchronous>, transform_indices = @transform_5, window_bounds = array<i64: 3, 3, 64, 64>}, {pipeline_mode = #tpu.pipeline_mode<synchronous>, transform_indices = @transform_6, window_bounds = array<i64: 1, 64>}, {transform_indices = @transform_7, window_bounds = array<i64: 1, 1, 8, 128>}]} {
    %0 = tpu.iota {dimensions = array<i32: 0>} : vector<10x24x64xi32>
    %1 = tpu.iota {dimensions = array<i32: 1>} : vector<10x24x64xi32>
    %c1_i32 = arith.constant 1 : i32
    %2 = vector.broadcast %c1_i32 : i32 to vector<10x24x64xi32>
    %3 = arith.cmpi sge, %0, %2 : vector<10x24x64xi32>
    %c0_i32 = arith.constant 0 : i32
    %4 = arith.cmpi sgt, %arg1, %c0_i32 : i32
    %5 = vector.broadcast %4 : i1 to vector<10x24x64xi1>
    %6 = arith.ori %3, %5 : vector<10x24x64xi1>
    %c8_i32 = arith.constant 8 : i32
    %7 = vector.broadcast %c8_i32 : i32 to vector<10x24x64xi32>
    %8 = arith.cmpi sle, %0, %7 : vector<10x24x64xi32>
    %c1_i32_0 = arith.constant 1 : i32
    %9 = arith.cmpi slt, %arg1, %c1_i32_0 : i32
    %10 = vector.broadcast %9 : i1 to vector<10x24x64xi1>
    %11 = arith.ori %8, %10 : vector<10x24x64xi1>
    %12 = arith.andi %6, %11 : vector<10x24x64xi1>
    %c1_i32_1 = arith.constant 1 : i32
    %13 = vector.broadcast %c1_i32_1 : i32 to vector<10x24x64xi32>
    %14 = arith.cmpi sge, %1, %13 : vector<10x24x64xi32>
    %c16_i32 = arith.constant 16 : i32
    %15 = vector.broadcast %c16_i32 : i32 to vector<10x24x64xi32>
    %16 = arith.cmpi sle, %1, %15 : vector<10x24x64xi32>
    %17 = arith.andi %14, %16 : vector<10x24x64xi1>
    %18 = arith.andi %12, %17 : vector<10x24x64xi1>
    %c0 = arith.constant 0 : index
    %c0_2 = arith.constant 0 : index
    %c0_3 = arith.constant 0 : index
    %c0_4 = arith.constant 0 : index
    %c0_5 = arith.constant 0 : index
    %19 = vector.load %arg2[%c0, %c0_2, %c0_3, %c0_4, %c0_5] : memref<1x1x10x24x72xf32, #tpu.memory_space<vmem>>, vector<1x1x10x24x72xf32>
    %20 = vector.shape_cast %19 : vector<1x1x10x24x72xf32> to vector<10x24x72xf32>
    %21 = vector.shape_cast %20 : vector<10x24x72xf32> to vector<240x72xf32>
    %22 = arith.truncf %21 : vector<240x72xf32> to vector<240x72xbf16>
    %c0_6 = arith.constant 0 : index
    %c0_7 = arith.constant 0 : index
    %23 = vector.load %arg5[%c0_6, %c0_7] : memref<72x64xbf16, #tpu.memory_space<vmem>>, vector<72x64xbf16>
    %cst = arith.constant dense<0.000000e+00> : vector<240x64xf32>
    %24 = tpu.matmul %22, %23, %cst {dimension_numbers = #tpu.dot_dimension_numbers<[1], [0], [0], [1], [0, 0, 1, 1], [], []>} : vector<240x72xbf16>, vector<72x64xbf16>, vector<240x64xf32> -> vector<240x64xf32>
    %c0_8 = arith.constant 0 : index
    %c0_9 = arith.constant 0 : index
    %25 = vector.load %arg6[%c0_8, %c0_9] : memref<1x64xf32, #tpu.memory_space<vmem>>, vector<1x64xf32>
    %26 = vector.broadcast %25 : vector<1x64xf32> to vector<240x64xf32>
    %27 = arith.addf %24, %26 : vector<240x64xf32>
    %28 = vector.shape_cast %27 : vector<240x64xf32> to vector<10x24x64xf32>
    %cst_10 = arith.constant 0.000000e+00 : f32
    %29 = vector.broadcast %cst_10 : f32 to vector<10x24x64xf32>
    %30 = arith.select %18, %28, %29 : vector<10x24x64xi1>, vector<10x24x64xf32>
    %c0_11 = arith.constant 0 : index
    %c0_12 = arith.constant 0 : index
    %c0_13 = arith.constant 0 : index
    %31 = vector.load %arg10[%c0_11, %c0_12, %c0_13] : memref<10x24x64xf32, #tpu.memory_space<vmem>>, vector<10x24x64xf32>
    tpu.vector_store %arg10[%c0_11, %c0_12, %c0_13], %30 {strides = array<i32>} : memref<10x24x64xf32, #tpu.memory_space<vmem>>, vector<10x24x64xf32>,
    %c0_14 = arith.constant 0 : index
    %c0_15 = arith.constant 0 : index
    %c0_16 = arith.constant 0 : index
    %32 = vector.load %arg10[%c0_14, %c0_15, %c0_16] : memref<10x24x64xf32, #tpu.memory_space<vmem>>, vector<10x24x64xf32>
    %cst_17 = arith.constant 0.000000e+00 : f32
    %33 = vector.broadcast %cst_17 : f32 to vector<10x24x64xf32>
    %34 = arith.maximumf %32, %33 : vector<10x24x64xf32>
    %cst_18 = arith.constant 0.000000e+00 : f32
    %35 = vector.broadcast %cst_18 : f32 to vector<128x64xf32>
    %36 = vector.extract_strided_slice %34 {offsets = [0, 0, 0], sizes = [8, 16, 64], strides = [1, 1, 1]} : vector<10x24x64xf32> to vector<8x16x64xf32>
    %37 = vector.shape_cast %36 : vector<8x16x64xf32> to vector<128x64xf32>
    %38 = arith.truncf %37 : vector<128x64xf32> to vector<128x64xbf16>
    %c0_19 = arith.constant 0 : index
    %c0_20 = arith.constant 0 : index
    %c0_21 = arith.constant 0 : index
    %c0_22 = arith.constant 0 : index
    %39 = vector.load %arg7[%c0_19, %c0_20, %c0_21, %c0_22] : memref<3x3x64x64xbf16, #tpu.memory_space<vmem>>, vector<1x1x64x64xbf16>
    %40 = vector.shape_cast %39 : vector<1x1x64x64xbf16> to vector<64x64xbf16>
    %cst_23 = arith.constant dense<0.000000e+00> : vector<128x64xf32>
    %41 = tpu.matmul %38, %40, %cst_23 {dimension_numbers = #tpu.dot_dimension_numbers<[1], [0], [0], [1], [0, 0, 1, 1], [], []>} : vector<128x64xbf16>, vector<64x64xbf16>, vector<128x64xf32> -> vector<128x64xf32>
    %42 = arith.addf %35, %41 : vector<128x64xf32>
    %43 = vector.extract_strided_slice %34 {offsets = [0, 1, 0], sizes = [8, 16, 64], strides = [1, 1, 1]} : vector<10x24x64xf32> to vector<8x16x64xf32>
    %44 = vector.shape_cast %43 : vector<8x16x64xf32> to vector<128x64xf32>
    %45 = arith.truncf %44 : vector<128x64xf32> to vector<128x64xbf16>
    %c0_24 = arith.constant 0 : index
    %c1 = arith.constant 1 : index
    %c0_25 = arith.constant 0 : index
    %c0_26 = arith.constant 0 : index
    %46 = vector.load %arg7[%c0_24, %c1, %c0_25, %c0_26] : memref<3x3x64x64xbf16, #tpu.memory_space<vmem>>, vector<1x1x64x64xbf16>
    %47 = vector.shape_cast %46 : vector<1x1x64x64xbf16> to vector<64x64xbf16>
    %cst_27 = arith.constant dense<0.000000e+00> : vector<128x64xf32>
    %48 = tpu.matmul %45, %47, %cst_27 {dimension_numbers = #tpu.dot_dimension_numbers<[1], [0], [0], [1], [0, 0, 1, 1], [], []>} : vector<128x64xbf16>, vector<64x64xbf16>, vector<128x64xf32> -> vector<128x64xf32>
    %49 = arith.addf %42, %48 : vector<128x64xf32>
    %50 = vector.extract_strided_slice %34 {offsets = [0, 2, 0], sizes = [8, 16, 64], strides = [1, 1, 1]} : vector<10x24x64xf32> to vector<8x16x64xf32>
    %51 = vector.shape_cast %50 : vector<8x16x64xf32> to vector<128x64xf32>
    %52 = arith.truncf %51 : vector<128x64xf32> to vector<128x64xbf16>
    %c0_28 = arith.constant 0 : index
    %c2 = arith.constant 2 : index
    %c0_29 = arith.constant 0 : index
    %c0_30 = arith.constant 0 : index
    %53 = vector.load %arg7[%c0_28, %c2, %c0_29, %c0_30] : memref<3x3x64x64xbf16, #tpu.memory_space<vmem>>, vector<1x1x64x64xbf16>
    %54 = vector.shape_cast %53 : vector<1x1x64x64xbf16> to vector<64x64xbf16>
    %cst_31 = arith.constant dense<0.000000e+00> : vector<128x64xf32>
    %55 = tpu.matmul %52, %54, %cst_31 {dimension_numbers = #tpu.dot_dimension_numbers<[1], [0], [0], [1], [0, 0, 1, 1], [], []>} : vector<128x64xbf16>, vector<64x64xbf16>, vector<128x64xf32> -> vector<128x64xf32>
    %56 = arith.addf %49, %55 : vector<128x64xf32>
    %57 = vector.extract_strided_slice %34 {offsets = [1, 0, 0], sizes = [8, 16, 64], strides = [1, 1, 1]} : vector<10x24x64xf32> to vector<8x16x64xf32>
    %58 = vector.shape_cast %57 : vector<8x16x64xf32> to vector<128x64xf32>
    %59 = arith.truncf %58 : vector<128x64xf32> to vector<128x64xbf16>
    %c1_32 = arith.constant 1 : index
    %c0_33 = arith.constant 0 : index
    %c0_34 = arith.constant 0 : index
    %c0_35 = arith.constant 0 : index
    %60 = vector.load %arg7[%c1_32, %c0_33, %c0_34, %c0_35] : memref<3x3x64x64xbf16, #tpu.memory_space<vmem>>, vector<1x1x64x64xbf16>
    %61 = vector.shape_cast %60 : vector<1x1x64x64xbf16> to vector<64x64xbf16>
    %cst_36 = arith.constant dense<0.000000e+00> : vector<128x64xf32>
    %62 = tpu.matmul %59, %61, %cst_36 {dimension_numbers = #tpu.dot_dimension_numbers<[1], [0], [0], [1], [0, 0, 1, 1], [], []>} : vector<128x64xbf16>, vector<64x64xbf16>, vector<128x64xf32> -> vector<128x64xf32>
    %63 = arith.addf %56, %62 : vector<128x64xf32>
    %64 = vector.extract_strided_slice %34 {offsets = [1, 1, 0], sizes = [8, 16, 64], strides = [1, 1, 1]} : vector<10x24x64xf32> to vector<8x16x64xf32>
    %65 = vector.shape_cast %64 : vector<8x16x64xf32> to vector<128x64xf32>
    %66 = arith.truncf %65 : vector<128x64xf32> to vector<128x64xbf16>
    %c1_37 = arith.constant 1 : index
    %c1_38 = arith.constant 1 : index
    %c0_39 = arith.constant 0 : index
    %c0_40 = arith.constant 0 : index
    %67 = vector.load %arg7[%c1_37, %c1_38, %c0_39, %c0_40] : memref<3x3x64x64xbf16, #tpu.memory_space<vmem>>, vector<1x1x64x64xbf16>
    %68 = vector.shape_cast %67 : vector<1x1x64x64xbf16> to vector<64x64xbf16>
    %cst_41 = arith.constant dense<0.000000e+00> : vector<128x64xf32>
    %69 = tpu.matmul %66, %68, %cst_41 {dimension_numbers = #tpu.dot_dimension_numbers<[1], [0], [0], [1], [0, 0, 1, 1], [], []>} : vector<128x64xbf16>, vector<64x64xbf16>, vector<128x64xf32> -> vector<128x64xf32>
    %70 = arith.addf %63, %69 : vector<128x64xf32>
    %71 = vector.extract_strided_slice %34 {offsets = [1, 2, 0], sizes = [8, 16, 64], strides = [1, 1, 1]} : vector<10x24x64xf32> to vector<8x16x64xf32>
    %72 = vector.shape_cast %71 : vector<8x16x64xf32> to vector<128x64xf32>
    %73 = arith.truncf %72 : vector<128x64xf32> to vector<128x64xbf16>
    %c1_42 = arith.constant 1 : index
    %c2_43 = arith.constant 2 : index
    %c0_44 = arith.constant 0 : index
    %c0_45 = arith.constant 0 : index
    %74 = vector.load %arg7[%c1_42, %c2_43, %c0_44, %c0_45] : memref<3x3x64x64xbf16, #tpu.memory_space<vmem>>, vector<1x1x64x64xbf16>
    %75 = vector.shape_cast %74 : vector<1x1x64x64xbf16> to vector<64x64xbf16>
    %cst_46 = arith.constant dense<0.000000e+00> : vector<128x64xf32>
    %76 = tpu.matmul %73, %75, %cst_46 {dimension_numbers = #tpu.dot_dimension_numbers<[1], [0], [0], [1], [0, 0, 1, 1], [], []>} : vector<128x64xbf16>, vector<64x64xbf16>, vector<128x64xf32> -> vector<128x64xf32>
    %77 = arith.addf %70, %76 : vector<128x64xf32>
    %78 = vector.extract_strided_slice %34 {offsets = [2, 0, 0], sizes = [8, 16, 64], strides = [1, 1, 1]} : vector<10x24x64xf32> to vector<8x16x64xf32>
    %79 = vector.shape_cast %78 : vector<8x16x64xf32> to vector<128x64xf32>
    %80 = arith.truncf %79 : vector<128x64xf32> to vector<128x64xbf16>
    %c2_47 = arith.constant 2 : index
    %c0_48 = arith.constant 0 : index
    %c0_49 = arith.constant 0 : index
    %c0_50 = arith.constant 0 : index
    %81 = vector.load %arg7[%c2_47, %c0_48, %c0_49, %c0_50] : memref<3x3x64x64xbf16, #tpu.memory_space<vmem>>, vector<1x1x64x64xbf16>
    %82 = vector.shape_cast %81 : vector<1x1x64x64xbf16> to vector<64x64xbf16>
    %cst_51 = arith.constant dense<0.000000e+00> : vector<128x64xf32>
    %83 = tpu.matmul %80, %82, %cst_51 {dimension_numbers = #tpu.dot_dimension_numbers<[1], [0], [0], [1], [0, 0, 1, 1], [], []>} : vector<128x64xbf16>, vector<64x64xbf16>, vector<128x64xf32> -> vector<128x64xf32>
    %84 = arith.addf %77, %83 : vector<128x64xf32>
    %85 = vector.extract_strided_slice %34 {offsets = [2, 1, 0], sizes = [8, 16, 64], strides = [1, 1, 1]} : vector<10x24x64xf32> to vector<8x16x64xf32>
    %86 = vector.shape_cast %85 : vector<8x16x64xf32> to vector<128x64xf32>
    %87 = arith.truncf %86 : vector<128x64xf32> to vector<128x64xbf16>
    %c2_52 = arith.constant 2 : index
    %c1_53 = arith.constant 1 : index
    %c0_54 = arith.constant 0 : index
    %c0_55 = arith.constant 0 : index
    %88 = vector.load %arg7[%c2_52, %c1_53, %c0_54, %c0_55] : memref<3x3x64x64xbf16, #tpu.memory_space<vmem>>, vector<1x1x64x64xbf16>
    %89 = vector.shape_cast %88 : vector<1x1x64x64xbf16> to vector<64x64xbf16>
    %cst_56 = arith.constant dense<0.000000e+00> : vector<128x64xf32>
    %90 = tpu.matmul %87, %89, %cst_56 {dimension_numbers = #tpu.dot_dimension_numbers<[1], [0], [0], [1], [0, 0, 1, 1], [], []>} : vector<128x64xbf16>, vector<64x64xbf16>, vector<128x64xf32> -> vector<128x64xf32>
    %91 = arith.addf %84, %90 : vector<128x64xf32>
    %92 = vector.extract_strided_slice %34 {offsets = [2, 2, 0], sizes = [8, 16, 64], strides = [1, 1, 1]} : vector<10x24x64xf32> to vector<8x16x64xf32>
    %93 = vector.shape_cast %92 : vector<8x16x64xf32> to vector<128x64xf32>
    %94 = arith.truncf %93 : vector<128x64xf32> to vector<128x64xbf16>
    %c2_57 = arith.constant 2 : index
    %c2_58 = arith.constant 2 : index
    %c0_59 = arith.constant 0 : index
    %c0_60 = arith.constant 0 : index
    %95 = vector.load %arg7[%c2_57, %c2_58, %c0_59, %c0_60] : memref<3x3x64x64xbf16, #tpu.memory_space<vmem>>, vector<1x1x64x64xbf16>
    %96 = vector.shape_cast %95 : vector<1x1x64x64xbf16> to vector<64x64xbf16>
    %cst_61 = arith.constant dense<0.000000e+00> : vector<128x64xf32>
    %97 = tpu.matmul %94, %96, %cst_61 {dimension_numbers = #tpu.dot_dimension_numbers<[1], [0], [0], [1], [0, 0, 1, 1], [], []>} : vector<128x64xbf16>, vector<64x64xbf16>, vector<128x64xf32> -> vector<128x64xf32>
    %98 = arith.addf %91, %97 : vector<128x64xf32>
    %c0_62 = arith.constant 0 : index
    %c0_63 = arith.constant 0 : index
    %99 = vector.load %arg8[%c0_62, %c0_63] : memref<1x64xf32, #tpu.memory_space<vmem>>, vector<1x64xf32>
    %100 = vector.broadcast %99 : vector<1x64xf32> to vector<128x64xf32>
    %101 = arith.addf %98, %100 : vector<128x64xf32>
    %c0_64 = arith.constant 0 : index
    %c0_65 = arith.constant 0 : index
    %c0_66 = arith.constant 0 : index
    %c0_67 = arith.constant 0 : index
    %c0_68 = arith.constant 0 : index
    %102 = vector.load %arg3[%c0_64, %c0_65, %c0_66, %c0_67, %c0_68] : memref<1x1x10x24x72xf32, #tpu.memory_space<vmem>>, vector<1x1x10x24x72xf32>
    %103 = vector.shape_cast %102 : vector<1x1x10x24x72xf32> to vector<10x24x72xf32>
    %104 = vector.shape_cast %103 : vector<10x24x72xf32> to vector<240x72xf32>
    %105 = arith.truncf %104 : vector<240x72xf32> to vector<240x72xbf16>
    %c0_69 = arith.constant 0 : index
    %c0_70 = arith.constant 0 : index
    %106 = vector.load %arg5[%c0_69, %c0_70] : memref<72x64xbf16, #tpu.memory_space<vmem>>, vector<72x64xbf16>
    %cst_71 = arith.constant dense<0.000000e+00> : vector<240x64xf32>
    %107 = tpu.matmul %105, %106, %cst_71 {dimension_numbers = #tpu.dot_dimension_numbers<[1], [0], [0], [1], [0, 0, 1, 1], [], []>} : vector<240x72xbf16>, vector<72x64xbf16>, vector<240x64xf32> -> vector<240x64xf32>
    %c0_72 = arith.constant 0 : index
    %c0_73 = arith.constant 0 : index
    %108 = vector.load %arg6[%c0_72, %c0_73] : memref<1x64xf32, #tpu.memory_space<vmem>>, vector<1x64xf32>
    %109 = vector.broadcast %108 : vector<1x64xf32> to vector<240x64xf32>
    %110 = arith.addf %107, %109 : vector<240x64xf32>
    %111 = vector.shape_cast %110 : vector<240x64xf32> to vector<10x24x64xf32>
    %cst_74 = arith.constant 0.000000e+00 : f32
    %112 = vector.broadcast %cst_74 : f32 to vector<10x24x64xf32>
    %113 = arith.select %18, %111, %112 : vector<10x24x64xi1>, vector<10x24x64xf32>
    %c1_75 = arith.constant 1 : index
    %c0_76 = arith.constant 0 : index
    %c0_77 = arith.constant 0 : index
    %114 = vector.load %arg10[%c1_75, %c0_76, %c0_77] : memref<10x24x64xf32, #tpu.memory_space<vmem>>, vector<8x24x64xf32>
    %115 = vector.extract_strided_slice %113 {offsets = [1, 0, 0], sizes = [8, 24, 64], strides = [1, 1, 1]} : vector<10x24x64xf32> to vector<8x24x64xf32>
    %116 = arith.subf %114, %115 : vector<8x24x64xf32>
    %117 = math.absf %116 : vector<8x24x64xf32>
    %118 = vector.shape_cast %117 : vector<8x24x64xf32> to vector<1x8x24x64xf32>
    %cst_78 = arith.constant dense<0.000000e+00> : vector<1xf32>
    %119 = vector.multi_reduction <add>, %118, %cst_78 [1, 2, 3] : vector<1x8x24x64xf32> to vector<1xf32>
    %120 = vector.shape_cast %119 : vector<1xf32> to vector<1x1x1x1xf32>
    %121 = vector.extract %120[0, 0, 0, 0] : f32 from vector<1x1x1x1xf32>
    %cst_79 = arith.constant 0.000000e+00 : f32
    %122 = vector.broadcast %cst_79 : f32 to vector<10x24x64xf32>
    %123 = arith.maximumf %113, %122 : vector<10x24x64xf32>
    %cst_80 = arith.constant 0.000000e+00 : f32
    %124 = vector.broadcast %cst_80 : f32 to vector<128x64xf32>
    %125 = vector.extract_strided_slice %123 {offsets = [0, 0, 0], sizes = [8, 16, 64], strides = [1, 1, 1]} : vector<10x24x64xf32> to vector<8x16x64xf32>
    %126 = vector.shape_cast %125 : vector<8x16x64xf32> to vector<128x64xf32>
    %127 = arith.truncf %126 : vector<128x64xf32> to vector<128x64xbf16>
    %c0_81 = arith.constant 0 : index
    %c0_82 = arith.constant 0 : index
    %c0_83 = arith.constant 0 : index
    %c0_84 = arith.constant 0 : index
    %128 = vector.load %arg7[%c0_81, %c0_82, %c0_83, %c0_84] : memref<3x3x64x64xbf16, #tpu.memory_space<vmem>>, vector<1x1x64x64xbf16>
    %129 = vector.shape_cast %128 : vector<1x1x64x64xbf16> to vector<64x64xbf16>
    %cst_85 = arith.constant dense<0.000000e+00> : vector<128x64xf32>
    %130 = tpu.matmul %127, %129, %cst_85 {dimension_numbers = #tpu.dot_dimension_numbers<[1], [0], [0], [1], [0, 0, 1, 1], [], []>} : vector<128x64xbf16>, vector<64x64xbf16>, vector<128x64xf32> -> vector<128x64xf32>
    %131 = arith.addf %124, %130 : vector<128x64xf32>
    %132 = vector.extract_strided_slice %123 {offsets = [0, 1, 0], sizes = [8, 16, 64], strides = [1, 1, 1]} : vector<10x24x64xf32> to vector<8x16x64xf32>
    %133 = vector.shape_cast %132 : vector<8x16x64xf32> to vector<128x64xf32>
    %134 = arith.truncf %133 : vector<128x64xf32> to vector<128x64xbf16>
    %c0_86 = arith.constant 0 : index
    %c1_87 = arith.constant 1 : index
    %c0_88 = arith.constant 0 : index
    %c0_89 = arith.constant 0 : index
    %135 = vector.load %arg7[%c0_86, %c1_87, %c0_88, %c0_89] : memref<3x3x64x64xbf16, #tpu.memory_space<vmem>>, vector<1x1x64x64xbf16>
    %136 = vector.shape_cast %135 : vector<1x1x64x64xbf16> to vector<64x64xbf16>
    %cst_90 = arith.constant dense<0.000000e+00> : vector<128x64xf32>
    %137 = tpu.matmul %134, %136, %cst_90 {dimension_numbers = #tpu.dot_dimension_numbers<[1], [0], [0], [1], [0, 0, 1, 1], [], []>} : vector<128x64xbf16>, vector<64x64xbf16>, vector<128x64xf32> -> vector<128x64xf32>
    %138 = arith.addf %131, %137 : vector<128x64xf32>
    %139 = vector.extract_strided_slice %123 {offsets = [0, 2, 0], sizes = [8, 16, 64], strides = [1, 1, 1]} : vector<10x24x64xf32> to vector<8x16x64xf32>
    %140 = vector.shape_cast %139 : vector<8x16x64xf32> to vector<128x64xf32>
    %141 = arith.truncf %140 : vector<128x64xf32> to vector<128x64xbf16>
    %c0_91 = arith.constant 0 : index
    %c2_92 = arith.constant 2 : index
    %c0_93 = arith.constant 0 : index
    %c0_94 = arith.constant 0 : index
    %142 = vector.load %arg7[%c0_91, %c2_92, %c0_93, %c0_94] : memref<3x3x64x64xbf16, #tpu.memory_space<vmem>>, vector<1x1x64x64xbf16>
    %143 = vector.shape_cast %142 : vector<1x1x64x64xbf16> to vector<64x64xbf16>
    %cst_95 = arith.constant dense<0.000000e+00> : vector<128x64xf32>
    %144 = tpu.matmul %141, %143, %cst_95 {dimension_numbers = #tpu.dot_dimension_numbers<[1], [0], [0], [1], [0, 0, 1, 1], [], []>} : vector<128x64xbf16>, vector<64x64xbf16>, vector<128x64xf32> -> vector<128x64xf32>
    %145 = arith.addf %138, %144 : vector<128x64xf32>
    %146 = vector.extract_strided_slice %123 {offsets = [1, 0, 0], sizes = [8, 16, 64], strides = [1, 1, 1]} : vector<10x24x64xf32> to vector<8x16x64xf32>
    %147 = vector.shape_cast %146 : vector<8x16x64xf32> to vector<128x64xf32>
    %148 = arith.truncf %147 : vector<128x64xf32> to vector<128x64xbf16>
    %c1_96 = arith.constant 1 : index
    %c0_97 = arith.constant 0 : index
    %c0_98 = arith.constant 0 : index
    %c0_99 = arith.constant 0 : index
    %149 = vector.load %arg7[%c1_96, %c0_97, %c0_98, %c0_99] : memref<3x3x64x64xbf16, #tpu.memory_space<vmem>>, vector<1x1x64x64xbf16>
    %150 = vector.shape_cast %149 : vector<1x1x64x64xbf16> to vector<64x64xbf16>
    %cst_100 = arith.constant dense<0.000000e+00> : vector<128x64xf32>
    %151 = tpu.matmul %148, %150, %cst_100 {dimension_numbers = #tpu.dot_dimension_numbers<[1], [0], [0], [1], [0, 0, 1, 1], [], []>} : vector<128x64xbf16>, vector<64x64xbf16>, vector<128x64xf32> -> vector<128x64xf32>
    %152 = arith.addf %145, %151 : vector<128x64xf32>
    %153 = vector.extract_strided_slice %123 {offsets = [1, 1, 0], sizes = [8, 16, 64], strides = [1, 1, 1]} : vector<10x24x64xf32> to vector<8x16x64xf32>
    %154 = vector.shape_cast %153 : vector<8x16x64xf32> to vector<128x64xf32>
    %155 = arith.truncf %154 : vector<128x64xf32> to vector<128x64xbf16>
    %c1_101 = arith.constant 1 : index
    %c1_102 = arith.constant 1 : index
    %c0_103 = arith.constant 0 : index
    %c0_104 = arith.constant 0 : index
    %156 = vector.load %arg7[%c1_101, %c1_102, %c0_103, %c0_104] : memref<3x3x64x64xbf16, #tpu.memory_space<vmem>>, vector<1x1x64x64xbf16>
    %157 = vector.shape_cast %156 : vector<1x1x64x64xbf16> to vector<64x64xbf16>
    %cst_105 = arith.constant dense<0.000000e+00> : vector<128x64xf32>
    %158 = tpu.matmul %155, %157, %cst_105 {dimension_numbers = #tpu.dot_dimension_numbers<[1], [0], [0], [1], [0, 0, 1, 1], [], []>} : vector<128x64xbf16>, vector<64x64xbf16>, vector<128x64xf32> -> vector<128x64xf32>
    %159 = arith.addf %152, %158 : vector<128x64xf32>
    %160 = vector.extract_strided_slice %123 {offsets = [1, 2, 0], sizes = [8, 16, 64], strides = [1, 1, 1]} : vector<10x24x64xf32> to vector<8x16x64xf32>
    %161 = vector.shape_cast %160 : vector<8x16x64xf32> to vector<128x64xf32>
    %162 = arith.truncf %161 : vector<128x64xf32> to vector<128x64xbf16>
    %c1_106 = arith.constant 1 : index
    %c2_107 = arith.constant 2 : index
    %c0_108 = arith.constant 0 : index
    %c0_109 = arith.constant 0 : index
    %163 = vector.load %arg7[%c1_106, %c2_107, %c0_108, %c0_109] : memref<3x3x64x64xbf16, #tpu.memory_space<vmem>>, vector<1x1x64x64xbf16>
    %164 = vector.shape_cast %163 : vector<1x1x64x64xbf16> to vector<64x64xbf16>
    %cst_110 = arith.constant dense<0.000000e+00> : vector<128x64xf32>
    %165 = tpu.matmul %162, %164, %cst_110 {dimension_numbers = #tpu.dot_dimension_numbers<[1], [0], [0], [1], [0, 0, 1, 1], [], []>} : vector<128x64xbf16>, vector<64x64xbf16>, vector<128x64xf32> -> vector<128x64xf32>
    %166 = arith.addf %159, %165 : vector<128x64xf32>
    %167 = vector.extract_strided_slice %123 {offsets = [2, 0, 0], sizes = [8, 16, 64], strides = [1, 1, 1]} : vector<10x24x64xf32> to vector<8x16x64xf32>
    %168 = vector.shape_cast %167 : vector<8x16x64xf32> to vector<128x64xf32>
    %169 = arith.truncf %168 : vector<128x64xf32> to vector<128x64xbf16>
    %c2_111 = arith.constant 2 : index
    %c0_112 = arith.constant 0 : index
    %c0_113 = arith.constant 0 : index
    %c0_114 = arith.constant 0 : index
    %170 = vector.load %arg7[%c2_111, %c0_112, %c0_113, %c0_114] : memref<3x3x64x64xbf16, #tpu.memory_space<vmem>>, vector<1x1x64x64xbf16>
    %171 = vector.shape_cast %170 : vector<1x1x64x64xbf16> to vector<64x64xbf16>
    %cst_115 = arith.constant dense<0.000000e+00> : vector<128x64xf32>
    %172 = tpu.matmul %169, %171, %cst_115 {dimension_numbers = #tpu.dot_dimension_numbers<[1], [0], [0], [1], [0, 0, 1, 1], [], []>} : vector<128x64xbf16>, vector<64x64xbf16>, vector<128x64xf32> -> vector<128x64xf32>
    %173 = arith.addf %166, %172 : vector<128x64xf32>
    %174 = vector.extract_strided_slice %123 {offsets = [2, 1, 0], sizes = [8, 16, 64], strides = [1, 1, 1]} : vector<10x24x64xf32> to vector<8x16x64xf32>
    %175 = vector.shape_cast %174 : vector<8x16x64xf32> to vector<128x64xf32>
    %176 = arith.truncf %175 : vector<128x64xf32> to vector<128x64xbf16>
    %c2_116 = arith.constant 2 : index
    %c1_117 = arith.constant 1 : index
    %c0_118 = arith.constant 0 : index
    %c0_119 = arith.constant 0 : index
    %177 = vector.load %arg7[%c2_116, %c1_117, %c0_118, %c0_119] : memref<3x3x64x64xbf16, #tpu.memory_space<vmem>>, vector<1x1x64x64xbf16>
    %178 = vector.shape_cast %177 : vector<1x1x64x64xbf16> to vector<64x64xbf16>
    %cst_120 = arith.constant dense<0.000000e+00> : vector<128x64xf32>
    %179 = tpu.matmul %176, %178, %cst_120 {dimension_numbers = #tpu.dot_dimension_numbers<[1], [0], [0], [1], [0, 0, 1, 1], [], []>} : vector<128x64xbf16>, vector<64x64xbf16>, vector<128x64xf32> -> vector<128x64xf32>
    %180 = arith.addf %173, %179 : vector<128x64xf32>
    %181 = vector.extract_strided_slice %123 {offsets = [2, 2, 0], sizes = [8, 16, 64], strides = [1, 1, 1]} : vector<10x24x64xf32> to vector<8x16x64xf32>
    %182 = vector.shape_cast %181 : vector<8x16x64xf32> to vector<128x64xf32>
    %183 = arith.truncf %182 : vector<128x64xf32> to vector<128x64xbf16>
    %c2_121 = arith.constant 2 : index
    %c2_122 = arith.constant 2 : index
    %c0_123 = arith.constant 0 : index
    %c0_124 = arith.constant 0 : index
    %184 = vector.load %arg7[%c2_121, %c2_122, %c0_123, %c0_124] : memref<3x3x64x64xbf16, #tpu.memory_space<vmem>>, vector<1x1x64x64xbf16>
    %185 = vector.shape_cast %184 : vector<1x1x64x64xbf16> to vector<64x64xbf16>
    %cst_125 = arith.constant dense<0.000000e+00> : vector<128x64xf32>
    %186 = tpu.matmul %183, %185, %cst_125 {dimension_numbers = #tpu.dot_dimension_numbers<[1], [0], [0], [1], [0, 0, 1, 1], [], []>} : vector<128x64xbf16>, vector<64x64xbf16>, vector<128x64xf32> -> vector<128x64xf32>
    %187 = arith.addf %180, %186 : vector<128x64xf32>
    %c0_126 = arith.constant 0 : index
    %c0_127 = arith.constant 0 : index
    %188 = vector.load %arg8[%c0_126, %c0_127] : memref<1x64xf32, #tpu.memory_space<vmem>>, vector<1x64xf32>
    %189 = vector.broadcast %188 : vector<1x64xf32> to vector<128x64xf32>
    %190 = arith.addf %187, %189 : vector<128x64xf32>
    %191 = arith.subf %101, %190 : vector<128x64xf32>
    %192 = math.absf %191 : vector<128x64xf32>
    %193 = vector.shape_cast %192 : vector<128x64xf32> to vector<1x128x64xf32>
    %cst_128 = arith.constant dense<0.000000e+00> : vector<1xf32>
    %194 = vector.multi_reduction <add>, %193, %cst_128 [1, 2] : vector<1x128x64xf32> to vector<1xf32>
    %195 = vector.shape_cast %194 : vector<1xf32> to vector<1x1x1xf32>
    %196 = vector.extract %195[0, 0, 0] : f32 from vector<1x1x1xf32>
    %c0_129 = arith.constant 0 : index
    %c0_130 = arith.constant 0 : index
    %c0_131 = arith.constant 0 : index
    %c0_132 = arith.constant 0 : index
    %c0_133 = arith.constant 0 : index
    %197 = vector.load %arg4[%c0_129, %c0_130, %c0_131, %c0_132, %c0_133] : memref<1x1x10x24x72xf32, #tpu.memory_space<vmem>>, vector<1x1x10x24x72xf32>
    %198 = vector.shape_cast %197 : vector<1x1x10x24x72xf32> to vector<10x24x72xf32>
    %199 = vector.shape_cast %198 : vector<10x24x72xf32> to vector<240x72xf32>
    %200 = arith.truncf %199 : vector<240x72xf32> to vector<240x72xbf16>
    %c0_134 = arith.constant 0 : index
    %c0_135 = arith.constant 0 : index
    %201 = vector.load %arg5[%c0_134, %c0_135] : memref<72x64xbf16, #tpu.memory_space<vmem>>, vector<72x64xbf16>
    %cst_136 = arith.constant dense<0.000000e+00> : vector<240x64xf32>
    %202 = tpu.matmul %200, %201, %cst_136 {dimension_numbers = #tpu.dot_dimension_numbers<[1], [0], [0], [1], [0, 0, 1, 1], [], []>} : vector<240x72xbf16>, vector<72x64xbf16>, vector<240x64xf32> -> vector<240x64xf32>
    %c0_137 = arith.constant 0 : index
    %c0_138 = arith.constant 0 : index
    %203 = vector.load %arg6[%c0_137, %c0_138] : memref<1x64xf32, #tpu.memory_space<vmem>>, vector<1x64xf32>
    %204 = vector.broadcast %203 : vector<1x64xf32> to vector<240x64xf32>
    %205 = arith.addf %202, %204 : vector<240x64xf32>
    %206 = vector.shape_cast %205 : vector<240x64xf32> to vector<10x24x64xf32>
    %cst_139 = arith.constant 0.000000e+00 : f32
    %207 = vector.broadcast %cst_139 : f32 to vector<10x24x64xf32>
    %208 = arith.select %18, %206, %207 : vector<10x24x64xi1>, vector<10x24x64xf32>
    %c1_140 = arith.constant 1 : index
    %c0_141 = arith.constant 0 : index
    %c0_142 = arith.constant 0 : index
    %209 = vector.load %arg10[%c1_140, %c0_141, %c0_142] : memref<10x24x64xf32, #tpu.memory_space<vmem>>, vector<8x24x64xf32>
    %210 = vector.extract_strided_slice %208 {offsets = [1, 0, 0], sizes = [8, 24, 64], strides = [1, 1, 1]} : vector<10x24x64xf32> to vector<8x24x64xf32>
    %211 = arith.subf %209, %210 : vector<8x24x64xf32>
    %212 = math.absf %211 : vector<8x24x64xf32>
    %213 = vector.shape_cast %212 : vector<8x24x64xf32> to vector<1x8x24x64xf32>
    %cst_143 = arith.constant dense<0.000000e+00> : vector<1xf32>
    %214 = vector.multi_reduction <add>, %213, %cst_143 [1, 2, 3] : vector<1x8x24x64xf32> to vector<1xf32>
    %215 = vector.shape_cast %214 : vector<1xf32> to vector<1x1x1x1xf32>
    %216 = vector.extract %215[0, 0, 0, 0] : f32 from vector<1x1x1x1xf32>
    %cst_144 = arith.constant 0.000000e+00 : f32
    %217 = vector.broadcast %cst_144 : f32 to vector<10x24x64xf32>
    %218 = arith.maximumf %208, %217 : vector<10x24x64xf32>
    %cst_145 = arith.constant 0.000000e+00 : f32
    %219 = vector.broadcast %cst_145 : f32 to vector<128x64xf32>
    %220 = vector.extract_strided_slice %218 {offsets = [0, 0, 0], sizes = [8, 16, 64], strides = [1, 1, 1]} : vector<10x24x64xf32> to vector<8x16x64xf32>
    %221 = vector.shape_cast %220 : vector<8x16x64xf32> to vector<128x64xf32>
    %222 = arith.truncf %221 : vector<128x64xf32> to vector<128x64xbf16>
    %c0_146 = arith.constant 0 : index
    %c0_147 = arith.constant 0 : index
    %c0_148 = arith.constant 0 : index
    %c0_149 = arith.constant 0 : index
    %223 = vector.load %arg7[%c0_146, %c0_147, %c0_148, %c0_149] : memref<3x3x64x64xbf16, #tpu.memory_space<vmem>>, vector<1x1x64x64xbf16>
    %224 = vector.shape_cast %223 : vector<1x1x64x64xbf16> to vector<64x64xbf16>
    %cst_150 = arith.constant dense<0.000000e+00> : vector<128x64xf32>
    %225 = tpu.matmul %222, %224, %cst_150 {dimension_numbers = #tpu.dot_dimension_numbers<[1], [0], [0], [1], [0, 0, 1, 1], [], []>} : vector<128x64xbf16>, vector<64x64xbf16>, vector<128x64xf32> -> vector<128x64xf32>
    %226 = arith.addf %219, %225 : vector<128x64xf32>
    %227 = vector.extract_strided_slice %218 {offsets = [0, 1, 0], sizes = [8, 16, 64], strides = [1, 1, 1]} : vector<10x24x64xf32> to vector<8x16x64xf32>
    %228 = vector.shape_cast %227 : vector<8x16x64xf32> to vector<128x64xf32>
    %229 = arith.truncf %228 : vector<128x64xf32> to vector<128x64xbf16>
    %c0_151 = arith.constant 0 : index
    %c1_152 = arith.constant 1 : index
    %c0_153 = arith.constant 0 : index
    %c0_154 = arith.constant 0 : index
    %230 = vector.load %arg7[%c0_151, %c1_152, %c0_153, %c0_154] : memref<3x3x64x64xbf16, #tpu.memory_space<vmem>>, vector<1x1x64x64xbf16>
    %231 = vector.shape_cast %230 : vector<1x1x64x64xbf16> to vector<64x64xbf16>
    %cst_155 = arith.constant dense<0.000000e+00> : vector<128x64xf32>
    %232 = tpu.matmul %229, %231, %cst_155 {dimension_numbers = #tpu.dot_dimension_numbers<[1], [0], [0], [1], [0, 0, 1, 1], [], []>} : vector<128x64xbf16>, vector<64x64xbf16>, vector<128x64xf32> -> vector<128x64xf32>
    %233 = arith.addf %226, %232 : vector<128x64xf32>
    %234 = vector.extract_strided_slice %218 {offsets = [0, 2, 0], sizes = [8, 16, 64], strides = [1, 1, 1]} : vector<10x24x64xf32> to vector<8x16x64xf32>
    %235 = vector.shape_cast %234 : vector<8x16x64xf32> to vector<128x64xf32>
    %236 = arith.truncf %235 : vector<128x64xf32> to vector<128x64xbf16>
    %c0_156 = arith.constant 0 : index
    %c2_157 = arith.constant 2 : index
    %c0_158 = arith.constant 0 : index
    %c0_159 = arith.constant 0 : index
    %237 = vector.load %arg7[%c0_156, %c2_157, %c0_158, %c0_159] : memref<3x3x64x64xbf16, #tpu.memory_space<vmem>>, vector<1x1x64x64xbf16>
    %238 = vector.shape_cast %237 : vector<1x1x64x64xbf16> to vector<64x64xbf16>
    %cst_160 = arith.constant dense<0.000000e+00> : vector<128x64xf32>
    %239 = tpu.matmul %236, %238, %cst_160 {dimension_numbers = #tpu.dot_dimension_numbers<[1], [0], [0], [1], [0, 0, 1, 1], [], []>} : vector<128x64xbf16>, vector<64x64xbf16>, vector<128x64xf32> -> vector<128x64xf32>
    %240 = arith.addf %233, %239 : vector<128x64xf32>
    %241 = vector.extract_strided_slice %218 {offsets = [1, 0, 0], sizes = [8, 16, 64], strides = [1, 1, 1]} : vector<10x24x64xf32> to vector<8x16x64xf32>
    %242 = vector.shape_cast %241 : vector<8x16x64xf32> to vector<128x64xf32>
    %243 = arith.truncf %242 : vector<128x64xf32> to vector<128x64xbf16>
    %c1_161 = arith.constant 1 : index
    %c0_162 = arith.constant 0 : index
    %c0_163 = arith.constant 0 : index
    %c0_164 = arith.constant 0 : index
    %244 = vector.load %arg7[%c1_161, %c0_162, %c0_163, %c0_164] : memref<3x3x64x64xbf16, #tpu.memory_space<vmem>>, vector<1x1x64x64xbf16>
    %245 = vector.shape_cast %244 : vector<1x1x64x64xbf16> to vector<64x64xbf16>
    %cst_165 = arith.constant dense<0.000000e+00> : vector<128x64xf32>
    %246 = tpu.matmul %243, %245, %cst_165 {dimension_numbers = #tpu.dot_dimension_numbers<[1], [0], [0], [1], [0, 0, 1, 1], [], []>} : vector<128x64xbf16>, vector<64x64xbf16>, vector<128x64xf32> -> vector<128x64xf32>
    %247 = arith.addf %240, %246 : vector<128x64xf32>
    %248 = vector.extract_strided_slice %218 {offsets = [1, 1, 0], sizes = [8, 16, 64], strides = [1, 1, 1]} : vector<10x24x64xf32> to vector<8x16x64xf32>
    %249 = vector.shape_cast %248 : vector<8x16x64xf32> to vector<128x64xf32>
    %250 = arith.truncf %249 : vector<128x64xf32> to vector<128x64xbf16>
    %c1_166 = arith.constant 1 : index
    %c1_167 = arith.constant 1 : index
    %c0_168 = arith.constant 0 : index
    %c0_169 = arith.constant 0 : index
    %251 = vector.load %arg7[%c1_166, %c1_167, %c0_168, %c0_169] : memref<3x3x64x64xbf16, #tpu.memory_space<vmem>>, vector<1x1x64x64xbf16>
    %252 = vector.shape_cast %251 : vector<1x1x64x64xbf16> to vector<64x64xbf16>
    %cst_170 = arith.constant dense<0.000000e+00> : vector<128x64xf32>
    %253 = tpu.matmul %250, %252, %cst_170 {dimension_numbers = #tpu.dot_dimension_numbers<[1], [0], [0], [1], [0, 0, 1, 1], [], []>} : vector<128x64xbf16>, vector<64x64xbf16>, vector<128x64xf32> -> vector<128x64xf32>
    %254 = arith.addf %247, %253 : vector<128x64xf32>
    %255 = vector.extract_strided_slice %218 {offsets = [1, 2, 0], sizes = [8, 16, 64], strides = [1, 1, 1]} : vector<10x24x64xf32> to vector<8x16x64xf32>
    %256 = vector.shape_cast %255 : vector<8x16x64xf32> to vector<128x64xf32>
    %257 = arith.truncf %256 : vector<128x64xf32> to vector<128x64xbf16>
    %c1_171 = arith.constant 1 : index
    %c2_172 = arith.constant 2 : index
    %c0_173 = arith.constant 0 : index
    %c0_174 = arith.constant 0 : index
    %258 = vector.load %arg7[%c1_171, %c2_172, %c0_173, %c0_174] : memref<3x3x64x64xbf16, #tpu.memory_space<vmem>>, vector<1x1x64x64xbf16>
    %259 = vector.shape_cast %258 : vector<1x1x64x64xbf16> to vector<64x64xbf16>
    %cst_175 = arith.constant dense<0.000000e+00> : vector<128x64xf32>
    %260 = tpu.matmul %257, %259, %cst_175 {dimension_numbers = #tpu.dot_dimension_numbers<[1], [0], [0], [1], [0, 0, 1, 1], [], []>} : vector<128x64xbf16>, vector<64x64xbf16>, vector<128x64xf32> -> vector<128x64xf32>
    %261 = arith.addf %254, %260 : vector<128x64xf32>
    %262 = vector.extract_strided_slice %218 {offsets = [2, 0, 0], sizes = [8, 16, 64], strides = [1, 1, 1]} : vector<10x24x64xf32> to vector<8x16x64xf32>
    %263 = vector.shape_cast %262 : vector<8x16x64xf32> to vector<128x64xf32>
    %264 = arith.truncf %263 : vector<128x64xf32> to vector<128x64xbf16>
    %c2_176 = arith.constant 2 : index
    %c0_177 = arith.constant 0 : index
    %c0_178 = arith.constant 0 : index
    %c0_179 = arith.constant 0 : index
    %265 = vector.load %arg7[%c2_176, %c0_177, %c0_178, %c0_179] : memref<3x3x64x64xbf16, #tpu.memory_space<vmem>>, vector<1x1x64x64xbf16>
    %266 = vector.shape_cast %265 : vector<1x1x64x64xbf16> to vector<64x64xbf16>
    %cst_180 = arith.constant dense<0.000000e+00> : vector<128x64xf32>
    %267 = tpu.matmul %264, %266, %cst_180 {dimension_numbers = #tpu.dot_dimension_numbers<[1], [0], [0], [1], [0, 0, 1, 1], [], []>} : vector<128x64xbf16>, vector<64x64xbf16>, vector<128x64xf32> -> vector<128x64xf32>
    %268 = arith.addf %261, %267 : vector<128x64xf32>
    %269 = vector.extract_strided_slice %218 {offsets = [2, 1, 0], sizes = [8, 16, 64], strides = [1, 1, 1]} : vector<10x24x64xf32> to vector<8x16x64xf32>
    %270 = vector.shape_cast %269 : vector<8x16x64xf32> to vector<128x64xf32>
    %271 = arith.truncf %270 : vector<128x64xf32> to vector<128x64xbf16>
    %c2_181 = arith.constant 2 : index
    %c1_182 = arith.constant 1 : index
    %c0_183 = arith.constant 0 : index
    %c0_184 = arith.constant 0 : index
    %272 = vector.load %arg7[%c2_181, %c1_182, %c0_183, %c0_184] : memref<3x3x64x64xbf16, #tpu.memory_space<vmem>>, vector<1x1x64x64xbf16>
    %273 = vector.shape_cast %272 : vector<1x1x64x64xbf16> to vector<64x64xbf16>
    %cst_185 = arith.constant dense<0.000000e+00> : vector<128x64xf32>
    %274 = tpu.matmul %271, %273, %cst_185 {dimension_numbers = #tpu.dot_dimension_numbers<[1], [0], [0], [1], [0, 0, 1, 1], [], []>} : vector<128x64xbf16>, vector<64x64xbf16>, vector<128x64xf32> -> vector<128x64xf32>
    %275 = arith.addf %268, %274 : vector<128x64xf32>
    %276 = vector.extract_strided_slice %218 {offsets = [2, 2, 0], sizes = [8, 16, 64], strides = [1, 1, 1]} : vector<10x24x64xf32> to vector<8x16x64xf32>
    %277 = vector.shape_cast %276 : vector<8x16x64xf32> to vector<128x64xf32>
    %278 = arith.truncf %277 : vector<128x64xf32> to vector<128x64xbf16>
    %c2_186 = arith.constant 2 : index
    %c2_187 = arith.constant 2 : index
    %c0_188 = arith.constant 0 : index
    %c0_189 = arith.constant 0 : index
    %279 = vector.load %arg7[%c2_186, %c2_187, %c0_188, %c0_189] : memref<3x3x64x64xbf16, #tpu.memory_space<vmem>>, vector<1x1x64x64xbf16>
    %280 = vector.shape_cast %279 : vector<1x1x64x64xbf16> to vector<64x64xbf16>
    %cst_190 = arith.constant dense<0.000000e+00> : vector<128x64xf32>
    %281 = tpu.matmul %278, %280, %cst_190 {dimension_numbers = #tpu.dot_dimension_numbers<[1], [0], [0], [1], [0, 0, 1, 1], [], []>} : vector<128x64xbf16>, vector<64x64xbf16>, vector<128x64xf32> -> vector<128x64xf32>
    %282 = arith.addf %275, %281 : vector<128x64xf32>
    %c0_191 = arith.constant 0 : index
    %c0_192 = arith.constant 0 : index
    %283 = vector.load %arg8[%c0_191, %c0_192] : memref<1x64xf32, #tpu.memory_space<vmem>>, vector<1x64xf32>
    %284 = vector.broadcast %283 : vector<1x64xf32> to vector<128x64xf32>
    %285 = arith.addf %282, %284 : vector<128x64xf32>
    %286 = arith.subf %101, %285 : vector<128x64xf32>
    %287 = math.absf %286 : vector<128x64xf32>
    %288 = vector.shape_cast %287 : vector<128x64xf32> to vector<1x128x64xf32>
    %cst_193 = arith.constant dense<0.000000e+00> : vector<1xf32>
    %289 = vector.multi_reduction <add>, %288, %cst_193 [1, 2] : vector<1x128x64xf32> to vector<1xf32>
    %290 = vector.shape_cast %289 : vector<1xf32> to vector<1x1x1xf32>
    %291 = vector.extract %290[0, 0, 0] : f32 from vector<1x1x1xf32>
    %292 = tpu.iota {dimensions = array<i32: 3>} : vector<1x1x8x128xi32>
    %293 = tpu.iota {dimensions = array<i32: 2>} : vector<1x1x8x128xi32>
    %c0_i32_194 = arith.constant 0 : i32
    %294 = vector.broadcast %c0_i32_194 : i32 to vector<1x1x8x128xi32>
    %295 = arith.cmpi eq, %293, %294 : vector<1x1x8x128xi32>
    %c0_i32_195 = arith.constant 0 : i32
    %296 = vector.broadcast %c0_i32_195 : i32 to vector<1x1x8x128xi32>
    %297 = arith.cmpi eq, %292, %296 : vector<1x1x8x128xi32>
    %298 = arith.andi %295, %297 : vector<1x1x8x128xi1>
    %c1_i32_196 = arith.constant 1 : i32
    %299 = vector.broadcast %c1_i32_196 : i32 to vector<1x1x8x128xi32>
    %300 = arith.cmpi eq, %292, %299 : vector<1x1x8x128xi32>
    %301 = arith.andi %295, %300 : vector<1x1x8x128xi1>
    %c2_i32 = arith.constant 2 : i32
    %302 = vector.broadcast %c2_i32 : i32 to vector<1x1x8x128xi32>
    %303 = arith.cmpi eq, %292, %302 : vector<1x1x8x128xi32>
    %304 = arith.andi %295, %303 : vector<1x1x8x128xi1>
    %c3_i32 = arith.constant 3 : i32
    %305 = vector.broadcast %c3_i32 : i32 to vector<1x1x8x128xi32>
    %306 = arith.cmpi eq, %292, %305 : vector<1x1x8x128xi32>
    %307 = arith.andi %295, %306 : vector<1x1x8x128xi1>
    %cst_197 = arith.constant 0.000000e+00 : f32
    %308 = vector.broadcast %291 : f32 to vector<1x1x8x128xf32>
    %309 = vector.broadcast %cst_197 : f32 to vector<1x1x8x128xf32>
    %310 = arith.select %307, %308, %309 : vector<1x1x8x128xi1>, vector<1x1x8x128xf32>
    %311 = vector.broadcast %216 : f32 to vector<1x1x8x128xf32>
    %312 = arith.select %304, %311, %310 : vector<1x1x8x128xi1>, vector<1x1x8x128xf32>
    %313 = vector.broadcast %196 : f32 to vector<1x1x8x128xf32>
    %314 = arith.select %301, %313, %312 : vector<1x1x8x128xi1>, vector<1x1x8x128xf32>
    %315 = vector.broadcast %121 : f32 to vector<1x1x8x128xf32>
    %316 = arith.select %298, %315, %314 : vector<1x1x8x128xi1>, vector<1x1x8x128xf32>
    %c0_198 = arith.constant 0 : index
    %c0_199 = arith.constant 0 : index
    %c0_200 = arith.constant 0 : index
    %c0_201 = arith.constant 0 : index
    %317 = vector.load %arg9[%c0_198, %c0_199, %c0_200, %c0_201] : memref<1x1x8x128xf32, #tpu.memory_space<vmem>>, vector<1x1x8x128xf32>
    tpu.vector_store %arg9[%c0_198, %c0_199, %c0_200, %c0_201], %316 {strides = array<i32>} : memref<1x1x8x128xf32, #tpu.memory_space<vmem>>, vector<1x1x8x128xf32>,
    return
  }
  func.func @transform_0(%arg0: i32, %arg1: i32) -> (i32, i32, i32, i32, i32) {
    %c0_i32 = arith.constant 0 : i32
    %c0_i32_0 = arith.constant 0 : i32
    %c0_i32_1 = arith.constant 0 : i32
    %c0_i32_2 = arith.constant 0 : i32
    return %arg0, %arg1, %c0_i32, %c0_i32_0, %c0_i32_1 : i32, i32, i32, i32, i32
  }
  func.func @transform_1(%arg0: i32, %arg1: i32) -> (i32, i32, i32, i32, i32) {
    %c0_i32 = arith.constant 0 : i32
    %c0_i32_0 = arith.constant 0 : i32
    %c0_i32_1 = arith.constant 0 : i32
    %c0_i32_2 = arith.constant 0 : i32
    return %arg0, %arg1, %c0_i32, %c0_i32_0, %c0_i32_1 : i32, i32, i32, i32, i32
  }
  func.func @transform_2(%arg0: i32, %arg1: i32) -> (i32, i32, i32, i32, i32) {
    %c0_i32 = arith.constant 0 : i32
    %c0_i32_0 = arith.constant 0 : i32
    %c0_i32_1 = arith.constant 0 : i32
    %c0_i32_2 = arith.constant 0 : i32
    return %arg0, %arg1, %c0_i32, %c0_i32_0, %c0_i32_1 : i32, i32, i32, i32, i32
  }
  func.func @transform_3(%arg0: i32, %arg1: i32) -> (i32, i32) {
    %c0_i32 = arith.constant 0 : i32
    %c0_i32_0 = arith.constant 0 : i32
    %c0_i32_1 = arith.constant 0 : i32
    return %c0_i32, %c0_i32_0 : i32, i32
  }
  func.func @transform_4(%arg0: i32, %arg1: i32) -> (i32, i32) {
    %c0_i32 = arith.constant 0 : i32
    %c0_i32_0 = arith.constant 0 : i32
    %c0_i32_1 = arith.constant 0 : i32
    return %c0_i32, %c0_i32_0 : i32, i32
  }
  func.func @transform_5(%arg0: i32, %arg1: i32) -> (i32, i32, i32, i32) {
    %c0_i32 = arith.constant 0 : i32
    %c0_i32_0 = arith.constant 0 : i32
    %c0_i32_1 = arith.constant 0 : i32
    %c0_i32_2 = arith.constant 0 : i32
    %c0_i32_3 = arith.constant 0 : i32
    return %c0_i32, %c0_i32_0, %c0_i32_1, %c0_i32_2 : i32, i32, i32, i32
  }
  func.func @transform_6(%arg0: i32, %arg1: i32) -> (i32, i32) {
    %c0_i32 = arith.constant 0 : i32
    %c0_i32_0 = arith.constant 0 : i32
    %c0_i32_1 = arith.constant 0 : i32
    return %c0_i32, %c0_i32_0 : i32, i32
  }
  func.func @transform_7(%arg0: i32, %arg1: i32) -> (i32, i32, i32, i32) {
    %c0_i32 = arith.constant 0 : i32
    %c0_i32_0 = arith.constant 0 : i32
    %c0_i32_1 = arith.constant 0 : i32
    return %arg0, %arg1, %c0_i32, %c0_i32_0 : i32, i32, i32, i32
  }
}

</mosaic_0001>

<bundles_post_ra>
// kernel: contrast_loss.1
= control target key start
LH: loop header
LB: loop body
LE: loop exit
PB: predicated region body
PF: predicated region fallthrough
CT: control target
= control target key end

     0   :  { %s5431_s24 = smov 0   ;;  %s5433_s25 = smov 0   ;;  %s8062_s0 = inlined_call_operand.vmem [shape: f32[2,2,10,24,72], index: 0, kind: input, shape index: {}]   ;;  %s8063_s1 = inlined_call_operand.vmem [shape: f32[2,2,10,24,72], index: 1, kind: input, shape index: {}]   ;;  %s8064_s2 = inlined_call_operand.vmem [shape: f32[2,2,10,24,72], index: 2, kind: input, shape index: {}]   ;;  %s8065_s3 = inlined_call_operand.vmem [shape: bf16[72,64], index: 3, kind: input, shape index: {}]   ;;  %s8066_s4 = inlined_call_operand.vmem [shape: f32[1,64], index: 4, kind: input, shape index: {}]   ;;  %s8067_s5 = inlined_call_operand.vmem [shape: bf16[3,3,64,64], index: 5, kind: input, shape index: {}]   ;;  %s8068_s6 = inlined_call_operand.vmem [shape: f32[1,64], index: 6, kind: input, shape index: {}]   ;;  %s8069_s7 = inlined_call_operand.vmem [shape: f32[2,2,8,128], index: 7, kind: output, shape index: {}]  }
   0x1   :  { %s5435_s26 = smov 0   ;;  %s5437_s27 = smov 0  }
   0x2   :  { %s5439_s28 = smov 0  }
   0x3 LB: > { %s26_s29 = sadd.s32 1, %s5381_s26  ;;  %s29_s30 = sadd.s32 1, %s5385_s27  ;;  %s5389_s28 = sphi %s5439_s28, %s17_s28   ;;  %s5385_s27 = sphi %s5437_s27, %s8262_s27   ;;  %s5381_s26 = sphi %s5435_s26, %s8261_s26   ;;  %s5377_s25 = sphi %s5433_s25, %s8260_s25   ;;  %s5373_s24 = sphi %s5431_s24, %s8259_s24  }
   0x4   : > { %p27_p0 = scmp.ge.s32.totalorder %s26_s29, 2  ;;  %p4674_p1 = scmp.ge.s32.totalorder %s5389_s28, 1 }
   0x5   : > { %p289_p2 = scmp.lt.s32.totalorder %s5389_s28, 5 }
   0x6   : > { %s8264_s29 = smov (%p27_p0, %s26_s29), 0  ;;  %s8266_s30 = smov (!%p27_p0, %s29_s30), %s5385_s27 }
   0x7   : > { %p290_p3 = pnand %p4674_p1, %p289_p2  ;;  %p31_p4 = scmp.ge.s32.totalorder %s8266_s30, 2 }
   0x9   : > { %s8268_s30 = smov (%p31_p4, %s8266_s30), 0  ;;  %293 = sbr.rel (%p290_p3) target bundleno = 2010 (0x7da), region = 48 }
   0xe   : > { %v465_v0 = vld [vmem:[%s8065_s3 + $0x20] sm:$0xf]  ;;  %vm543_vm0 = vcmask 1043456   ;;  %p346_p5 = scmp.lt.s32.totalorder %s5377_s25, 1  ;;  %p348_p6 = scmp.lt.s32.totalorder %s5373_s24, 1  ;;  %v5186_v4 = vld [vmem:[%s8065_s3 + $0x18] sm:$0xff]  ;;  %v8070_v36 = vlaneseq }
   0xf   : > { %v487_v1 = vunpack.c.l.b16 %v465_v0  ;;  %v5185_v5 = vld [vmem:[%s8065_s3 + $0x10] sm:$0xff]  ;;  %v5184_v6 = vld [vmem:[%s8065_s3 + $0x8] sm:$0xff]  ;;  %v5183_v7 = vld [vmem:[%s8065_s3] sm:$0xff]  ;;  %vm497_vm1 = vcmask 588800   ;;  %p386_p7 = scmp.gt.s32.totalorder %s5373_s24, 0  ;;  %v8104_v41 = vmov 0 }
  0x10   : > { %s8270_s25 = smov (!%p346_p5, %s5377_s25), 1  ;;  %v5521_v29 = vld [vmem:[%s8067_s5 + $0x18] sm:$0xff]  ;;  %v5527_v30 = vld [vmem:[%s8067_s5 + $0x10] sm:$0xff]  ;;  %v5535_v34 = vld [vmem:[%s8067_s5 + $0x8] sm:$0xff]  ;;  %v5547_v37 = vshrl.u32 %v8070_v36, 7  ;;  %vm661_vm5 = vcmask 523264  }
  0x11   : > { %v492_v2 = vpack.c.b16 %v487_v1, %v487_v1  ;;  %s5472_s10 = scalar_select %p348_p6, %s5373_s24, 1  ;;  %1015 = vmatpush.bf16.msra.mxu2 %v5521_v29  ;;  %v5543_v35 = vld [vmem:[%s8067_s5] sm:$0xff]  ;;  %v8110_v56 = vmov 0  ;;  %vm792_vm8 = vcmask 1046528   ;;  %vm1060_vm9 = vcmask 1045504  }
  0x12   : > { %s5236_s11 = smul.u32 60, %s8270_s25  ;;  %8103 = vst [vmem:[#allocation3_spill] sm:$0xff] %v5547_v37  ;;  %vm394_vm3 = vcmp.ge.s32.totalorder %v5547_v37, 1  ;;  %v5559_v42 = vld [vmem:[%s8066_s4] ss:$0 sm:$0xff]  ;;  %v5576_v50 = vadd.s32 16, %v5547_v37 }
  0x13   : > { %v545_v3 = vsel %vm543_vm0, %v492_v2, 0  ;;  %s5235_s14 = smul.u32 30, %s5472_s10  ;;  %v7211_v44 = vld [vmem:[%s8068_s6] ss:$0 sm:$0xff]  ;;  %s4678_s22 = sshll.u32 %s8270_s25, 1 }
  0x14   : > { %550 = vmatpush.bf16.msra.mxu0 %v545_v3  ;;  %s387_s20 = scalar_select %p386_p7, 1, 0  ;;  %8109 = vst [vmem:[#allocation5_spill] sm:$0xff] %v5576_v50  ;;  %vm399_vm6 = vcmp.le.s32.totalorder %v5576_v50, 16 }
  0x15   : > { %s352_s15 = sadd.s32 %s5236_s11, %s5235_s14  ;;  %1016 = vmatpush.bf16.msra.mxu2 %v5527_v30  ;;  %s378_s24 = sadd.s32 %s4678_s22, %s5472_s10 }
  0x16   : > { %s5483_s18 = sshll.u32 %s352_s15, 3  ;;  %v388_v38 = vstv %s387_s20  ;;  %s4679_s12 = sshll.u32 %s378_s24, 3 }
  0x17   : > { %s5492_s23 = scalar_lea.vmem %s8062_s0, %s5483_s18  ;;  %vm5551_vm2 = vcmp.eq.s32.totalorder %v388_v38, 1  ;;  %s6315_s13 = scalar_lea.vmem %s8063_s1, %s5483_s18 }
  0x18   : > { %551 = vmatpush.bf16.msra.mxu0 %v5186_v4  ;;  %v412_v8 = vld [vmem:[%s5492_s23] sm:$0xff]  ;;  %v413_v9 = vld [vmem:[%s5492_s23 + $0x8] sm:$0xff]  ;;  %v414_v11 = vld [vmem:[%s5492_s23 + $0x10] sm:$0xff]  ;;  %v8105_v41 = vsel %vm5551_vm2, 4294967295, %v8104_v41  ;;  %s391_s8 = scalar_select %p348_p6, 1, 0 }
  0x19   : > { %v442_v10 = vpack.c.bf16 %v413_v9, %v412_v8  ;;  %v415_v12 = vld [vmem:[%s5492_s23 + $0x18] sm:$0xff]  ;;  %v416_v14 = vld [vmem:[%s5492_s23 + $0x20] sm:$0xff]  ;;  %v417_v15 = vld [vmem:[%s5492_s23 + $0x28] sm:$0xff]  ;;  %1017 = vmatpush.bf16.msra.mxu2 %v5535_v34  ;;  %8106 = vst [vmem:[#allocation4_spill] sm:$0xff] %v8105_v41  ;;  %s7008_s21 = scalar_lea.vmem %s8064_s2, %s5483_s18  ;;  %s380_s14 = scalar_lea.vmem %s8069_s7, %s4679_s12 }
  0x1a   : > { %v443_v13 = vpack.c.bf16 %v415_v12, %v414_v11  ;;  %v444_v16 = vpack.c.bf16 %v417_v15, %v416_v14  ;;  %v418_v17 = vld [vmem:[%s5492_s23 + $0x30] sm:$0xff]  ;;  %v419_v18 = vld [vmem:[%s5492_s23 + $0x38] sm:$0xff]  ;;  %v420_v20 = vld [vmem:[%s5492_s23 + $0x40] sm:$0xff] }
  0x1b   : > { %v445_v19 = vpack.c.bf16 %v419_v18, %v418_v17  ;;  %v421_v21 = vld [vmem:[%s5492_s23 + $0x48] sm:$0xff]  ;;  %v422_v23 = vld [vmem:[%s5492_s23 + $0x50] sm:$0xff]  ;;  %v423_v24 = vld [vmem:[%s5492_s23 + $0x58] sm:$0xff] }
  0x1c   : > { %552 = vmatpush.bf16.msra.mxu0 %v5185_v5  ;;  %v446_v22 = vpack.c.bf16 %v421_v21, %v420_v20  ;;  %v447_v25 = vpack.c.bf16 %v423_v24, %v422_v23  ;;  %v424_v26 = vld [vmem:[%s5492_s23 + $0x60] sm:$0xff]  ;;  %v425_v27 = vld [vmem:[%s5492_s23 + $0x68] sm:$0xff]  ;;  %v426_v31 = vld [vmem:[%s5492_s23 + $0x70] sm:$0xff] }
  0x1d   : > { %v448_v28 = vpack.c.bf16 %v425_v27, %v424_v26  ;;  %v427_v32 = vld [vmem:[%s5492_s23 + $0x78] sm:$0xff]  ;;  %1018 = vmatpush.bf16.msra.mxu2 %v5543_v35  ;;  %v428_v39 = vld [vmem:[%s5492_s23 + $0x80] sm:$0xff]  ;;  %v429_v40 = vld [vmem:[%s5492_s23 + $0x88] sm:$0xff] }
  0x1e   : > { %v449_v33 = vpack.c.bf16 %v427_v32, %v426_v31  ;;  %v450_v43 = vpack.c.bf16 %v429_v40, %v428_v39  ;;  %vm5565_vm4 = vmand %vm5551_vm2, %vm394_vm3  ;;  %v430_v52 = vld [vmem:[%s5492_s23 + $0x90] sm:$0xff]  ;;  %v431_v53 = vld [vmem:[%s5492_s23 + $0x98] sm:$0xff] }
  0x1f   : > { %v451_v55 = vpack.c.bf16 %v431_v53, %v430_v52  ;;  %vm5588_vm7 = vmand %vm5551_vm2, %vm399_vm6  ;;  %v433_v11 = vld [vmem:[%s5492_s23 + $0xa8] sm:$0xff]  ;;  %v5634_v24 = vld [vmem:[%s8067_s5 + $0x30] sm:$0xff] }
  0x20   : > { %553 = vmatpush.bf16.msra.mxu0 %v5184_v6  ;;  %v8111_v56 = vsel %vm5588_vm7, 4294967295, %v8110_v56  ;;  %v5643_v31 = vld [vmem:[%s8067_s5 + $0x28] sm:$0xff]  ;;  %v434_v38 = vld [vmem:[%s5492_s23 + $0xb0] sm:$0xff]  ;;  %v435_v39 = vld [vmem:[%s5492_s23 + $0xb8] sm:$0xff] }
  0x21   : > { %8112 = vst [vmem:[#allocation6_spill] sm:$0xff] %v8111_v56 }
  0x24   : > { %554 = vmatpush.bf16.msra.mxu0 %v5183_v7 }
  0x27   : > { %4696 = vmatmul.msk.bf16.vlgmr.msra.gmra.mxu0 %vm497_vm1, %v442_v10  ;;  %v432_v10 = vld [vmem:[%s5492_s23 + $0xa0] sm:$0xff] }
  0x28   : > { %v452_v15 = vpack.c.bf16 %v433_v11, %v432_v10 }
  0x37   : > { %4697 = vmatmul.msk.bf16.gmra.mxu0 %vm497_vm1, %v443_v13 }
  0x47   : > { %4698 = vmatmul.msk.bf16.gmra.mxu0 %vm497_vm1, %v444_v16 }
  0x57   : > { %4699 = vmatmul.msk.bf16.gmra.mxu0 %vm497_vm1, %v445_v19 }
  0x67   : > { %4700 = vmatmul.msk.bf16.gmra.mxu0 %vm497_vm1, %v446_v22  ;;  %v5624_v22 = vld [vmem:[%s8067_s5 + $0x38] sm:$0xff] }
  0x68   : > { %5227 = vmatpush.bf16.msra.mxu1 %v5624_v22  ;;  %918 = vmatpush.bf16.msrb.mxu0 %v5624_v22 }
  0x69   : > { %5228 = vmatpush.bf16.msra.mxu3 %v5624_v22 }
  0x6c   : > { %5229 = vmatpush.bf16.msra.mxu1 %v5634_v24  ;;  %919 = vmatpush.bf16.msrb.mxu0 %v5634_v24 }
  0x6d   : > { %5230 = vmatpush.bf16.msra.mxu3 %v5634_v24 }
  0x70   : > { %5231 = vmatpush.bf16.msra.mxu1 %v5643_v31  ;;  %920 = vmatpush.bf16.msrb.mxu0 %v5643_v31 }
  0x71   : > { %5232 = vmatpush.bf16.msra.mxu3 %v5643_v31 }
  0x77   : > { %4701 = vmatmul.msk.bf16.gmra.mxu0 %vm497_vm1, %v447_v25 }
  0x87   : > { %4702 = vmatmul.msk.bf16.gmra.mxu0 %vm497_vm1, %v448_v28 }
  0x97   : > { %4703 = vmatmul.msk.bf16.gmra.mxu0 %vm497_vm1, %v449_v33 }
  0xa4   : > { %v556_v45 = vpop.f32.mrf.mxu0 }
  0xa5   : > { %v557_v46 = vadd.f32 %v5559_v42, %v556_v45 }
  0xa7   : > { %v631_v47 = vsel %vm5565_vm4, %v557_v46, 0.0  ;;  %4704 = vmatmul.msk.bf16.gmra.mxu0 %vm497_vm1, %v450_v43 }
  0xa8   : > { %662 = vst.msk [vmem:[#allocation2] sm:$0xff] %vm661_vm5, %v631_v47 }
  0xac   : > { %v558_v48 = vpop.f32.mrf.mxu0 }
  0xad   : > { %v559_v49 = vadd.f32 %v5559_v42, %v558_v48  ;;  %v5658_v48 = vld [vmem:[%s8067_s5 + $0x20] sm:$0xff] }
  0xae   : > { %5233 = vmatpush.bf16.msra.mxu1 %v5658_v48  ;;  %921 = vmatpush.bf16.msrb.mxu0 %v5658_v48 }
  0xaf   : > { %v632_v51 = vsel %vm5551_vm2, %v559_v49, 0.0  ;;  %v692_v54 = vld [vmem:[#allocation2] sm:$0xff]  ;;  %v453_v49 = vpack.c.bf16 %v435_v39, %v434_v38  ;;  %5234 = vmatpush.bf16.msra.mxu3 %v5658_v48 }
  0xb0   : > { %663 = vst.msk [vmem:[#allocation2 + $0x8] sm:$0xff] %vm661_vm5, %v632_v51  ;;  %v722_v59 = vmax.f32 %v692_v54, 0.0 }
  0xb2   : > { %v793_v63 = vrot.slane %v722_v59, 1  ;;  %v1061_v2 = vrot.slane %v722_v59, 2 }
  0xb4   : > { %v561_v57 = vpop.f32.mrf.mxu0 }
  0xb5   : > { %v562_v58 = vadd.f32 %v5559_v42, %v561_v57 }
  0xb7   : > { %v633_v60 = vsel %vm5588_vm7, %v562_v58, 0.0  ;;  %4705 = vmatmul.msk.bf16.gmra.mxu0 %vm497_vm1, %v451_v55  ;;  %v693_v61 = vld [vmem:[#allocation2 + $0x8] sm:$0xff] }
  0xb8   : > { %664 = vst.msk [vmem:[#allocation2 + $0x10] sm:$0xff] %vm661_vm5, %v633_v60  ;;  %v723_v62 = vmax.f32 %v693_v61, 0.0 }
  0xba   : > { %v752_v0 = vpack.c.bf16 %v723_v62, %v722_v59  ;;  %v794_v1 = vrot.slane %v723_v62, 1  ;;  %v1062_v3 = vrot.slane %v723_v62, 2 }
  0xbc   : > { %v563_v4 = vpop.f32.mrf.mxu0  ;;  %4759 = vmatmul.msk.bf16.vlgmr.msra.gmra.mxu2 %vm661_vm5, %v752_v0  ;;  %v5599_v5 = vsel %vm792_vm8, %v793_v63, %v794_v1  ;;  %v5602_v6 = vsel %vm1060_vm9, %v1061_v2, %v1062_v3 }
  0xbd   : > { %v564_v7 = vadd.f32 %v5559_v42, %v563_v4  ;;  %v437_v4 = vld [vmem:[%s5492_s23 + $0xc8] sm:$0xff] }
  0xbf   : > { %v634_v8 = vsel %vm394_vm3, %v564_v7, 0.0  ;;  %v694_v9 = vld [vmem:[#allocation2 + $0x10] sm:$0xff] }
  0xc0   : > { %665 = vst.msk [vmem:[#allocation2 + $0x18] sm:$0xff] %vm661_vm5, %v634_v8  ;;  %v724_v12 = vmax.f32 %v694_v9, 0.0 }
  0xc2   : > { %v796_v13 = vrot.slane %v724_v12, 1  ;;  %v1064_v14 = vrot.slane %v724_v12, 2 }
  0xc4   : > { %v566_v16 = vpop.f32.mrf.mxu0  ;;  %v5611_v17 = vsel %vm792_vm8, %v794_v1, %v796_v13  ;;  %v5614_v18 = vsel %vm1060_vm9, %v1062_v3, %v1064_v14  ;;  %v436_v3 = vld [vmem:[%s5492_s23 + $0xc0] sm:$0xff] }
  0xc5   : > { %v567_v19 = vadd.f32 %v5559_v42, %v566_v16  ;;  %v849_v20 = vpack.c.bf16 %v5611_v17, %v5599_v5  ;;  %v1117_v21 = vpack.c.bf16 %v5614_v18, %v5602_v6  ;;  %v454_v8 = vpack.c.bf16 %v437_v4, %v436_v3  ;;  %v440_v3 = vld [vmem:[%s5492_s23 + $0xe0] sm:$0xff]  ;;  %v441_v4 = vld [vmem:[%s5492_s23 + $0xe8] sm:$0xff]  ;;  %v6008_v18 = vld [vmem:[%s8067_s5 + $0xf8] sm:$0xff] }
  0xc7   : > { %666 = vst.msk [vmem:[#allocation2 + $0x20] sm:$0xff] %vm661_vm5, %v567_v19  ;;  %4706 = vmatmul.msk.bf16.gmra.mxu0 %vm497_vm1, %v452_v15  ;;  %v695_v23 = vld [vmem:[#allocation2 + $0x18] sm:$0xff] }
  0xc8   : > { %v725_v26 = vmax.f32 %v695_v23, 0.0 }
  0xca   : > { %v798_v40 = vrot.slane %v725_v26, 1  ;;  %v1066_v46 = vrot.slane %v725_v26, 2 }
  0xcc   : > { %v568_v25 = vpop.f32.mrf.mxu0 }
  0xcd   : > { %v569_v27 = vadd.f32 %v5559_v42, %v568_v25 }
  0xce   : > { %v696_v28 = vld [vmem:[#allocation2 + $0x20] sm:$0xff] }
  0xcf   : > { %v636_v32 = vsel %vm399_vm6, %v569_v27, 0.0  ;;  %v726_v33 = vmax.f32 %v696_v28, 0.0 }
  0xd0   : > { %667 = vst.msk [vmem:[#allocation2 + $0x28] sm:$0xff] %vm661_vm5, %v636_v32  ;;  %v438_v32 = vld [vmem:[%s5492_s23 + $0xd0] sm:$0xff] }
  0xd1   : > { %v5652_v43 = vpack.c.bf16 %v726_v33, %v725_v26  ;;  %v799_v45 = vrot.slane %v726_v33, 1  ;;  %v1067_v47 = vrot.slane %v726_v33, 2  ;;  %v439_v33 = vld [vmem:[%s5492_s23 + $0xd8] sm:$0xff] }
  0xd3   : > { %4760 = vmatmul.msk.bf16.gmra.mxu2 %vm661_vm5, %v5652_v43  ;;  %v800_v51 = vsel %vm792_vm8, %v798_v40, %v799_v45  ;;  %v1068_v52 = vsel %vm1060_vm9, %v1066_v46, %v1067_v47 }
  0xd4   : > { %v571_v53 = vpop.f32.mrf.mxu0 }
  0xd5   : > { %v572_v54 = vadd.f32 %v5559_v42, %v571_v53 }
  0xd7   : > { %v637_v55 = vsel %vm394_vm3, %v572_v54, 0.0  ;;  %4707 = vmatmul.msk.bf16.gmra.mxu0 %vm497_vm1, %v453_v49  ;;  %v697_v57 = vld [vmem:[#allocation2 + $0x28] sm:$0xff] }
  0xd8   : > { %668 = vst.msk [vmem:[#allocation2 + $0x30] sm:$0xff] %vm661_vm5, %v637_v55  ;;  %v727_v58 = vmax.f32 %v697_v57, 0.0 }
  0xda   : > { %v801_v59 = vrot.slane %v727_v58, 1  ;;  %v1069_v60 = vrot.slane %v727_v58, 2 }
  0xdc   : > { %v573_v61 = vpop.f32.mrf.mxu0  ;;  %v802_v62 = vsel %vm792_vm8, %v799_v45, %v801_v59  ;;  %v1070_v63 = vsel %vm1060_vm9, %v1067_v47, %v1069_v60  ;;  %v455_v47 = vpack.c.bf16 %v439_v33, %v438_v32  ;;  %v5741_v32 = vld [vmem:[%s8067_s5 + $0x70] sm:$0xff] }
  0xdd   : > { %v574_v0 = vadd.f32 %v5559_v42, %v573_v61  ;;  %v5675_v1 = vpack.c.bf16 %v802_v62, %v800_v51  ;;  %v5677_v2 = vpack.c.bf16 %v1070_v63, %v1068_v52  ;;  %v5746_v33 = vld [vmem:[%s8067_s5 + $0xd0] sm:$0xff] }
  0xdf   : > { %669 = vst.msk [vmem:[#allocation2 + $0x38] sm:$0xff] %vm661_vm5, %v574_v0  ;;  %v698_v7 = vld [vmem:[#allocation2 + $0x30] sm:$0xff] }
  0xe0   : > { %v728_v11 = vmax.f32 %v698_v7, 0.0 }
  0xe2   : > { %v1071_v16 = vrot.slane %v728_v11, 2  ;;  %v803_v40 = vrot.slane %v728_v11, 1 }
  0xe4   : > { %v576_v9 = vpop.f32.mrf.mxu0 }
  0xe5   : > { %v577_v10 = vadd.f32 %v5559_v42, %v576_v9 }
  0xe6   : > { %v699_v12 = vld [vmem:[#allocation2 + $0x38] sm:$0xff] }
  0xe7   : > { %v639_v13 = vsel %vm399_vm6, %v577_v10, 0.0  ;;  %4708 = vmatmul.msk.bf16.gmra.mxu0 %vm497_vm1, %v454_v8  ;;  %v729_v14 = vmax.f32 %v699_v12, 0.0  ;;  %v456_v10 = vpack.c.bf16 %v441_v4, %v440_v3 }
  0xe8   : > { %670 = vst.msk [vmem:[#allocation2 + $0x40] sm:$0xff] %vm661_vm5, %v639_v13 }
  0xe9   : > { %v5687_v15 = vpack.c.bf16 %v729_v14, %v728_v11  ;;  %v1072_v19 = vrot.slane %v729_v14, 2  ;;  %v804_v39 = vrot.slane %v729_v14, 1  ;;  %v5725_v14 = vld [vmem:[%s8067_s5 + $0x78] sm:$0xff] }
  0xea   : > { %1288 = vmatpush.bf16.msrb.mxu1 %v5725_v14 }
  0xeb   : > { %4761 = vmatmul.msk.bf16.gmra.mxu2 %vm661_vm5, %v5687_v15  ;;  %v1073_v23 = vsel %vm1060_vm9, %v1071_v16, %v1072_v19  ;;  %v805_v51 = vsel %vm792_vm8, %v803_v40, %v804_v39  ;;  %v5730_v16 = vld [vmem:[%s8067_s5 + $0xd8] sm:$0xff] }
  0xec   : > { %v578_v25 = vpop.f32.mrf.mxu0  ;;  %1611 = vmatpush.bf16.msra.mxu0 %v5730_v16 }
  0xed   : > { %v579_v26 = vadd.f32 %v5559_v42, %v578_v25 }
  0xee   : > { %1289 = vmatpush.bf16.msrb.mxu1 %v5741_v32 }
  0xef   : > { %v640_v27 = vsel %vm394_vm3, %v579_v26, 0.0  ;;  %v700_v28 = vld [vmem:[#allocation2 + $0x40] sm:$0xff] }
  0xf0   : > { %671 = vst.msk [vmem:[#allocation2 + $0x48] sm:$0xff] %vm661_vm5, %v640_v27  ;;  %v730_v38 = vmax.f32 %v700_v28, 0.0  ;;  %1612 = vmatpush.bf16.msra.mxu0 %v5746_v33 }
  0xf2   : > { %v806_v45 = vrot.slane %v730_v38, 1  ;;  %v1074_v46 = vrot.slane %v730_v38, 2 }
  0xf4   : > { %v581_v49 = vpop.f32.mrf.mxu0  ;;  %v807_v52 = vsel %vm792_vm8, %v804_v39, %v806_v45  ;;  %v1075_v53 = vsel %vm1060_vm9, %v1072_v19, %v1074_v46 }
  0xf5   : > { %v582_v54 = vadd.f32 %v5559_v42, %v581_v49  ;;  %v5702_v55 = vpack.c.bf16 %v807_v52, %v805_v51  ;;  %v5704_v57 = vpack.c.bf16 %v1075_v53, %v1073_v23  ;;  %v5761_v52 = vld [vmem:[%s8067_s5 + $0x68] sm:$0xff] }
  0xf6   : > { %v5766_v53 = vld [vmem:[%s8067_s5 + $0xc8] sm:$0xff]  ;;  %1290 = vmatpush.bf16.msrb.mxu1 %v5761_v52 }
  0xf7   : > { %672 = vst.msk [vmem:[#allocation2 + $0x50] sm:$0xff] %vm661_vm5, %v582_v54  ;;  %4709 = vmatmul.msk.bf16.gmra.mxu0 %vm497_vm1, %v455_v47  ;;  %4737 = vmatmul.msk.bf16.vlgmr.msra.gmra.mxu1 %vm661_vm5, %v5702_v55  ;;  %v701_v58 = vld [vmem:[#allocation2 + $0x48] sm:$0xff] }
  0xf8   : > { %v731_v61 = vmax.f32 %v701_v58, 0.0  ;;  %1613 = vmatpush.bf16.msra.mxu0 %v5766_v53  ;;  %v5776_v58 = vld [vmem:[%s8067_s5 + $0x60] sm:$0xff] }
  0xfa   : > { %v1076_v8 = vrot.slane %v731_v61, 2  ;;  %v808_v27 = vrot.slane %v731_v61, 1  ;;  %1291 = vmatpush.bf16.msrb.mxu1 %v5776_v58 }
  0xfc   : > { %v583_v59 = vpop.f32.mrf.mxu0 }
  0xfd   : > { %v584_v60 = vadd.f32 %v5559_v42, %v583_v59  ;;  %v5781_v59 = vld [vmem:[%s8067_s5 + $0xc0] sm:$0xff] }
  0xfe   : > { %v702_v62 = vld [vmem:[#allocation2 + $0x50] sm:$0xff]  ;;  %1614 = vmatpush.bf16.msra.mxu0 %v5781_v59  ;;  %1723 = vmatpush.bf16.msra.mxu1 %v6008_v18 }
  0xff   : > { %v642_v63 = vsel %vm399_vm6, %v584_v60, 0.0  ;;  %v732_v0 = vmax.f32 %v702_v62, 0.0 }
 0x100   : > { %673 = vst.msk [vmem:[#allocation2 + $0x58] sm:$0xff] %vm661_vm5, %v642_v63 }
 0x101   : > { %v5716_v7 = vpack.c.bf16 %v732_v0, %v731_v61  ;;  %v1077_v9 = vrot.slane %v732_v0, 2  ;;  %v809_v26 = vrot.slane %v732_v0, 1 }
 0x103   : > { %4762 = vmatmul.msk.bf16.gmra.mxu2 %vm661_vm5, %v5716_v7  ;;  %v1078_v11 = vsel %vm1060_vm9, %v1076_v8, %v1077_v9  ;;  %v810_v40 = vsel %vm792_vm8, %v808_v27, %v809_v26 }
 0x104   : > { %v586_v12 = vpop.f32.mrf.mxu0 }
 0x105   : > { %v587_v13 = vadd.f32 %v5559_v42, %v586_v12 }
 0x107   : > { %v643_v19 = vsel %vm394_vm3, %v587_v13, 0.0  ;;  %4710 = vmatmul.msk.bf16.gmra.mxu0 %vm497_vm1, %v456_v10  ;;  %v703_v23 = vld [vmem:[#allocation2 + $0x58] sm:$0xff] }
 0x108   : > { %674 = vst.msk [vmem:[#allocation2 + $0x60] sm:$0xff] %vm661_vm5, %v643_v19  ;;  %v733_v25 = vmax.f32 %v703_v23, 0.0 }
 0x10a   : > { %v811_v28 = vrot.slane %v733_v25, 1  ;;  %v1079_v38 = vrot.slane %v733_v25, 2 }
 0x10c   : > { %v588_v39 = vpop.f32.mrf.mxu0  ;;  %v812_v45 = vsel %vm792_vm8, %v809_v26, %v811_v28  ;;  %v1080_v46 = vsel %vm1060_vm9, %v1077_v9, %v1079_v38 }
 0x10d   : > { %v589_v47 = vadd.f32 %v5559_v42, %v588_v39  ;;  %v5754_v49 = vpack.c.bf16 %v812_v45, %v810_v40  ;;  %v5756_v51 = vpack.c.bf16 %v1080_v46, %v1078_v11 }
 0x10f   : > { %675 = vst.msk [vmem:[#allocation2 + $0x68] sm:$0xff] %vm661_vm5, %v589_v47  ;;  %4738 = vmatmul.msk.bf16.gmra.mxu1 %vm661_vm5, %v5754_v49  ;;  %v704_v54 = vld [vmem:[#allocation2 + $0x60] sm:$0xff] }
 0x110   : > { %v734_v62 = vmax.f32 %v704_v54, 0.0 }
 0x112   : > { %v1081_v8 = vrot.slane %v734_v62, 2  ;;  %v813_v13 = vrot.slane %v734_v62, 1 }
 0x114   : > { %v591_v60 = vpop.f32.mrf.mxu0 }
 0x115   : > { %v592_v61 = vadd.f32 %v5559_v42, %v591_v60  ;;  %v5826_v60 = vld [vmem:[%s8067_s5 + $0x58] sm:$0xff] }
 0x116   : > { %v705_v63 = vld [vmem:[#allocation2 + $0x68] sm:$0xff]  ;;  %1186 = vmatpush.bf16.msrb.mxu3 %v5826_v60 }
 0x117   : > { %v645_v0 = vsel %vm399_vm6, %v592_v61, 0.0  ;;  %4735 = vmatmul.msk.bf16.vlgmr.msrb.gmra.mxu0 %vm661_vm5, %v849_v20  ;;  %v735_v3 = vmax.f32 %v705_v63, 0.0 }
 0x118   : > { %676 = vst.msk [vmem:[#allocation2 + $0x70] sm:$0xff] %vm661_vm5, %v645_v0  ;;  %2443 = vmatpush.bf16.msrb.mxu0 %v5624_v22 }
 0x119   : > { %v5794_v4 = vpack.c.bf16 %v735_v3, %v734_v62  ;;  %v1082_v9 = vrot.slane %v735_v3, 2  ;;  %v814_v12 = vrot.slane %v735_v3, 1 }
 0x11b   : > { %4763 = vmatmul.msk.bf16.gmra.mxu2 %vm661_vm5, %v5794_v4  ;;  %v1083_v10 = vsel %vm1060_vm9, %v1081_v8, %v1082_v9  ;;  %v815_v26 = vsel %vm792_vm8, %v813_v13, %v814_v12 }
 0x11c   : > { %v593_v11 = vpop.f32.mrf.mxu0  ;;  %2444 = vmatpush.bf16.msrb.mxu0 %v5634_v24 }
 0x11d   : > { %v594_v5 = vadd.f32 %v5559_v42, %v593_v11 }
 0x11f   : > { %v646_v17 = vsel %vm394_vm3, %v594_v5, 0.0  ;;  %v706_v20 = vld [vmem:[#allocation2 + $0x70] sm:$0xff] }
 0x120   : > { %677 = vst.msk [vmem:[#allocation2 + $0x78] sm:$0xff] %vm661_vm5, %v646_v17  ;;  %v736_v22 = vmax.f32 %v706_v20, 0.0  ;;  %2445 = vmatpush.bf16.msrb.mxu0 %v5643_v31  ;;  %v5845_v17 = vld [vmem:[%s8067_s5 + $0x50] sm:$0xff] }
 0x121   : > { %1187 = vmatpush.bf16.msrb.mxu3 %v5845_v17 }
 0x122   : > { %v816_v19 = vrot.slane %v736_v22, 1  ;;  %v1084_v23 = vrot.slane %v736_v22, 2 }
 0x124   : > { %v596_v25 = vpop.f32.mrf.mxu0  ;;  %v817_v24 = vsel %vm792_vm8, %v814_v12, %v816_v19  ;;  %v1085_v27 = vsel %vm1060_vm9, %v1082_v9, %v1084_v23  ;;  %2446 = vmatpush.bf16.msrb.mxu0 %v5658_v48 }
 0x125   : > { %v597_v28 = vadd.f32 %v5559_v42, %v596_v25  ;;  %v5810_v38 = vpack.c.bf16 %v817_v24, %v815_v26  ;;  %v5812_v39 = vpack.c.bf16 %v1085_v27, %v1083_v10 }
 0x127   : > { %678 = vst.msk [vmem:[#allocation2 + $0x80] sm:$0xff] %vm661_vm5, %v597_v28  ;;  %4736 = vmatmul.msk.bf16.gmra.mxu0 %vm661_vm5, %v5675_v1  ;;  %4739 = vmatmul.msk.bf16.gmra.mxu1 %vm661_vm5, %v5810_v38  ;;  %v707_v31 = vld [vmem:[#allocation2 + $0x78] sm:$0xff] }
 0x128   : > { %v737_v46 = vmax.f32 %v707_v31, 0.0  ;;  %v5206_v28 = vld [vmem:[%s8067_s5 + $0x98] sm:$0xff] }
 0x129   : > { %1400 = vmatpush.bf16.msrb.mxu2 %v5206_v28 }
 0x12a   : > { %v1086_v62 = vrot.slane %v737_v46, 2  ;;  %v818_v20 = vrot.slane %v737_v46, 1 }
 0x12c   : > { %v598_v40 = vpop.f32.mrf.mxu0 }
 0x12d   : > { %v599_v45 = vadd.f32 %v5559_v42, %v598_v40 }
 0x12e   : > { %v708_v48 = vld [vmem:[#allocation2 + $0x80] sm:$0xff] }
 0x12f   : > { %v648_v47 = vsel %vm399_vm6, %v599_v45, 0.0  ;;  %v738_v54 = vmax.f32 %v708_v48, 0.0 }
 0x130   : > { %679 = vst.msk [vmem:[#allocation2 + $0x88] sm:$0xff] %vm661_vm5, %v648_v47 }
 0x131   : > { %v5828_v61 = vpack.c.bf16 %v738_v54, %v737_v46  ;;  %v1087_v63 = vrot.slane %v738_v54, 2  ;;  %v819_v5 = vrot.slane %v738_v54, 1  ;;  %v5205_v54 = vld [vmem:[%s8067_s5 + $0x90] sm:$0xff] }
 0x132   : > { %1401 = vmatpush.bf16.msrb.mxu2 %v5205_v54 }
 0x133   : > { %4764 = vmatmul.msk.bf16.gmra.mxu2 %vm661_vm5, %v5828_v61  ;;  %v1088_v0 = vsel %vm1060_vm9, %v1086_v62, %v1087_v63  ;;  %v5876_v62 = vld [vmem:[%s8067_s5 + $0x48] sm:$0xff] }
 0x134   : > { %v601_v3 = vpop.f32.mrf.mxu0  ;;  %1188 = vmatpush.bf16.msrb.mxu3 %v5876_v62 }
 0x135   : > { %v602_v8 = vadd.f32 %v5559_v42, %v601_v3  ;;  %v5204_v3 = vld [vmem:[%s8067_s5 + $0x88] sm:$0xff] }
 0x136   : > { %1402 = vmatpush.bf16.msrb.mxu2 %v5204_v3 }
 0x137   : > { %v649_v9 = vsel %vm394_vm3, %v602_v8, 0.0  ;;  %4823 = vmatmul.msk.bf16.vlgmr.msrb.gmra.mxu1 %vm661_vm5, %v5652_v43  ;;  %4919 = vmatmul.msk.bf16.vlgmr.msra.gmra.mxu0 %vm661_vm5, %v5687_v15  ;;  %v709_v10 = vld [vmem:[#allocation2 + $0x88] sm:$0xff]  ;;  %v820_v43 = vsel %vm792_vm8, %v818_v20, %v819_v5 }
 0x138   : > { %680 = vst.msk [vmem:[#allocation2 + $0x90] sm:$0xff] %vm661_vm5, %v649_v9  ;;  %v739_v11 = vmax.f32 %v709_v10, 0.0  ;;  %2801 = vmatpush.bf16.msra.mxu0 %v5206_v28 }
 0x13a   : > { %v821_v22 = vrot.slane %v739_v11, 1  ;;  %v1089_v12 = vrot.slane %v739_v11, 2 }
 0x13c   : > { %v603_v13 = vpop.f32.mrf.mxu0  ;;  %v822_v19 = vsel %vm792_vm8, %v819_v5, %v821_v22  ;;  %v1090_v23 = vsel %vm1060_vm9, %v1087_v63, %v1089_v12  ;;  %2802 = vmatpush.bf16.msra.mxu0 %v5205_v54  ;;  %v5203_v22 = vld [vmem:[%s8067_s5 + $0x80] sm:$0xff] }
 0x13d   : > { %v604_v25 = vadd.f32 %v5559_v42, %v603_v13  ;;  %v5852_v26 = vpack.c.bf16 %v822_v19, %v820_v43  ;;  %v5854_v24 = vpack.c.bf16 %v1090_v23, %v1088_v0  ;;  %v5898_v12 = vld [vmem:[%s8067_s5 + $0x40] sm:$0xff]  ;;  %1403 = vmatpush.bf16.msrb.mxu2 %v5203_v22 }
 0x13e   : > { %1189 = vmatpush.bf16.msrb.mxu3 %v5898_v12 }
 0x13f   : > { %681 = vst.msk [vmem:[#allocation2 + $0x98] sm:$0xff] %vm661_vm5, %v604_v25  ;;  %4740 = vmatmul.msk.bf16.vlgmr.msra.gmra.mxu3 %vm661_vm5, %v5852_v26  ;;  %v710_v27 = vld [vmem:[#allocation2 + $0x90] sm:$0xff]  ;;  %v5888_v11 = vpop.f32.mrf.mxu2 }
 0x140   : > { %v740_v45 = vmax.f32 %v710_v27, 0.0  ;;  %2803 = vmatpush.bf16.msra.mxu0 %v5204_v3 }
 0x142   : > { %v1091_v0 = vrot.slane %v740_v45, 2  ;;  %v823_v19 = vrot.slane %v740_v45, 1 }
 0x144   : > { %v606_v31 = vpop.f32.mrf.mxu0  ;;  %2804 = vmatpush.bf16.msra.mxu0 %v5203_v22 }
 0x145   : > { %v607_v40 = vadd.f32 %v5559_v42, %v606_v31 }
 0x146   : > { %v711_v46 = vld [vmem:[#allocation2 + $0x98] sm:$0xff] }
 0x147   : > { %v651_v48 = vsel %vm399_vm6, %v607_v40, 0.0  ;;  %4824 = vmatmul.msk.bf16.gmra.mxu1 %vm661_vm5, %v5687_v15  ;;  %4920 = vmatmul.msk.bf16.gmra.mxu0 %vm661_vm5, %v5716_v7  ;;  %v741_v47 = vmax.f32 %v711_v46, 0.0 }
 0x148   : > { %682 = vst.msk [vmem:[#allocation2 + $0xa0] sm:$0xff] %vm661_vm5, %v651_v48 }
 0x149   : > { %v5878_v63 = vpack.c.bf16 %v741_v47, %v740_v45  ;;  %v1092_v15 = vrot.slane %v741_v47, 2  ;;  %v824_v43 = vrot.slane %v741_v47, 1  ;;  %v5917_v45 = vpop.f32.mrf.mxu2 }
 0x14b   : > { %4765 = vmatmul.msk.bf16.gmra.mxu2 %vm661_vm5, %v5878_v63  ;;  %v1093_v8 = vsel %vm1060_vm9, %v1091_v0, %v1092_v15  ;;  %v825_v28 = vsel %vm792_vm8, %v823_v19, %v824_v43 }
 0x14c   : > { %v608_v9 = vpop.f32.mrf.mxu0 }
 0x14d   : > { %v609_v10 = vadd.f32 %v5559_v42, %v608_v9 }
 0x14f   : > { %v652_v5 = vsel %vm394_vm3, %v609_v10, 0.0  ;;  %v712_v20 = vld [vmem:[#allocation2 + $0xa0] sm:$0xff] }
 0x150   : > { %683 = vst.msk [vmem:[#allocation2 + $0xa8] sm:$0xff] %vm661_vm5, %v652_v5  ;;  %v742_v13 = vmax.f32 %v712_v20, 0.0 }
 0x152   : > { %v826_v23 = vrot.slane %v742_v13, 1  ;;  %v1094_v25 = vrot.slane %v742_v13, 2 }
 0x154   : > { %v611_v27 = vpop.f32.mrf.mxu0  ;;  %v827_v31 = vsel %vm792_vm8, %v824_v43, %v826_v23  ;;  %v1095_v40 = vsel %vm1060_vm9, %v1092_v15, %v1094_v25 }
 0x155   : > { %v612_v46 = vadd.f32 %v5559_v42, %v611_v27  ;;  %v5906_v48 = vpack.c.bf16 %v827_v31, %v825_v28  ;;  %v5908_v54 = vpack.c.bf16 %v1095_v40, %v1093_v8 }
 0x156   : > { %v5928_v5 = vpop.f32.mrf.mxu2 }
 0x157   : > { %684 = vst.msk [vmem:[#allocation2 + $0xb0] sm:$0xff] %vm661_vm5, %v612_v46  ;;  %4741 = vmatmul.msk.bf16.gmra.mxu3 %vm661_vm5, %v5906_v48  ;;  %4825 = vmatmul.msk.bf16.gmra.mxu1 %vm661_vm5, %v5716_v7  ;;  %v713_v47 = vld [vmem:[#allocation2 + $0xa8] sm:$0xff]  ;;  %v5926_v7 = vld [vmem:[%s8067_s5 + $0xb8] sm:$0xff] }
 0x158   : > { %4921 = vmatmul.msk.bf16.gmra.mxu0 %vm661_vm5, %v5794_v4  ;;  %v743_v3 = vmax.f32 %v713_v47, 0.0  ;;  %1509 = vmatpush.bf16.msra.mxu3 %v5926_v7  ;;  %v2179_v56 = vld [vmem:[#allocation2 + $0xa8] sm:$0xff] }
 0x15a   : > { %v1096_v22 = vrot.slane %v743_v3, 2  ;;  %v828_v40 = vrot.slane %v743_v3, 1 }
 0x15c   : > { %v613_v0 = vpop.f32.mrf.mxu0 }
 0x15d   : > { %v614_v15 = vadd.f32 %v5559_v42, %v613_v0 }
 0x15e   : > { %v714_v8 = vld [vmem:[#allocation2 + $0xb0] sm:$0xff]  ;;  %v5944_v0 = vpop.f32.mrf.mxu2 }
 0x15f   : > { %v654_v9 = vsel %vm399_vm6, %v614_v15, 0.0  ;;  %v744_v10 = vmax.f32 %v714_v8, 0.0 }
 0x160   : > { %685 = vst.msk [vmem:[#allocation2 + $0xb8] sm:$0xff] %vm661_vm5, %v654_v9 }
 0x161   : > { %v5930_v20 = vpack.c.bf16 %v744_v10, %v743_v3  ;;  %v1097_v13 = vrot.slane %v744_v10, 2  ;;  %v829_v31 = vrot.slane %v744_v10, 1 }
 0x163   : > { %4766 = vmatmul.msk.bf16.gmra.mxu2 %vm661_vm5, %v5930_v20  ;;  %v1098_v43 = vsel %vm1060_vm9, %v1096_v22, %v1097_v13  ;;  %v830_v8 = vsel %vm792_vm8, %v828_v40, %v829_v31 }
 0x164   : > { %v616_v19 = vpop.f32.mrf.mxu0 }
 0x165   : > { %v617_v23 = vadd.f32 %v5559_v42, %v616_v19 }
 0x167   : > { %v655_v25 = vsel %vm394_vm3, %v617_v23, 0.0  ;;  %4826 = vmatmul.msk.bf16.gmra.mxu1 %vm661_vm5, %v5794_v4  ;;  %v715_v27 = vld [vmem:[#allocation2 + $0xb8] sm:$0xff] }
 0x168   : > { %686 = vst.msk [vmem:[#allocation2 + $0xc0] sm:$0xff] %vm661_vm5, %v655_v25  ;;  %4922 = vmatmul.msk.bf16.gmra.mxu0 %vm661_vm5, %v5828_v61  ;;  %v745_v28 = vmax.f32 %v715_v27, 0.0 }
 0x16a   : > { %v831_v46 = vrot.slane %v745_v28, 1  ;;  %v1099_v47 = vrot.slane %v745_v28, 2  ;;  %v392_v28 = vstv %s391_s8 }
 0x16b   : > { %vm5971_vm10 = vcmp.eq.s32.totalorder %v392_v28, 1 }
 0x16c   : > { %v618_v15 = vpop.f32.mrf.mxu0  ;;  %v832_v9 = vsel %vm792_vm8, %v829_v31, %v831_v46  ;;  %v1100_v4 = vsel %vm1060_vm9, %v1097_v13, %v1099_v47  ;;  %vm5979_vm11 = vmand %vm5971_vm10, %vm394_vm3  ;;  %v8116_v31 = vmov 0  ;;  %v5209_v47 = vld [vmem:[%s8067_s5 + $0xb0] sm:$0xff] }
 0x16d   : > { %v619_v22 = vadd.f32 %v5559_v42, %v618_v15  ;;  %v5950_v19 = vpack.c.bf16 %v832_v9, %v830_v8  ;;  %v5952_v23 = vpack.c.bf16 %v1100_v4, %v1098_v43  ;;  %v8117_v31 = vsel %vm5979_vm11, 4294967295, %v8116_v31  ;;  %1510 = vmatpush.bf16.msra.mxu3 %v5209_v47  ;;  %vm6023_vm12 = vmand %vm5971_vm10, %vm399_vm6 }
 0x16e   : > { %v1030_v3 = vpop.f32.mrf.mxu2  ;;  %8118 = vst [vmem:[#allocation8_spill] sm:$0xff] %v8117_v31 }
 0x16f   : > { %687 = vst.msk [vmem:[#allocation2 + $0xc8] sm:$0xff] %vm661_vm5, %v619_v22  ;;  %4742 = vmatmul.msk.bf16.gmra.mxu3 %vm661_vm5, %v5950_v19  ;;  %v6017_v22 = vld [vmem:[%s8067_s5 + $0xf0] sm:$0xff] }
 0x170   : > { %1724 = vmatpush.bf16.msra.mxu1 %v6017_v22 }
 0x173   : > { %4855 = vmatmul.msk.bf16.vlgmr.msrb.gmra.mxu2 %vm661_vm5, %v5675_v1  ;;  %v8113_v1 = vmov 0 }
 0x174   : > { %v621_v10 = vpop.f32.mrf.mxu0  ;;  %v933_v25 = vpop.f32.mrf.mxu1  ;;  %v8114_v1 = vsel %vm5971_vm10, 4294967295, %v8113_v1 }
 0x175   : > { %v622_v13 = vadd.f32 %v5559_v42, %v621_v10  ;;  %v5962_v27 = vadd.f32 %v1030_v3, %v933_v25  ;;  %8115 = vst [vmem:[#allocation7_spill] sm:$0xff] %v8114_v1 }
 0x176   : > { %v5994_v15 = vpop.f32.mrf.mxu2 }
 0x177   : > { %v657_v43 = vsel %vm399_vm6, %v622_v13, 0.0  ;;  %4827 = vmatmul.msk.bf16.gmra.mxu1 %vm661_vm5, %v5828_v61 }
 0x178   : > { %688 = vst.msk [vmem:[#allocation2 + $0xd0] sm:$0xff] %vm661_vm5, %v657_v43  ;;  %4923 = vmatmul.msk.bf16.gmra.mxu0 %vm661_vm5, %v5878_v63  ;;  %v716_v43 = vld [vmem:[#allocation2 + $0xc0] sm:$0xff] }
 0x17c   : > { %v623_v40 = vpop.f32.mrf.mxu0  ;;  %v5998_v8 = vpop.f32.mrf.mxu1 }
 0x17d   : > { %v624_v61 = vadd.f32 %v5559_v42, %v623_v40  ;;  %v717_v40 = vld [vmem:[#allocation2 + $0xc8] sm:$0xff] }
 0x17f   : > { %v658_v46 = vsel %vm5979_vm11, %v624_v61, 0.0  ;;  %4791 = vmatmul.msk.bf16.vlgmr.msrb.gmra.mxu3 %vm661_vm5, %v1117_v21  ;;  %v6038_v61 = vld [vmem:[%s8067_s5 + $0xe8] sm:$0xff] }
 0x180   : > { %689 = vst.msk [vmem:[#allocation2 + $0xd8] sm:$0xff] %vm661_vm5, %v658_v46  ;;  %1725 = vmatpush.bf16.msra.mxu1 %v6038_v61  ;;  %v6044_v46 = vmax.f32 %v717_v40, 0.0 }
 0x183   : > { %4856 = vmatmul.msk.bf16.gmra.mxu2 %vm661_vm5, %v5702_v55 }
 0x184   : > { %v626_v9 = vpop.f32.mrf.mxu0 }
 0x185   : > { %v627_v4 = vadd.f32 %v5559_v42, %v626_v9  ;;  %v6051_v9 = vld [vmem:[%s8067_s5 + $0xe0] sm:$0xff] }
 0x186   : > { %v1035_v21 = vpop.f32.mrf.mxu2  ;;  %1726 = vmatpush.bf16.msra.mxu1 %v6051_v9 }
 0x187   : > { %v659_v6 = vsel %vm5971_vm10, %v627_v4, 0.0  ;;  %4828 = vmatmul.msk.bf16.gmra.mxu1 %vm661_vm5, %v5878_v63  ;;  %v8119_v63 = vmov 0 }
 0x188   : > { %690 = vst.msk [vmem:[#allocation2 + $0xe0] sm:$0xff] %vm661_vm5, %v659_v6  ;;  %4924 = vmatmul.msk.bf16.gmra.mxu0 %vm661_vm5, %v5930_v20  ;;  %v8120_v63 = vsel %vm6023_vm12, 4294967295, %v8119_v63 }
 0x189   : > { %8121 = vst [vmem:[#allocation9_spill] sm:$0xff] %v8120_v63  ;;  %v1353_v63 = vrot.slane %v6044_v46, 1 }
 0x18a   : > { %2516 = vmatpush.bf16.msrb.mxu1 %v5521_v29  ;;  %v5208_v29 = vld [vmem:[%s8067_s5 + $0xa8] sm:$0xff] }
 0x18b   : > { %1511 = vmatpush.bf16.msra.mxu3 %v5208_v29 }
 0x18c   : > { %v628_v3 = vpop.f32.mrf.mxu0  ;;  %v938_v10 = vpop.f32.mrf.mxu1 }
 0x18d   : > { %v629_v25 = vadd.f32 %v5559_v42, %v628_v3  ;;  %v6028_v13 = vadd.f32 %v1035_v21, %v938_v10  ;;  %v6042_v42 = vmax.f32 %v716_v43, 0.0  ;;  %v5207_v43 = vld [vmem:[%s8067_s5 + $0xa0] sm:$0xff] }
 0x18e   : > { %2517 = vmatpush.bf16.msrb.mxu1 %v5527_v30  ;;  %v6061_v6 = vpop.f32.mrf.mxu2 }
 0x18f   : > { %v660_v28 = vsel %vm6023_vm12, %v629_v25, 0.0  ;;  %4792 = vmatmul.msk.bf16.gmra.mxu3 %vm661_vm5, %v5677_v2  ;;  %v1247_v4 = vpack.c.bf16 %v6044_v46, %v6042_v42  ;;  %v1352_v36 = vrot.slane %v6042_v42, 1 }
 0x190   : > { %691 = vst.msk [vmem:[#allocation2 + $0xe8] sm:$0xff] %vm661_vm5, %v660_v28  ;;  %1512 = vmatpush.bf16.msra.mxu3 %v5207_v43 }
 0x191   : > { %v1354_v50 = vsel %vm792_vm8, %v1352_v36, %v1353_v63 }
 0x192   : > { %2518 = vmatpush.bf16.msrb.mxu1 %v5535_v34  ;;  %v1966_v34 = vld [vmem:[%s8065_s3 + $0x20] sm:$0xf] }
 0x193   : > { %4857 = vmatmul.msk.bf16.gmra.mxu2 %vm661_vm5, %v5754_v49 }
 0x194   : > { %v6063_v21 = vpop.f32.mrf.mxu1 }
 0x196   : > { %2519 = vmatpush.bf16.msrb.mxu1 %v5543_v35  ;;  %v1988_v35 = vunpack.c.l.b16 %v1966_v34 }
 0x197   : > { %4829 = vmatmul.msk.bf16.gmra.mxu1 %vm661_vm5, %v5930_v20 }
 0x198   : > { %4925 = vmatmul.msk.bf16.gmra.mxu0 %vm661_vm5, %v1247_v4  ;;  %v1993_v25 = vpack.c.b16 %v1988_v35, %v1988_v35  ;;  %v6133_v35 = vld [vmem:[#allocation2 + $0xd0] sm:$0xff] }
 0x19a   : > { %v6090_v28 = vsel %vm543_vm0, %v1993_v25, 0 }
 0x19b   : > { %2049 = vmatpush.bf16.msrb.mxu3 %v6090_v28 }
 0x19e   : > { %v1040_v30 = vpop.f32.mrf.mxu2 }
 0x19f   : > { %4793 = vmatmul.msk.bf16.gmra.mxu3 %vm661_vm5, %v5704_v57 }
 0x1a3   : > { %4858 = vmatmul.msk.bf16.gmra.mxu2 %vm661_vm5, %v5810_v38 }
 0x1a4   : > { %v943_v20 = vpop.f32.mrf.mxu1 }
 0x1a5   : > { %v6074_v3 = vadd.f32 %v1040_v30, %v943_v20  ;;  %v6121_v30 = vld [vmem:[%s8067_s5 + $0x108] sm:$0xff] }
 0x1a6   : > { %v6087_v10 = vpop.f32.mrf.mxu2  ;;  %8124 = vst [vmem:[#allocation12_spill] sm:$0xff] %v6121_v30 }
 0x1a7   : > { %4830 = vmatmul.msk.bf16.gmra.mxu1 %vm661_vm5, %v1247_v4 }
 0x1ac   : > { %v6097_v40 = vpop.f32.mrf.mxu1 }
 0x1af   : > { %4794 = vmatmul.msk.bf16.gmra.mxu3 %vm661_vm5, %v5756_v51 }
 0x1b3   : > { %4859 = vmatmul.msk.bf16.gmra.mxu2 %vm661_vm5, %v5852_v26 }
 0x1b4   : > { %v1293_v20 = vpop.f32.mrf.mxu1 }
 0x1b7   : > { %4951 = vmatmul.msk.bf16.vlgmr.msra.gmra.mxu1 %vm661_vm5, %v5702_v55  ;;  %v1045_v55 = vpop.f32.mrf.mxu2 }
 0x1b8   : > { %2877 = vmatpush.bf16.msra.mxu1 %v5926_v7 }
 0x1bc   : > { %2878 = vmatpush.bf16.msra.mxu1 %v5209_v47  ;;  %v6107_v47 = vld [vmem:[%s8067_s5 + $0x118] sm:$0xff] }
 0x1bd   : > { %8122 = vst [vmem:[#allocation10_spill] sm:$0xff] %v6107_v47  ;;  %1832 = vmatpush.bf16.msra.mxu2 %v6107_v47 }
 0x1bf   : > { %4795 = vmatmul.msk.bf16.gmra.mxu3 %vm661_vm5, %v5812_v39  ;;  %v6123_v34 = vpop.f32.mrf.mxu2 }
 0x1c0   : > { %2879 = vmatpush.bf16.msra.mxu1 %v5208_v29  ;;  %v6115_v29 = vld [vmem:[%s8067_s5 + $0x110] sm:$0xff] }
 0x1c1   : > { %8123 = vst [vmem:[#allocation11_spill] sm:$0xff] %v6115_v29  ;;  %1833 = vmatpush.bf16.msra.mxu2 %v6115_v29 }
 0x1c2   : > { %v948_v7 = vpop.f32.mrf.mxu3 }
 0x1c3   : > { %v6100_v4 = vadd.f32 %v1045_v55, %v948_v7  ;;  %4860 = vmatmul.msk.bf16.gmra.mxu2 %vm661_vm5, %v5906_v48  ;;  %v8083_v55 = vmax.f32 %v6133_v35, 0.0  ;;  %v1295_v7 = vpop.f32.mrf.mxu1 }
 0x1c4   : > { %2880 = vmatpush.bf16.msra.mxu1 %v5207_v43 }
 0x1c5   : > { %1834 = vmatpush.bf16.msra.mxu2 %v6121_v30  ;;  %v1355_v1 = vrot.slane %v8083_v55, 1 }
 0x1c7   : > { %4952 = vmatmul.msk.bf16.gmra.mxu1 %vm661_vm5, %v5754_v49  ;;  %v6131_v49 = vld [vmem:[%s8067_s5 + $0x100] sm:$0xff] }
 0x1c8   : > { %8125 = vst [vmem:[#allocation13_spill] sm:$0xff] %v6131_v49 }
 0x1c9   : > { %1835 = vmatpush.bf16.msra.mxu2 %v6131_v49  ;;  %v1356_v49 = vsel %vm792_vm8, %v1353_v63, %v1355_v1 }
 0x1ca   : > { %v6136_v25 = vpop.f32.mrf.mxu3 }
 0x1cb   : > { %v1298_v30 = vpop.f32.mrf.mxu1 }
 0x1cd   : > { %2653 = vmatpush.bf16.msrb.mxu2 %v5826_v60 }
 0x1ce   : > { %v1050_v43 = vpop.f32.mrf.mxu2 }
 0x1cf   : > { %4796 = vmatmul.msk.bf16.gmra.mxu3 %vm661_vm5, %v5854_v24 }
 0x1d1   : > { %2654 = vmatpush.bf16.msrb.mxu2 %v5845_v17 }
 0x1d3   : > { %4861 = vmatmul.msk.bf16.gmra.mxu2 %vm661_vm5, %v5950_v19  ;;  %v1300_v36 = vpop.f32.mrf.mxu1 }
 0x1d5   : > { %2655 = vmatpush.bf16.msrb.mxu2 %v5876_v62 }
 0x1d6   : > { %v1052_v17 = vpop.f32.mrf.mxu2 }
 0x1d7   : > { %4953 = vmatmul.msk.bf16.gmra.mxu1 %vm661_vm5, %v5810_v38  ;;  %v1359_v38 = vpack.c.bf16 %v1356_v49, %v1354_v50 }
 0x1d9   : > { %2656 = vmatpush.bf16.msrb.mxu2 %v5898_v12 }
 0x1da   : > { %v953_v60 = vpop.f32.mrf.mxu3 }
 0x1db   : > { %v6150_v31 = vadd.f32 %v1050_v43, %v953_v60  ;;  %v1303_v50 = vpop.f32.mrf.mxu1 }
 0x1df   : > { %4797 = vmatmul.msk.bf16.gmra.mxu3 %vm661_vm5, %v5908_v54 }
 0x1e2   : > { %v955_v29 = vpop.f32.mrf.mxu3 }
 0x1e3   : > { %v6157_v47 = vadd.f32 %v1052_v17, %v955_v29  ;;  %4862 = vmatmul.msk.bf16.gmra.mxu2 %vm661_vm5, %v1359_v38  ;;  %v6172_v29 = vld [vmem:[%s8065_s3 + $0x18] sm:$0xff] }
 0x1e4   : > { %8126 = vst [vmem:[#allocation14_spill] sm:$0xff] %v6172_v29  ;;  %2050 = vmatpush.bf16.msrb.mxu3 %v6172_v29 }
 0x1e6   : > { %v1055_v62 = vpop.f32.mrf.mxu2 }
 0x1e7   : > { %4954 = vmatmul.msk.bf16.gmra.mxu1 %vm661_vm5, %v5852_v26  ;;  %v923_v26 = vpop.f32.mrf.mxu0 }
 0x1ee   : > { %v1057_v43 = vpop.f32.mrf.mxu2 }
 0x1ef   : > { %4798 = vmatmul.msk.bf16.gmra.mxu3 %vm661_vm5, %v5952_v23 }
 0x1f2   : > { %v958_v12 = vpop.f32.mrf.mxu3 }
 0x1f3   : > { %v6164_v1 = vadd.f32 %v1055_v62, %v958_v12  ;;  %4983 = vmatmul.msk.bf16.vlgmr.msra.gmra.mxu2 %vm661_vm5, %v5704_v57  ;;  %v1021_v62 = vadd.f32 %v5888_v11, %v923_v26 }
 0x1f4   : > { %2946 = vmatpush.bf16.msra.mxu2 %v5730_v16  ;;  %v1305_v16 = vpop.f32.mrf.mxu1 }
 0x1f6   : > { %v1405_v63 = vpop.f32.mrf.mxu2 }
 0x1f7   : > { %4955 = vmatmul.msk.bf16.gmra.mxu1 %vm661_vm5, %v5906_v48  ;;  %v925_v48 = vpop.f32.mrf.mxu0 }
 0x1f8   : > { %2947 = vmatpush.bf16.msra.mxu2 %v5746_v33 }
 0x1fa   : > { %v960_v49 = vpop.f32.mrf.mxu3 }
 0x1fb   : > { %v6178_v60 = vadd.f32 %v1057_v43, %v960_v49 }
 0x1fc   : > { %2948 = vmatpush.bf16.msra.mxu2 %v5766_v53  ;;  %v1308_v49 = vpop.f32.mrf.mxu1 }
 0x1fe   : > { %v1407_v17 = vpop.f32.mrf.mxu2 }
 0x1ff   : > { %4887 = vmatmul.msk.bf16.vlgmr.msra.gmra.mxu3 %vm661_vm5, %v5677_v2  ;;  %v1023_v2 = vadd.f32 %v5917_v45, %v925_v48  ;;  %v928_v29 = vpop.f32.mrf.mxu0 }
 0x200   : > { %2949 = vmatpush.bf16.msra.mxu2 %v5781_v59 }
 0x202   : > { %v1191_v12 = vpop.f32.mrf.mxu3 }
 0x203   : > { %v1231_v55 = vadd.f32 %v1191_v12, %v1021_v62  ;;  %4984 = vmatmul.msk.bf16.gmra.mxu2 %vm661_vm5, %v5756_v51 }
 0x205   : > { %v1333_v33 = vadd.f32 %v1293_v20, %v1231_v55  ;;  %v1026_v20 = vadd.f32 %v5928_v5, %v928_v29  ;;  %v1310_v55 = vpop.f32.mrf.mxu1 }
 0x206   : > { %v1410_v43 = vpop.f32.mrf.mxu2 }
 0x207   : > { %4956 = vmatmul.msk.bf16.gmra.mxu1 %vm661_vm5, %v5950_v19  ;;  %v6189_v53 = vadd.f32 %v1405_v63, %v1333_v33  ;;  %v930_v45 = vpop.f32.mrf.mxu0 }
 0x208   : > { %v1028_v5 = vadd.f32 %v5944_v0, %v930_v45 }
 0x20a   : > { %v1193_v37 = vpop.f32.mrf.mxu3 }
 0x20b   : > { %v1232_v59 = vadd.f32 %v1193_v37, %v1023_v2  ;;  %v6202_v37 = vld [vmem:[%s8065_s3 + $0x10] sm:$0xff] }
 0x20c   : > { %2051 = vmatpush.bf16.msrb.mxu3 %v6202_v37 }
 0x20d   : > { %v1334_v11 = vadd.f32 %v1295_v7, %v1232_v59  ;;  %v1313_v48 = vpop.f32.mrf.mxu1 }
 0x20e   : > { %v1412_v26 = vpop.f32.mrf.mxu2 }
 0x20f   : > { %4888 = vmatmul.msk.bf16.gmra.mxu3 %vm661_vm5, %v5704_v57  ;;  %v6194_v62 = vadd.f32 %v1407_v17, %v1334_v11 }
 0x212   : > { %v1196_v12 = vpop.f32.mrf.mxu3 }
 0x213   : > { %v1233_v19 = vadd.f32 %v1196_v12, %v1026_v20  ;;  %4985 = vmatmul.msk.bf16.gmra.mxu2 %vm661_vm5, %v5812_v39 }
 0x215   : > { %v1335_v63 = vadd.f32 %v1298_v30, %v1233_v19 }
 0x216   : > { %v1415_v7 = vpop.f32.mrf.mxu2 }
 0x217   : > { %4957 = vmatmul.msk.bf16.gmra.mxu1 %vm661_vm5, %v1359_v38  ;;  %v6206_v57 = vadd.f32 %v1410_v43, %v1335_v63  ;;  %v6216_v43 = vpop.f32.mrf.mxu1 }
 0x21a   : > { %v1198_v29 = vpop.f32.mrf.mxu3 }
 0x21b   : > { %v1234_v17 = vadd.f32 %v1198_v29, %v1028_v5  ;;  %v1038_v5 = vadd.f32 %v6061_v6, %v6063_v21 }
 0x21d   : > { %v1336_v33 = vadd.f32 %v1300_v36, %v1234_v17  ;;  %v1033_v36 = vadd.f32 %v5994_v15, %v5998_v8 }
 0x21e   : > { %v1417_v30 = vpop.f32.mrf.mxu2 }
 0x21f   : > { %4889 = vmatmul.msk.bf16.gmra.mxu3 %vm661_vm5, %v5756_v51  ;;  %v6211_v2 = vadd.f32 %v1412_v26, %v1336_v33  ;;  %v6225_v26 = vld [vmem:[%s8065_s3 + $0x8] sm:$0xff]  ;;  %v1318_v63 = vpop.f32.mrf.mxu1 }
 0x220   : > { %2052 = vmatpush.bf16.msrb.mxu3 %v6225_v26 }
 0x222   : > { %v1201_v59 = vpop.f32.mrf.mxu3 }
 0x223   : > { %v1235_v11 = vadd.f32 %v1201_v59, %v5962_v27  ;;  %4986 = vmatmul.msk.bf16.gmra.mxu2 %vm661_vm5, %v5854_v24  ;;  %v719_v59 = vld [vmem:[#allocation2 + $0xd8] sm:$0xff] }
 0x225   : > { %v1337_v38 = vadd.f32 %v1303_v50, %v1235_v11  ;;  %v721_v11 = vld [vmem:[#allocation2 + $0xe8] sm:$0xff] }
 0x226   : > { %v1420_v0 = vpop.f32.mrf.mxu2 }
 0x227   : > { %v6218_v20 = vadd.f32 %v1415_v7, %v1337_v38  ;;  %v6239_v29 = vpop.f32.mrf.mxu1  ;;  %v749_v38 = vmax.f32 %v719_v59, 0.0 }
 0x22a   : > { %v1203_v12 = vpop.f32.mrf.mxu3 }
 0x22b   : > { %v1236_v19 = vadd.f32 %v1203_v12, %v1033_v36  ;;  %v751_v36 = vmax.f32 %v721_v11, 0.0 }
 0x22d   : > { %v1338_v51 = vadd.f32 %v1305_v16, %v1236_v19 }
 0x22e   : > { %v1422_v27 = vpop.f32.mrf.mxu2 }
 0x22f   : > { %4890 = vmatmul.msk.bf16.gmra.mxu3 %vm661_vm5, %v5812_v39  ;;  %v6229_v50 = vadd.f32 %v1417_v30, %v1338_v51  ;;  %v1323_v51 = vpop.f32.mrf.mxu1 }
 0x232   : > { %v1206_v45 = vpop.f32.mrf.mxu3 }
 0x233   : > { %v1237_v15 = vadd.f32 %v1206_v45, %v6028_v13  ;;  %4987 = vmatmul.msk.bf16.gmra.mxu2 %vm661_vm5, %v5908_v54  ;;  %v1678_v45 = vrot.slane %v751_v36, 1 }
 0x235   : > { %v1339_v8 = vadd.f32 %v1308_v49, %v1237_v15  ;;  %v720_v49 = vld [vmem:[#allocation2 + $0xe0] sm:$0xff] }
 0x236   : > { %v1425_v16 = vpop.f32.mrf.mxu2 }
 0x237   : > { %v6235_v7 = vadd.f32 %v1420_v0, %v1339_v8  ;;  %v750_v0 = vmax.f32 %v720_v49, 0.0  ;;  %v6255_v8 = vld [vmem:[%s8065_s3] sm:$0xff]  ;;  %v1043_v49 = vadd.f32 %v6087_v10, %v6097_v40 }
 0x238   : > { %2053 = vmatpush.bf16.msrb.mxu3 %v6255_v8 }
 0x239   : > { %v1570_v21 = vpack.c.bf16 %v750_v0, %v749_v38  ;;  %v1676_v19 = vrot.slane %v750_v0, 1 }
 0x23a   : > { %v1208_v39 = vpop.f32.mrf.mxu3 }
 0x23b   : > { %v1238_v17 = vadd.f32 %v1208_v39, %v1038_v5  ;;  %4926 = vmatmul.msk.bf16.gmra.mxu0 %vm661_vm5, %v1570_v21 }
 0x23c   : > { %2722 = vmatpush.bf16.msra.mxu3 %v5725_v14 }
 0x23d   : > { %v1340_v33 = vadd.f32 %v1310_v55, %v1238_v17  ;;  %v1675_v55 = vrot.slane %v749_v38, 1  ;;  %v1461_v17 = vrot.slane %v6042_v42, 2 }
 0x23e   : > { %v6241_v30 = vpop.f32.mrf.mxu2 }
 0x23f   : > { %4891 = vmatmul.msk.bf16.gmra.mxu3 %vm661_vm5, %v5854_v24  ;;  %v6245_v13 = vadd.f32 %v1422_v27, %v1340_v33  ;;  %v1677_v27 = vsel %vm792_vm8, %v1675_v55, %v1676_v19  ;;  %v1462_v33 = vrot.slane %v6044_v46, 2  ;;  %v6274_v46 = vpop.f32.mrf.mxu1 }
 0x240   : > { %2723 = vmatpush.bf16.msra.mxu3 %v5741_v32 }
 0x242   : > { %v1211_v12 = vpop.f32.mrf.mxu3 }
 0x243   : > { %v1239_v6 = vadd.f32 %v1211_v12, %v6074_v3  ;;  %4988 = vmatmul.msk.bf16.gmra.mxu2 %vm661_vm5, %v5952_v23  ;;  %v1679_v3 = vsel %vm792_vm8, %v1676_v19, %v1678_v45  ;;  %v1784_v19 = vrot.slane %v749_v38, 2  ;;  %v1785_v45 = vrot.slane %v750_v0, 2 }
 0x244   : > { %v1682_v5 = vpack.c.bf16 %v1679_v3, %v1677_v27  ;;  %2724 = vmatpush.bf16.msra.mxu3 %v5761_v52 }
 0x245   : > { %v1341_v24 = vadd.f32 %v1313_v48, %v1239_v6  ;;  %v8127_v48 = vmax.f32 %v6133_v35, 0.0 }
 0x246   : > { %v1430_v15 = vpop.f32.mrf.mxu2  ;;  %4958 = vmatmul.msk.bf16.gmra.mxu1 %vm661_vm5, %v1682_v5  ;;  %v1616_v5 = vpop.f32.mrf.mxu0 }
 0x247   : > { %v6258_v39 = vadd.f32 %v1425_v16, %v1341_v24  ;;  %v1464_v59 = vrot.slane %v8127_v48, 2  ;;  %v1463_v16 = vsel %vm1060_vm9, %v1461_v17, %v1462_v33  ;;  %v1328_v55 = vpop.f32.mrf.mxu1  ;;  %v1787_v24 = vrot.slane %v751_v36, 2 }
 0x248   : > { %2725 = vmatpush.bf16.msra.mxu3 %v5776_v58 }
 0x249   : > { %v1465_v42 = vsel %vm1060_vm9, %v1462_v33, %v1464_v59  ;;  %v1788_v3 = vsel %vm1060_vm9, %v1785_v45, %v1787_v24 }
 0x24a   : > { %v1213_v11 = vpop.f32.mrf.mxu3  ;;  %v1468_v10 = vpack.c.bf16 %v1465_v42, %v1463_v16  ;;  %v1913_v42 = vld [vmem:[%s6315_s13] sm:$0xff] }
 0x24b   : > { %v6269_v12 = vadd.f32 %v1213_v11, %v1043_v49 }
 0x24e   : > { %v6276_v35 = vpop.f32.mrf.mxu2 }
 0x24f   : > { %4892 = vmatmul.msk.bf16.gmra.mxu3 %vm661_vm5, %v5908_v54  ;;  %v1048_v54 = vadd.f32 %v6123_v34, %v6136_v25 }
 0x252   : > { %v1216_v14 = vpop.f32.mrf.mxu3 }
 0x253   : > { %v1241_v40 = vadd.f32 %v1216_v14, %v6100_v4  ;;  %4989 = vmatmul.msk.bf16.gmra.mxu2 %vm661_vm5, %v1468_v10  ;;  %v1786_v4 = vsel %vm1060_vm9, %v1784_v19, %v1785_v45 }
 0x254   : > { %v1791_v58 = vpack.c.bf16 %v1788_v3, %v1786_v4  ;;  %v1916_v3 = vld [vmem:[%s6315_s13 + $0x18] sm:$0xff] }
 0x255   : > { %v1343_v6 = vadd.f32 %v1318_v63, %v1241_v40 }
 0x256   : > { %v1435_v21 = vpop.f32.mrf.mxu2 }
 0x257   : > { %v6284_v32 = vadd.f32 %v1430_v15, %v1343_v6  ;;  %v6296_v15 = vpop.f32.mrf.mxu1 }
 0x25a   : > { %v1218_v27 = vpop.f32.mrf.mxu3 }
 0x25b   : > { %v6288_v52 = vadd.f32 %v1218_v27, %v1048_v54 }
 0x25e   : > { %v6292_v63 = vpop.f32.mrf.mxu2 }
 0x25f   : > { %4893 = vmatmul.msk.bf16.gmra.mxu3 %vm661_vm5, %v5952_v23  ;;  %v1728_v48 = vpop.f32.mrf.mxu1 }
 0x262   : > { %v1221_v38 = vpop.f32.mrf.mxu3 }
 0x263   : > { %v1243_v0 = vadd.f32 %v1221_v38, %v6150_v31  ;;  %4990 = vmatmul.msk.bf16.gmra.mxu2 %vm661_vm5, %v1791_v58  ;;  %v6309_v31 = vpop.f32.mrf.mxu0 }
 0x264   : > { %8128 = vst [vmem:[#allocation15_spill] sm:$0xff] %v6309_v31 }
 0x265   : > { %v1345_v34 = vadd.f32 %v1323_v51, %v1243_v0 }
 0x266   : > { %v1440_v25 = vpop.f32.mrf.mxu2 }
 0x267   : > { %v6300_v36 = vadd.f32 %v1435_v21, %v1345_v34 }
 0x26a   : > { %v1223_v17 = vpop.f32.mrf.mxu3 }
 0x26b   : > { %v6303_v33 = vadd.f32 %v1223_v17, %v6157_v47  ;;  %v6317_v47 = vpop.f32.mrf.mxu1  ;;  %v1621_v6 = vpop.f32.mrf.mxu0 }
 0x26c   : > { %8129 = vst [vmem:[#allocation16_spill] sm:$0xff] %v6317_v47 }
 0x26e   : > { %v6305_v23 = vpop.f32.mrf.mxu2 }
 0x26f   : > { %4894 = vmatmul.msk.bf16.gmra.mxu3 %vm661_vm5, %v1468_v10  ;;  %v1914_v10 = vld [vmem:[%s6315_s13 + $0x8] sm:$0xff] }
 0x270   : > { %v1943_v40 = vpack.c.bf16 %v1914_v10, %v1913_v42 }
 0x272   : > { %v1226_v59 = vpop.f32.mrf.mxu3 }
 0x273   : > { %v1245_v49 = vadd.f32 %v1226_v59, %v6164_v1  ;;  %v6332_v4 = vpop.f32.mrf.mxu0 }
 0x274   : > { %8131 = vst [vmem:[#allocation18_spill] sm:$0xff] %v6332_v4  ;;  %v2178_v4 = vld [vmem:[#allocation2 + $0xa0] sm:$0xff] }
 0x275   : > { %v1347_v51 = vadd.f32 %v1328_v55, %v1245_v49  ;;  %v1733_v55 = vpop.f32.mrf.mxu1  ;;  %v1917_v49 = vld [vmem:[%s6315_s13 + $0x20] sm:$0xff] }
 0x276   : > { %v1837_v11 = vpop.f32.mrf.mxu2 }
 0x277   : > { %v6319_v16 = vadd.f32 %v1440_v25, %v1347_v51  ;;  %v1918_v51 = vld [vmem:[%s6315_s13 + $0x28] sm:$0xff] }
 0x278   : > { %v1945_v42 = vpack.c.bf16 %v1918_v51, %v1917_v49  ;;  %v1922_v49 = vld [vmem:[%s6315_s13 + $0x48] sm:$0xff] }
 0x27a   : > { %v1228_v14 = vpop.f32.mrf.mxu3 }
 0x27b   : > { %v6324_v1 = vadd.f32 %v1228_v14, %v6178_v60  ;;  %v1915_v60 = vld [vmem:[%s6315_s13 + $0x10] sm:$0xff]  ;;  %v1626_v34 = vpop.f32.mrf.mxu0 }
 0x27d   : > { %v6339_v38 = vpop.f32.mrf.mxu1 }
 0x27e   : > { %v6326_v21 = vpop.f32.mrf.mxu2  ;;  %8133 = vst [vmem:[#allocation20_spill] sm:$0xff] %v6339_v38 }
 0x27f   : > { %8130 = vst [vmem:[#allocation17_spill] sm:$0xff] %v6326_v21  ;;  %5007 = vmatmul.msk.bf16.vlgmr.msrb.gmra.mxu3 %vm497_vm1, %v1943_v40  ;;  %v3253_v21 = vld [vmem:[%s7008_s21 + $0x18] sm:$0xff] }
 0x280   : > { %3025 = vmatpush.bf16.msrb.mxu3 %v6008_v18 }
 0x282   : > { %v1514_v19 = vpop.f32.mrf.mxu3 }
 0x283   : > { %v1554_v45 = vadd.f32 %v1514_v19, %v6189_v53  ;;  %v6356_v10 = vpop.f32.mrf.mxu0 }
 0x284   : > { %3026 = vmatpush.bf16.msrb.mxu3 %v6017_v22  ;;  %v1944_v22 = vpack.c.bf16 %v1916_v3, %v1915_v60  ;;  %8138 = vst [vmem:[#allocation25_spill] sm:$0xff] %v6356_v10 }
 0x285   : > { %v1656_v24 = vadd.f32 %v1616_v5, %v1554_v45  ;;  %v1738_v5 = vpop.f32.mrf.mxu1 }
 0x286   : > { %v1842_v54 = vpop.f32.mrf.mxu2 }
 0x287   : > { %v1768_v27 = vadd.f32 %v1728_v48, %v1656_v24 }
 0x288   : > { %3027 = vmatpush.bf16.msrb.mxu3 %v6038_v61 }
 0x289   : > { %v6337_v58 = vadd.f32 %v1837_v11, %v1768_v27 }
 0x28a   : > { %v1516_v18 = vpop.f32.mrf.mxu3 }
 0x28b   : > { %8132 = vst [vmem:[#allocation19_spill] sm:$0xff] %v6337_v58  ;;  %v6342_v53 = vadd.f32 %v1516_v18, %v6194_v62  ;;  %v1631_v19 = vpop.f32.mrf.mxu0 }
 0x28c   : > { %3028 = vmatpush.bf16.msrb.mxu3 %v6051_v9 }
 0x28d   : > { %8134 = vst [vmem:[#allocation21_spill] sm:$0xff] %v6342_v53  ;;  %v6358_v14 = vpop.f32.mrf.mxu1 }
 0x28e   : > { %v6345_v0 = vpop.f32.mrf.mxu2  ;;  %8139 = vst [vmem:[#allocation26_spill] sm:$0xff] %v6358_v14 }
 0x28f   : > { %8135 = vst [vmem:[#allocation22_spill] sm:$0xff] %v6345_v0  ;;  %5008 = vmatmul.msk.bf16.gmra.mxu3 %vm497_vm1, %v1944_v22 }
 0x292   : > { %v1519_v25 = vpop.f32.mrf.mxu3 }
 0x293   : > { %v1556_v61 = vadd.f32 %v1519_v25, %v6206_v57  ;;  %v6372_v25 = vpop.f32.mrf.mxu0 }
 0x294   : > { %8143 = vst [vmem:[#allocation30_spill] sm:$0xff] %v6372_v25 }
 0x295   : > { %v1658_v17 = vadd.f32 %v1621_v6, %v1556_v61  ;;  %v1743_v24 = vpop.f32.mrf.mxu1 }
 0x296   : > { %v1847_v48 = vpop.f32.mrf.mxu2 }
 0x297   : > { %v1770_v59 = vadd.f32 %v1733_v55, %v1658_v17 }
 0x299   : > { %v6351_v62 = vadd.f32 %v1842_v54, %v1770_v59  ;;  %v1919_v54 = vld [vmem:[%s6315_s13 + $0x30] sm:$0xff]  ;;  %v1921_v59 = vld [vmem:[%s6315_s13 + $0x40] sm:$0xff] }
 0x29a   : > { %v1521_v11 = vpop.f32.mrf.mxu3 }
 0x29b   : > { %8136 = vst [vmem:[#allocation23_spill] sm:$0xff] %v6351_v62  ;;  %v6354_v9 = vadd.f32 %v1521_v11, %v6211_v2  ;;  %v1920_v2 = vld [vmem:[%s6315_s13 + $0x38] sm:$0xff] }
 0x29c   : > { %v1946_v22 = vpack.c.bf16 %v1920_v2, %v1919_v54 }
 0x29d   : > { %8137 = vst [vmem:[#allocation24_spill] sm:$0xff] %v6354_v9 }
 0x29e   : > { %v6361_v57 = vpop.f32.mrf.mxu2 }
 0x29f   : > { %5009 = vmatmul.msk.bf16.gmra.mxu3 %vm497_vm1, %v1945_v42  ;;  %8140 = vst [vmem:[#allocation27_spill] sm:$0xff] %v6361_v57 }
 0x2a2   : > { %v1524_v40 = vpop.f32.mrf.mxu3 }
 0x2a3   : > { %v1558_v6 = vadd.f32 %v1524_v40, %v6218_v20  ;;  %v6374_v20 = vpop.f32.mrf.mxu1  ;;  %v1947_v40 = vpack.c.bf16 %v1922_v49, %v1921_v59 }
 0x2a4   : > { %8144 = vst [vmem:[#allocation31_spill] sm:$0xff] %v6374_v20 }
 0x2a5   : > { %v1660_v55 = vadd.f32 %v1626_v34, %v1558_v6 }
 0x2a6   : > { %v1852_v60 = vpop.f32.mrf.mxu2 }
 0x2a7   : > { %v1772_v45 = vadd.f32 %v1738_v5, %v1660_v55 }
 0x2a9   : > { %v6366_v27 = vadd.f32 %v1847_v48, %v1772_v45 }
 0x2aa   : > { %v1526_v3 = vpop.f32.mrf.mxu3 }
 0x2ab   : > { %8141 = vst [vmem:[#allocation28_spill] sm:$0xff] %v6366_v27  ;;  %v6369_v18 = vadd.f32 %v1526_v3, %v6229_v50  ;;  %v1636_v50 = vpop.f32.mrf.mxu0  ;;  %v1748_v6 = vpop.f32.mrf.mxu1 }
 0x2ad   : > { %8142 = vst [vmem:[#allocation29_spill] sm:$0xff] %v6369_v18 }
 0x2ae   : > { %v6377_v5 = vpop.f32.mrf.mxu2 }
 0x2af   : > { %5010 = vmatmul.msk.bf16.gmra.mxu3 %vm497_vm1, %v1946_v22  ;;  %8145 = vst [vmem:[#allocation32_spill] sm:$0xff] %v6377_v5  ;;  %v1924_v22 = vld [vmem:[%s6315_s13 + $0x58] sm:$0xff] }
 0x2b2   : > { %v1529_v34 = vpop.f32.mrf.mxu3 }
 0x2b3   : > { %v1560_v61 = vadd.f32 %v1529_v34, %v6235_v7  ;;  %v6388_v45 = vpop.f32.mrf.mxu0  ;;  %v6392_v2 = vpop.f32.mrf.mxu1 }
 0x2b4   : > { %8148 = vst [vmem:[#allocation35_spill] sm:$0xff] %v6388_v45 }
 0x2b5   : > { %v1662_v17 = vadd.f32 %v1631_v19, %v1560_v61  ;;  %8149 = vst [vmem:[#allocation36_spill] sm:$0xff] %v6392_v2 }
 0x2b6   : > { %v1857_v55 = vpop.f32.mrf.mxu2 }
 0x2b7   : > { %v1774_v48 = vadd.f32 %v1743_v24, %v1662_v17  ;;  %v1342_v24 = vadd.f32 %v6216_v43, %v6269_v12 }
 0x2b9   : > { %v6381_v51 = vadd.f32 %v1852_v60, %v1774_v48  ;;  %v1454_v61 = vadd.f32 %v6241_v30, %v1342_v24  ;;  %v1925_v30 = vld [vmem:[%s6315_s13 + $0x60] sm:$0xff] }
 0x2ba   : > { %v1531_v11 = vpop.f32.mrf.mxu3 }
 0x2bb   : > { %8146 = vst [vmem:[#allocation33_spill] sm:$0xff] %v6381_v51  ;;  %v6384_v42 = vadd.f32 %v1531_v11, %v6245_v13  ;;  %v1923_v13 = vld [vmem:[%s6315_s13 + $0x50] sm:$0xff]  ;;  %v1641_v59 = vpop.f32.mrf.mxu0  ;;  %v1753_v43 = vpop.f32.mrf.mxu1  ;;  %v1344_v11 = vadd.f32 %v6239_v29, %v6288_v52 }
 0x2bc   : > { %v1948_v48 = vpack.c.bf16 %v1924_v22, %v1923_v13 }
 0x2bd   : > { %8147 = vst [vmem:[#allocation34_spill] sm:$0xff] %v6384_v42  ;;  %v1456_v24 = vadd.f32 %v6276_v35, %v1344_v11  ;;  %v1346_v35 = vadd.f32 %v6274_v46, %v6303_v33 }
 0x2be   : > { %v6394_v3 = vpop.f32.mrf.mxu2 }
 0x2bf   : > { %5011 = vmatmul.msk.bf16.gmra.mxu3 %vm497_vm1, %v1947_v40  ;;  %8150 = vst [vmem:[#allocation37_spill] sm:$0xff] %v6394_v3  ;;  %v1458_v11 = vadd.f32 %v6292_v63, %v1346_v35  ;;  %v1348_v63 = vadd.f32 %v6296_v15, %v6324_v1  ;;  %v6452_v15 = vld [vmem:[%s8066_s4] ss:$0 sm:$0xff] }
 0x2c2   : > { %v1534_v7 = vpop.f32.mrf.mxu3 }
 0x2c3   : > { %v1562_v19 = vadd.f32 %v1534_v7, %v6258_v39  ;;  %v1926_v7 = vld [vmem:[%s6315_s13 + $0x68] sm:$0xff] }
 0x2c5   : > { %v1664_v54 = vadd.f32 %v1636_v50, %v1562_v19 }
 0x2c6   : > { %v1862_v12 = vpop.f32.mrf.mxu2 }
 0x2c7   : > { %v1776_v60 = vadd.f32 %v1748_v6, %v1664_v54  ;;  %v6414_v54 = vpop.f32.mrf.mxu1 }
 0x2c8   : > { %8155 = vst [vmem:[#allocation42_spill] sm:$0xff] %v6414_v54 }
 0x2c9   : > { %v6398_v34 = vadd.f32 %v1857_v55, %v1776_v60  ;;  %v6407_v55 = vpop.f32.mrf.mxu0 }
 0x2ca   : > { %v1536_v39 = vpop.f32.mrf.mxu3  ;;  %8153 = vst [vmem:[#allocation40_spill] sm:$0xff] %v6407_v55 }
 0x2cb   : > { %8151 = vst [vmem:[#allocation38_spill] sm:$0xff] %v6398_v34  ;;  %v6401_v17 = vadd.f32 %v1536_v39, %v1454_v61 }
 0x2cd   : > { %8152 = vst [vmem:[#allocation39_spill] sm:$0xff] %v6401_v17 }
 0x2ce   : > { %v6418_v22 = vpop.f32.mrf.mxu2 }
 0x2cf   : > { %5012 = vmatmul.msk.bf16.gmra.mxu3 %vm497_vm1, %v1948_v48  ;;  %8157 = vst [vmem:[#allocation44_spill] sm:$0xff] %v6418_v22  ;;  %v1758_v52 = vpop.f32.mrf.mxu1 }
 0x2d1   : > { %v1646_v29 = vpop.f32.mrf.mxu0 }
 0x2d2   : > { %v1539_v49 = vpop.f32.mrf.mxu3 }
 0x2d3   : > { %v1564_v50 = vadd.f32 %v1539_v49, %v6284_v32  ;;  %v1949_v32 = vpack.c.bf16 %v1926_v7, %v1925_v30  ;;  %v1928_v49 = vld [vmem:[%s6315_s13 + $0x78] sm:$0xff] }
 0x2d5   : > { %v1666_v40 = vadd.f32 %v1641_v59, %v1564_v50 }
 0x2d6   : > { %v1867_v48 = vpop.f32.mrf.mxu2 }
 0x2d7   : > { %v1778_v6 = vadd.f32 %v1753_v43, %v1666_v40  ;;  %v6433_v7 = vpop.f32.mrf.mxu1 }
 0x2d8   : > { %8161 = vst [vmem:[#allocation48_spill] sm:$0xff] %v6433_v7 }
 0x2d9   : > { %v6411_v19 = vadd.f32 %v1862_v12, %v1778_v6  ;;  %v1927_v12 = vld [vmem:[%s6315_s13 + $0x70] sm:$0xff]  ;;  %v6429_v40 = vpop.f32.mrf.mxu0 }
 0x2da   : > { %v1541_v60 = vpop.f32.mrf.mxu3  ;;  %8159 = vst [vmem:[#allocation46_spill] sm:$0xff] %v6429_v40 }
 0x2db   : > { %8154 = vst [vmem:[#allocation41_spill] sm:$0xff] %v6411_v19  ;;  %v6416_v13 = vadd.f32 %v1541_v60, %v1456_v24 }
 0x2dd   : > { %8156 = vst [vmem:[#allocation43_spill] sm:$0xff] %v6416_v13 }
 0x2de   : > { %v6435_v24 = vpop.f32.mrf.mxu2 }
 0x2df   : > { %5013 = vmatmul.msk.bf16.gmra.mxu3 %vm497_vm1, %v1949_v32  ;;  %8162 = vst [vmem:[#allocation49_spill] sm:$0xff] %v6435_v24 }
 0x2e1   : > { %v1651_v60 = vpop.f32.mrf.mxu0 }
 0x2e2   : > { %v1544_v61 = vpop.f32.mrf.mxu3 }
 0x2e3   : > { %v1566_v39 = vadd.f32 %v1544_v61, %v6300_v36  ;;  %v1950_v36 = vpack.c.bf16 %v1928_v49, %v1927_v12 }
 0x2e5   : > { %v1668_v59 = vadd.f32 %v1646_v29, %v1566_v39  ;;  %v1763_v29 = vpop.f32.mrf.mxu1  ;;  %v1929_v39 = vld [vmem:[%s6315_s13 + $0x80] sm:$0xff] }
 0x2e6   : > { %v1872_v61 = vpop.f32.mrf.mxu2 }
 0x2e7   : > { %v1780_v43 = vadd.f32 %v1758_v52, %v1668_v59  ;;  %v1460_v59 = vadd.f32 %v6305_v23, %v1348_v63 }
 0x2e9   : > { %v6426_v50 = vadd.f32 %v1867_v48, %v1780_v43  ;;  %v1930_v48 = vld [vmem:[%s6315_s13 + $0x88] sm:$0xff]  ;;  %v6655_v22 = vpop.f32.mrf.mxu0 }
 0x2ea   : > { %v1546_v6 = vpop.f32.mrf.mxu3 }
 0x2eb   : > { %8158 = vst [vmem:[#allocation45_spill] sm:$0xff] %v6426_v50  ;;  %v6431_v30 = vadd.f32 %v1546_v6, %v1458_v11  ;;  %v1931_v11 = vld [vmem:[%s6315_s13 + $0x90] sm:$0xff]  ;;  %v1932_v6 = vld [vmem:[%s6315_s13 + $0x98] sm:$0xff] }
 0x2ed   : > { %8160 = vst [vmem:[#allocation47_spill] sm:$0xff] %v6431_v30 }
 0x2ef   : > { %5014 = vmatmul.msk.bf16.gmra.mxu3 %vm497_vm1, %v1950_v36 }
 0x2f2   : > { %v1549_v46 = vpop.f32.mrf.mxu3 }
 0x2f3   : > { %v1568_v33 = vadd.f32 %v1549_v46, %v6319_v16  ;;  %v1951_v16 = vpack.c.bf16 %v1930_v48, %v1929_v39 }
 0x2f5   : > { %v1670_v32 = vadd.f32 %v1651_v60, %v1568_v33  ;;  %v1952_v33 = vpack.c.bf16 %v1932_v6, %v1931_v11 }
 0x2f7   : > { %v1782_v52 = vadd.f32 %v1763_v29, %v1670_v32 }
 0x2f9   : > { %v6443_v35 = vadd.f32 %v1872_v61, %v1782_v52 }
 0x2fa   : > { %v1551_v43 = vpop.f32.mrf.mxu3 }
 0x2fb   : > { %8163 = vst [vmem:[#allocation50_spill] sm:$0xff] %v6443_v35  ;;  %v6446_v12 = vadd.f32 %v1551_v43, %v1460_v59 }
 0x2fd   : > { %8164 = vst [vmem:[#allocation51_spill] sm:$0xff] %v6446_v12 }
 0x2ff   : > { %5015 = vmatmul.msk.bf16.gmra.mxu3 %vm497_vm1, %v1951_v16  ;;  %v8165_v16 = vld [vmem:[#allocation14_spill] sm:$0xff] }
 0x302   : > { %v2055_v49 = vpop.f32.mrf.mxu3 }
 0x303   : > { %v2056_v1 = vadd.f32 %v6452_v15, %v2055_v49 }
 0x305   : > { %v2130_v23 = vsel %vm5565_vm4, %v2056_v1, 0.0 }
 0x306   : > { %v2289_v63 = vmax.f32 %v2130_v23, 0.0  ;;  %v1934_v23 = vld [vmem:[%s6315_s13 + $0xa8] sm:$0xff] }
 0x308   : > { %v2351_v49 = vrot.slane %v2289_v63, 1  ;;  %v2561_v1 = vrot.slane %v2289_v63, 2 }
 0x30a   : > { %v2057_v36 = vpop.f32.mrf.mxu3 }
 0x30b   : > { %v2058_v46 = vadd.f32 %v6452_v15, %v2057_v36  ;;  %v1933_v36 = vld [vmem:[%s6315_s13 + $0xa0] sm:$0xff] }
 0x30d   : > { %v2131_v60 = vsel %vm5551_vm2, %v2058_v46, 0.0 }
 0x30e   : > { %v2290_v32 = vmax.f32 %v2131_v60, 0.0 }
 0x30f   : > { %5016 = vmatmul.msk.bf16.gmra.mxu3 %vm497_vm1, %v1952_v33 }
 0x310   : > { %v2319_v29 = vpack.c.bf16 %v2290_v32, %v2289_v63  ;;  %v2352_v48 = vrot.slane %v2290_v32, 1  ;;  %v2562_v59 = vrot.slane %v2290_v32, 2 }
 0x312   : > { %v2060_v52 = vpop.f32.mrf.mxu3  ;;  %5030 = vmatmul.msk.bf16.vlgmr.msrb.gmra.mxu1 %vm661_vm5, %v2319_v29  ;;  %v2353_v46 = vsel %vm792_vm8, %v2351_v49, %v2352_v48 }
 0x313   : > { %v2061_v61 = vadd.f32 %v6452_v15, %v2060_v52  ;;  %3343 = vmatpush.bf16.msrb.mxu1 %v6090_v28  ;;  %v2563_v28 = vsel %vm1060_vm9, %v2561_v1, %v2562_v59  ;;  %v8168_v1 = vld [vmem:[#allocation11_spill] sm:$0xff] }
 0x315   : > { %v2132_v39 = vsel %vm5588_vm7, %v2061_v61, 0.0 }
 0x316   : > { %v2291_v43 = vmax.f32 %v2132_v39, 0.0  ;;  %v1953_v39 = vpack.c.bf16 %v1934_v23, %v1933_v36  ;;  %v2162_v36 = vld [vmem:[#allocation2 + $0x20] sm:$0xff] }
 0x317   : > { %3344 = vmatpush.bf16.msrb.mxu1 %v8165_v16  ;;  %v2161_v16 = vld [vmem:[#allocation2 + $0x18] sm:$0xff] }
 0x318   : > { %v2354_v11 = vrot.slane %v2291_v43, 1  ;;  %v2564_v6 = vrot.slane %v2291_v43, 2 }
 0x31a   : > { %v2355_v33 = vsel %vm792_vm8, %v2352_v48, %v2354_v11  ;;  %v2565_v60 = vsel %vm1060_vm9, %v2562_v59, %v2564_v6  ;;  %v2062_v29 = vpop.f32.mrf.mxu3  ;;  %v8167_v48 = vld [vmem:[#allocation10_spill] sm:$0xff]  ;;  %v5288_v59 = vld [vmem:[%s8067_s5 + $0x38] sm:$0xff]  ;;  %v5289_v11 = vld [vmem:[%s8067_s5 + $0x30] sm:$0xff] }
 0x31b   : > { %v2407_v52 = vpack.c.bf16 %v2355_v33, %v2353_v46  ;;  %v2617_v32 = vpack.c.bf16 %v2565_v60, %v2563_v28  ;;  %v2063_v61 = vadd.f32 %v6452_v15, %v2062_v29  ;;  %3345 = vmatpush.bf16.msrb.mxu1 %v6202_v37  ;;  %v8169_v28 = vld [vmem:[#allocation12_spill] sm:$0xff]  ;;  %v5290_v60 = vld [vmem:[%s8067_s5 + $0x28] sm:$0xff]  ;;  %8173 = vst [vmem:[#allocation10_spill] sm:$0xff] %v6655_v22 }
 0x31d   : > { %5022 = vmatmul.msk.bf16.vlgmr.msrb.gmra.mxu0 %vm661_vm5, %v2407_v52  ;;  %5038 = vmatmul.msk.bf16.vlgmr.msrb.gmra.mxu2 %vm661_vm5, %v2617_v32  ;;  %v2133_v43 = vsel %vm394_vm3, %v2063_v61, 0.0  ;;  %v1935_v32 = vld [vmem:[%s6315_s13 + $0xb0] sm:$0xff]  ;;  %v1936_v61 = vld [vmem:[%s6315_s13 + $0xb8] sm:$0xff] }
 0x31e   : > { %3101 = vmatpush.bf16.msrb.mxu0 %v8167_v48  ;;  %3712 = vmatpush.bf16.msrb.mxu2 %v5288_v59  ;;  %v2185_v37 = vsub.f32 %v2161_v16, %v2133_v43  ;;  %v2292_v46 = vmax.f32 %v2133_v43, 0.0  ;;  %v8170_v59 = vld [vmem:[#allocation13_spill] sm:$0xff] }
 0x31f   : > { %5017 = vmatmul.msk.bf16.gmra.mxu3 %vm497_vm1, %v1953_v39  ;;  %3346 = vmatpush.bf16.msrb.mxu1 %v6225_v26  ;;  %v5291_v16 = vld [vmem:[%s8067_s5 + $0x20] sm:$0xff] }
 0x320   : > { %v2209_v23 = vand.u32 2147483647, %v2185_v37 }
 0x322   : > { %v2065_v49 = vpop.f32.mrf.mxu3  ;;  %3102 = vmatpush.bf16.msrb.mxu0 %v8168_v1  ;;  %3713 = vmatpush.bf16.msrb.mxu2 %v5289_v11  ;;  %v2233_v39 = vsel %vm661_vm5, %v2209_v23, 0.0 }
 0x323   : > { %v2066_v6 = vadd.f32 %v6452_v15, %v2065_v49  ;;  %3347 = vmatpush.bf16.msrb.mxu1 %v6255_v8  ;;  %v1954_v49 = vpack.c.bf16 %v1936_v61, %v1935_v32 }
 0x325   : > { %v2186_v26 = vsub.f32 %v2162_v36, %v2066_v6  ;;  %v2293_v33 = vmax.f32 %v2066_v6, 0.0  ;;  %v2163_v36 = vld [vmem:[#allocation2 + $0x28] sm:$0xff] }
 0x326   : > { %3103 = vmatpush.bf16.msrb.mxu0 %v8169_v28  ;;  %3714 = vmatpush.bf16.msrb.mxu2 %v5290_v60  ;;  %v2356_v60 = vrot.slane %v2292_v46, 1 }
 0x327   : > { %v2210_v29 = vand.u32 2147483647, %v2186_v26  ;;  %v6497_v52 = vpack.c.bf16 %v2293_v33, %v2292_v46  ;;  %v2357_v1 = vrot.slane %v2293_v33, 1  ;;  %v2567_v23 = vrot.slane %v2293_v33, 2 }
 0x329   : > { %v2234_v8 = vsel %vm661_vm5, %v2210_v29, 0.0  ;;  %5031 = vmatmul.msk.bf16.gmra.mxu1 %vm661_vm5, %v6497_v52  ;;  %v2566_v29 = vrot.slane %v2292_v46, 2 }
 0x32a   : > { %v2235_v43 = vadd.f32 %v2234_v8, %v2233_v39  ;;  %v2067_v48 = vpop.f32.mrf.mxu3  ;;  %3104 = vmatpush.bf16.msrb.mxu0 %v8170_v59  ;;  %3715 = vmatpush.bf16.msrb.mxu2 %v5291_v16  ;;  %v2358_v16 = vsel %vm792_vm8, %v2356_v60, %v2357_v1 }
 0x32b   : > { %v2068_v37 = vadd.f32 %v6452_v15, %v2067_v48  ;;  %v2568_v33 = vsel %vm1060_vm9, %v2566_v29, %v2567_v23 }
 0x32d   : > { %v2135_v6 = vsel %vm399_vm6, %v2068_v37, 0.0 }
 0x32e   : > { %v2187_v26 = vsub.f32 %v2163_v36, %v2135_v6  ;;  %v2294_v28 = vmax.f32 %v2135_v6, 0.0 }
 0x32f   : > { %5018 = vmatmul.msk.bf16.gmra.mxu3 %vm497_vm1, %v1954_v49 }
 0x330   : > { %v2211_v39 = vand.u32 2147483647, %v2187_v26  ;;  %v2359_v8 = vrot.slane %v2294_v28, 1  ;;  %v2569_v59 = vrot.slane %v2294_v28, 2  ;;  %v2164_v28 = vld [vmem:[#allocation2 + $0x30] sm:$0xff] }
 0x332   : > { %v2236_v32 = vsel %vm661_vm5, %v2211_v39, 0.0  ;;  %v2070_v61 = vpop.f32.mrf.mxu3  ;;  %v2360_v48 = vsel %vm792_vm8, %v2357_v1, %v2359_v8  ;;  %v2570_v37 = vsel %vm1060_vm9, %v2567_v23, %v2569_v59  ;;  %v1937_v23 = vld [vmem:[%s6315_s13 + $0xc0] sm:$0xff] }
 0x333   : > { %v2237_v6 = vadd.f32 %v2236_v32, %v2235_v43  ;;  %v2071_v49 = vadd.f32 %v6452_v15, %v2070_v61  ;;  %v6519_v46 = vpack.c.bf16 %v2360_v48, %v2358_v16  ;;  %v6521_v36 = vpack.c.bf16 %v2570_v37, %v2568_v33  ;;  %v1938_v43 = vld [vmem:[%s6315_s13 + $0xc8] sm:$0xff]  ;;  %v2165_v32 = vld [vmem:[#allocation2 + $0x38] sm:$0xff] }
 0x334   : > { %v1955_v16 = vpack.c.bf16 %v1938_v43, %v1937_v23  ;;  %v2166_v43 = vld [vmem:[#allocation2 + $0x40] sm:$0xff] }
 0x335   : > { %v2136_v26 = vsel %vm394_vm3, %v2071_v49, 0.0  ;;  %5023 = vmatmul.msk.bf16.gmra.mxu0 %vm661_vm5, %v6519_v46  ;;  %5039 = vmatmul.msk.bf16.gmra.mxu2 %vm661_vm5, %v6521_v36 }
 0x336   : > { %v2188_v1 = vsub.f32 %v2164_v28, %v2136_v26  ;;  %v2295_v61 = vmax.f32 %v2136_v26, 0.0 }
 0x338   : > { %v2212_v60 = vand.u32 2147483647, %v2188_v1  ;;  %v2571_v35 = vrot.slane %v2295_v61, 2 }
 0x33a   : > { %v2238_v29 = vsel %vm661_vm5, %v2212_v60, 0.0  ;;  %v2072_v39 = vpop.f32.mrf.mxu3 }
 0x33b   : > { %v2239_v8 = vadd.f32 %v2238_v29, %v2237_v6  ;;  %v2073_v59 = vadd.f32 %v6452_v15, %v2072_v39 }
 0x33d   : > { %v2189_v48 = vsub.f32 %v2165_v32, %v2073_v59  ;;  %v2296_v33 = vmax.f32 %v2073_v59, 0.0  ;;  %v1940_v32 = vld [vmem:[%s6315_s13 + $0xd8] sm:$0xff] }
 0x33f   : > { %v2213_v37 = vand.u32 2147483647, %v2189_v48  ;;  %5019 = vmatmul.msk.bf16.gmra.mxu3 %vm497_vm1, %v1955_v16  ;;  %v6534_v49 = vpack.c.bf16 %v2296_v33, %v2295_v61  ;;  %v2362_v23 = vrot.slane %v2296_v33, 1  ;;  %v2572_v29 = vrot.slane %v2296_v33, 2  ;;  %v1939_v16 = vld [vmem:[%s6315_s13 + $0xd0] sm:$0xff] }
 0x340   : > { %v2361_v48 = vrot.slane %v2295_v61, 1 }
 0x341   : > { %v2240_v28 = vsel %vm661_vm5, %v2213_v37, 0.0  ;;  %5032 = vmatmul.msk.bf16.gmra.mxu1 %vm661_vm5, %v6534_v49 }
 0x342   : > { %v2241_v6 = vadd.f32 %v2240_v28, %v2239_v8  ;;  %v2075_v1 = vpop.f32.mrf.mxu3  ;;  %v2363_v8 = vsel %vm792_vm8, %v2361_v48, %v2362_v23  ;;  %v1956_v28 = vpack.c.bf16 %v1940_v32, %v1939_v16 }
 0x343   : > { %v2076_v60 = vadd.f32 %v6452_v15, %v2075_v1 }
 0x345   : > { %v2138_v26 = vsel %vm399_vm6, %v2076_v60, 0.0  ;;  %v2573_v60 = vsel %vm1060_vm9, %v2571_v35, %v2572_v29 }
 0x346   : > { %v2190_v39 = vsub.f32 %v2166_v43, %v2138_v26  ;;  %v2297_v59 = vmax.f32 %v2138_v26, 0.0 }
 0x348   : > { %v2214_v37 = vand.u32 2147483647, %v2190_v39  ;;  %v2364_v12 = vrot.slane %v2297_v59, 1  ;;  %v2574_v24 = vrot.slane %v2297_v59, 2  ;;  %v2167_v59 = vld [vmem:[#allocation2 + $0x48] sm:$0xff] }
 0x34a   : > { %v2242_v1 = vsel %vm661_vm5, %v2214_v37, 0.0  ;;  %v2077_v50 = vpop.f32.mrf.mxu3  ;;  %v2365_v7 = vsel %vm792_vm8, %v2362_v23, %v2364_v12  ;;  %v2575_v33 = vsel %vm1060_vm9, %v2572_v29, %v2574_v24  ;;  %v2168_v23 = vld [vmem:[#allocation2 + $0x50] sm:$0xff] }
 0x34b   : > { %v2243_v26 = vadd.f32 %v2242_v1, %v2241_v6  ;;  %v2078_v43 = vadd.f32 %v6452_v15, %v2077_v50  ;;  %v6550_v40 = vpack.c.bf16 %v2365_v7, %v2363_v8  ;;  %v6552_v61 = vpack.c.bf16 %v2575_v33, %v2573_v60  ;;  %v1941_v8 = vld [vmem:[%s6315_s13 + $0xe0] sm:$0xff]  ;;  %v1942_v1 = vld [vmem:[%s6315_s13 + $0xe8] sm:$0xff] }
 0x34d   : > { %v2139_v39 = vsel %vm394_vm3, %v2078_v43, 0.0  ;;  %5024 = vmatmul.msk.bf16.gmra.mxu0 %vm661_vm5, %v6550_v40  ;;  %5040 = vmatmul.msk.bf16.gmra.mxu2 %vm661_vm5, %v6552_v61 }
 0x34e   : > { %v2191_v24 = vsub.f32 %v2167_v59, %v2139_v39  ;;  %v2298_v29 = vmax.f32 %v2139_v39, 0.0  ;;  %v1957_v59 = vpack.c.bf16 %v1942_v1, %v1941_v8 }
 0x34f   : > { %5020 = vmatmul.msk.bf16.gmra.mxu3 %vm497_vm1, %v1956_v28 }
 0x350   : > { %v2215_v50 = vand.u32 2147483647, %v2191_v24  ;;  %v2169_v24 = vld [vmem:[#allocation2 + $0x58] sm:$0xff] }
 0x352   : > { %v2244_v7 = vsel %vm661_vm5, %v2215_v50, 0.0  ;;  %v2080_v35 = vpop.f32.mrf.mxu3 }
 0x353   : > { %v2081_v12 = vadd.f32 %v6452_v15, %v2080_v35  ;;  %v2245_v6 = vadd.f32 %v2244_v7, %v2243_v26 }
 0x355   : > { %v2192_v16 = vsub.f32 %v2168_v23, %v2081_v12  ;;  %v2299_v32 = vmax.f32 %v2081_v12, 0.0  ;;  %v2366_v12 = vrot.slane %v2298_v29, 1  ;;  %v2576_v23 = vrot.slane %v2298_v29, 2 }
 0x357   : > { %v2216_v48 = vand.u32 2147483647, %v2192_v16  ;;  %v6563_v37 = vpack.c.bf16 %v2299_v32, %v2298_v29  ;;  %v2367_v26 = vrot.slane %v2299_v32, 1  ;;  %v2577_v50 = vrot.slane %v2299_v32, 2 }
 0x359   : > { %v2246_v60 = vsel %vm661_vm5, %v2216_v48, 0.0  ;;  %5033 = vmatmul.msk.bf16.gmra.mxu1 %vm661_vm5, %v6563_v37 }
 0x35a   : > { %v2247_v28 = vadd.f32 %v2246_v60, %v2245_v6  ;;  %v2082_v33 = vpop.f32.mrf.mxu3  ;;  %v2368_v6 = vsel %vm792_vm8, %v2366_v12, %v2367_v26 }
 0x35b   : > { %v2083_v43 = vadd.f32 %v6452_v15, %v2082_v33  ;;  %v2578_v33 = vsel %vm1060_vm9, %v2576_v23, %v2577_v50  ;;  %v2171_v23 = vld [vmem:[#allocation2 + $0x68] sm:$0xff] }
 0x35d   : > { %v2141_v39 = vsel %vm399_vm6, %v2083_v43, 0.0 }
 0x35e   : > { %v2193_v7 = vsub.f32 %v2169_v24, %v2141_v39  ;;  %v2300_v35 = vmax.f32 %v2141_v39, 0.0 }
 0x35f   : > { %5021 = vmatmul.msk.bf16.gmra.mxu3 %vm497_vm1, %v1957_v59 }
 0x360   : > { %v2217_v16 = vand.u32 2147483647, %v2193_v7  ;;  %v2369_v48 = vrot.slane %v2300_v35, 1  ;;  %v2579_v30 = vrot.slane %v2300_v35, 2  ;;  %v2170_v7 = vld [vmem:[#allocation2 + $0x60] sm:$0xff] }
 0x362   : > { %v2248_v60 = vsel %vm661_vm5, %v2217_v16, 0.0  ;;  %v2085_v8 = vpop.f32.mrf.mxu3  ;;  %v2370_v1 = vsel %vm792_vm8, %v2367_v26, %v2369_v48  ;;  %v2580_v32 = vsel %vm1060_vm9, %v2577_v50, %v2579_v30 }
 0x363   : > { %v2249_v43 = vadd.f32 %v2248_v60, %v2247_v28  ;;  %v2086_v39 = vadd.f32 %v6452_v15, %v2085_v8  ;;  %v6580_v24 = vpack.c.bf16 %v2370_v1, %v2368_v6  ;;  %v6582_v29 = vpack.c.bf16 %v2580_v32, %v2578_v33  ;;  %v5292_v1 = vld [vmem:[%s8067_s5 + $0x18] sm:$0xff] }
 0x365   : > { %v2142_v59 = vsel %vm394_vm3, %v2086_v39, 0.0  ;;  %5025 = vmatmul.msk.bf16.gmra.mxu0 %vm661_vm5, %v6580_v24  ;;  %5041 = vmatmul.msk.bf16.gmra.mxu2 %vm661_vm5, %v6582_v29 }
 0x366   : > { %v2194_v26 = vsub.f32 %v2170_v7, %v2142_v59  ;;  %v2301_v16 = vmax.f32 %v2142_v59, 0.0 }
 0x368   : > { %v2218_v35 = vand.u32 2147483647, %v2194_v26  ;;  %v2172_v26 = vld [vmem:[#allocation2 + $0x70] sm:$0xff] }
 0x36a   : > { %v2250_v30 = vsel %vm661_vm5, %v2218_v35, 0.0  ;;  %v2087_v28 = vpop.f32.mrf.mxu3 }
 0x36b   : > { %v2251_v50 = vadd.f32 %v2250_v30, %v2249_v43  ;;  %v2088_v12 = vadd.f32 %v6452_v15, %v2087_v28 }
 0x36d   : > { %v2195_v48 = vsub.f32 %v2171_v23, %v2088_v12  ;;  %v2302_v6 = vmax.f32 %v2088_v12, 0.0  ;;  %v2371_v12 = vrot.slane %v2301_v16, 1  ;;  %v2581_v23 = vrot.slane %v2301_v16, 2 }
 0x36f   : > { %v2219_v60 = vand.u32 2147483647, %v2195_v48  ;;  %5046 = vmatmul.msk.bf16.vlgmr.msra.gmra.mxu3 %vm661_vm5, %v6497_v52  ;;  %v6594_v8 = vpack.c.bf16 %v2302_v6, %v2301_v16  ;;  %v5293_v52 = vld [vmem:[%s8067_s5 + $0x10] sm:$0xff]  ;;  %v2372_v59 = vrot.slane %v2302_v6, 1  ;;  %v2582_v35 = vrot.slane %v2302_v6, 2 }
 0x370   : > { %3785 = vmatpush.bf16.msra.mxu3 %v5292_v1  ;;  %v5294_v1 = vld [vmem:[%s8067_s5 + $0x8] sm:$0xff] }
 0x371   : > { %v2252_v33 = vsel %vm661_vm5, %v2219_v60, 0.0  ;;  %5034 = vmatmul.msk.bf16.gmra.mxu1 %vm661_vm5, %v6594_v8  ;;  %v2583_v6 = vsel %vm1060_vm9, %v2581_v23, %v2582_v35 }
 0x372   : > { %v2253_v32 = vadd.f32 %v2252_v33, %v2251_v50  ;;  %v2090_v43 = vpop.f32.mrf.mxu3  ;;  %v2373_v33 = vsel %vm792_vm8, %v2371_v12, %v2372_v59 }
 0x373   : > { %v2091_v39 = vadd.f32 %v6452_v15, %v2090_v43 }
 0x374   : > { %3786 = vmatpush.bf16.msra.mxu3 %v5293_v52 }
 0x375   : > { %v2144_v7 = vsel %vm399_vm6, %v2091_v39, 0.0 }
 0x376   : > { %v2196_v30 = vsub.f32 %v2172_v26, %v2144_v7  ;;  %v2303_v28 = vmax.f32 %v2144_v7, 0.0 }
 0x378   : > { %v2220_v48 = vand.u32 2147483647, %v2196_v30  ;;  %v2374_v50 = vrot.slane %v2303_v28, 1  ;;  %v2584_v60 = vrot.slane %v2303_v28, 2  ;;  %3787 = vmatpush.bf16.msra.mxu3 %v5294_v1  ;;  %v5295_v28 = vld [vmem:[%s8067_s5] sm:$0xff] }
 0x37a   : > { %v2254_v43 = vsel %vm661_vm5, %v2220_v48, 0.0  ;;  %v2092_v52 = vpop.f32.mrf.mxu3  ;;  %v2375_v39 = vsel %vm792_vm8, %v2372_v59, %v2374_v50  ;;  %v2585_v7 = vsel %vm1060_vm9, %v2582_v35, %v2584_v60 }
 0x37b   : > { %v6616_v16 = vadd.f32 %v2254_v43, %v2253_v32  ;;  %v6618_v26 = vpack.c.bf16 %v2375_v39, %v2373_v33  ;;  %v6620_v30 = vpack.c.bf16 %v2585_v7, %v2583_v6  ;;  %v2093_v59 = vadd.f32 %v6452_v15, %v2092_v52 }
 0x37c   : > { %3788 = vmatpush.bf16.msra.mxu3 %v5295_v28 }
 0x37d   : > { %5026 = vmatmul.msk.bf16.gmra.mxu0 %vm661_vm5, %v6618_v26  ;;  %5042 = vmatmul.msk.bf16.gmra.mxu2 %vm661_vm5, %v6620_v30  ;;  %v6634_v32 = vsel %vm394_vm3, %v2093_v59, 0.0 }
 0x37e   : > { %v2304_v23 = vmax.f32 %v6634_v32, 0.0 }
 0x37f   : > { %5047 = vmatmul.msk.bf16.gmra.mxu3 %vm661_vm5, %v6534_v49 }
 0x380   : > { %v2376_v6 = vrot.slane %v2304_v23, 1  ;;  %v2586_v7 = vrot.slane %v2304_v23, 2 }
 0x382   : > { %v2095_v35 = vpop.f32.mrf.mxu3 }
 0x383   : > { %v6637_v12 = vadd.f32 %v6452_v15, %v2095_v35  ;;  %v6653_v35 = vpop.f32.mrf.mxu1 }
 0x384   : > { %8172 = vst [vmem:[#allocation14_spill] sm:$0xff] %v6653_v35 }
 0x385   : > { %v2305_v48 = vmax.f32 %v6637_v12, 0.0 }
 0x387   : > { %v6641_v50 = vpack.c.bf16 %v2305_v48, %v2304_v23  ;;  %v2377_v43 = vrot.slane %v2305_v48, 1  ;;  %v2587_v52 = vrot.slane %v2305_v48, 2 }
 0x389   : > { %5035 = vmatmul.msk.bf16.gmra.mxu1 %vm661_vm5, %v6641_v50  ;;  %v2378_v54 = vsel %vm792_vm8, %v2376_v6, %v2377_v43  ;;  %v2588_v48 = vsel %vm1060_vm9, %v2586_v7, %v2587_v52 }
 0x38a   : > { %v2097_v60 = vpop.f32.mrf.mxu3 }
 0x38b   : > { %v2098_v1 = vadd.f32 %v6452_v15, %v2097_v60 }
 0x38d   : > { %v6648_v33 = vsel %vm399_vm6, %v2098_v1, 0.0 }
 0x38e   : > { %v2306_v39 = vmax.f32 %v6648_v33, 0.0 }
 0x38f   : > { %5048 = vmatmul.msk.bf16.gmra.mxu3 %vm661_vm5, %v6563_v37  ;;  %v2521_v6 = vpop.f32.mrf.mxu1 }
 0x390   : > { %v2379_v28 = vrot.slane %v2306_v39, 1  ;;  %v2589_v59 = vrot.slane %v2306_v39, 2  ;;  %v6670_v39 = vpop.f32.mrf.mxu2 }
 0x391   : > { %8174 = vst [vmem:[#allocation11_spill] sm:$0xff] %v6670_v39 }
 0x392   : > { %v2100_v60 = vpop.f32.mrf.mxu3  ;;  %v2380_v1 = vsel %vm792_vm8, %v2377_v43, %v2379_v28  ;;  %v2590_v19 = vsel %vm1060_vm9, %v2587_v52, %v2589_v59 }
 0x393   : > { %v6661_v55 = vpack.c.bf16 %v2380_v1, %v2378_v54  ;;  %v6663_v13 = vpack.c.bf16 %v2590_v19, %v2588_v48  ;;  %v2101_v23 = vadd.f32 %v6452_v15, %v2100_v60 }
 0x395   : > { %5027 = vmatmul.msk.bf16.gmra.mxu0 %vm661_vm5, %v6661_v55  ;;  %5043 = vmatmul.msk.bf16.gmra.mxu2 %vm661_vm5, %v6663_v13  ;;  %v6674_v43 = vsel %vm394_vm3, %v2101_v23, 0.0 }
 0x396   : > { %v2307_v28 = vmax.f32 %v6674_v43, 0.0 }
 0x398   : > { %v2381_v22 = vrot.slane %v2307_v28, 1  ;;  %v2591_v3 = vrot.slane %v2307_v28, 2 }
 0x39a   : > { %v2102_v52 = vpop.f32.mrf.mxu3  ;;  %v2448_v54 = vpop.f32.mrf.mxu0 }
 0x39b   : > { %v6677_v19 = vadd.f32 %v6452_v15, %v2102_v52  ;;  %v2522_v7 = vadd.f32 %v2521_v6, %v2448_v54 }
 0x39d   : > { %v2308_v59 = vmax.f32 %v6677_v19, 0.0 }
 0x39f   : > { %5049 = vmatmul.msk.bf16.gmra.mxu3 %vm661_vm5, %v6594_v8  ;;  %v6683_v60 = vpack.c.bf16 %v2308_v59, %v2307_v28  ;;  %v2382_v54 = vrot.slane %v2308_v59, 1  ;;  %v2592_v39 = vrot.slane %v2308_v59, 2 }
 0x3a0   : > { %v2658_v1 = vpop.f32.mrf.mxu2 }
 0x3a1   : > { %v6685_v48 = vadd.f32 %v2658_v1, %v2522_v7  ;;  %5036 = vmatmul.msk.bf16.gmra.mxu1 %vm661_vm5, %v6683_v60  ;;  %v6695_v7 = vpop.f32.mrf.mxu1  ;;  %v2383_v17 = vsel %vm792_vm8, %v2381_v22, %v2382_v54 }
 0x3a2   : > { %v2105_v23 = vpop.f32.mrf.mxu3  ;;  %v6697_v1 = vpop.f32.mrf.mxu0 }
 0x3a3   : > { %v2106_v52 = vadd.f32 %v6452_v15, %v2105_v23 }
 0x3a5   : > { %v6692_v6 = vsel %vm399_vm6, %v2106_v52, 0.0  ;;  %v2593_v52 = vsel %vm1060_vm9, %v2591_v3, %v2592_v39 }
 0x3a6   : > { %v2309_v35 = vmax.f32 %v6692_v6, 0.0 }
 0x3a8   : > { %v2384_v2 = vrot.slane %v2309_v35, 1  ;;  %v2594_v34 = vrot.slane %v2309_v35, 2 }
 0x3a9   : > { %v2526_v3 = vpop.f32.mrf.mxu1 }
 0x3aa   : > { %v2107_v45 = vpop.f32.mrf.mxu3  ;;  %v2385_v23 = vsel %vm792_vm8, %v2382_v54, %v2384_v2  ;;  %v2595_v51 = vsel %vm1060_vm9, %v2592_v39, %v2594_v34  ;;  %v6714_v2 = vpop.f32.mrf.mxu2 }
 0x3ab   : > { %v6703_v59 = vpack.c.bf16 %v2385_v23, %v2383_v17  ;;  %v6705_v5 = vpack.c.bf16 %v2595_v51, %v2593_v52  ;;  %v2108_v35 = vadd.f32 %v6452_v15, %v2107_v45  ;;  %v2173_v23 = vld [vmem:[#allocation2 + $0x78] sm:$0xff] }
 0x3ac   : > { %v2197_v20 = vsub.f32 %v2173_v23, %v6634_v32  ;;  %v2176_v32 = vld [vmem:[#allocation2 + $0x90] sm:$0xff] }
 0x3ad   : > { %5028 = vmatmul.msk.bf16.gmra.mxu0 %vm661_vm5, %v6703_v59  ;;  %5044 = vmatmul.msk.bf16.gmra.mxu2 %vm661_vm5, %v6705_v5  ;;  %v6718_v34 = vsel %vm394_vm3, %v2108_v35, 0.0  ;;  %v2174_v35 = vld [vmem:[#allocation2 + $0x80] sm:$0xff]  ;;  %v2200_v18 = vsub.f32 %v2176_v32, %v6674_v43 }
 0x3ae   : > { %v2310_v28 = vmax.f32 %v6718_v34, 0.0  ;;  %v2221_v57 = vand.u32 2147483647, %v2197_v20 }
 0x3af   : > { %5050 = vmatmul.msk.bf16.gmra.mxu3 %vm661_vm5, %v6641_v50 }
 0x3b0   : > { %v2596_v20 = vrot.slane %v2310_v28, 2 }
 0x3b1   : > { %v6745_v38 = vpop.f32.mrf.mxu1 }
 0x3b2   : > { %v2110_v51 = vpop.f32.mrf.mxu3  ;;  %v2453_v17 = vpop.f32.mrf.mxu0 }
 0x3b3   : > { %v6721_v22 = vadd.f32 %v6452_v15, %v2110_v51  ;;  %v2527_v39 = vadd.f32 %v2526_v3, %v2453_v17  ;;  %v2198_v51 = vsub.f32 %v2174_v35, %v6637_v12  ;;  %v2175_v17 = vld [vmem:[#allocation2 + $0x88] sm:$0xff]  ;;  %v2386_v12 = vrot.slane %v2310_v28, 1 }
 0x3b4   : > { %v2199_v27 = vsub.f32 %v2175_v17, %v6648_v33  ;;  %v2256_v17 = vsel %vm661_vm5, %v2221_v57, 0.0 }
 0x3b5   : > { %v2311_v45 = vmax.f32 %v6721_v22, 0.0  ;;  %v2222_v10 = vand.u32 2147483647, %v2198_v51  ;;  %v2257_v9 = vadd.f32 %v2256_v17, %v6616_v16 }
 0x3b7   : > { %v6725_v54 = vpack.c.bf16 %v2311_v45, %v2310_v28  ;;  %v2597_v23 = vrot.slane %v2311_v45, 2 }
 0x3b8   : > { %v2663_v52 = vpop.f32.mrf.mxu2 }
 0x3b9   : > { %v6728_v25 = vadd.f32 %v2663_v52, %v2527_v39  ;;  %5037 = vmatmul.msk.bf16.gmra.mxu1 %vm661_vm5, %v6725_v54  ;;  %v2387_v39 = vrot.slane %v2311_v45, 1  ;;  %v2598_v62 = vsel %vm1060_vm9, %v2596_v20, %v2597_v23 }
 0x3ba   : > { %v2112_v42 = vpop.f32.mrf.mxu3  ;;  %v6747_v45 = vpop.f32.mrf.mxu0 }
 0x3bb   : > { %v2113_v3 = vadd.f32 %v6452_v15, %v2112_v42  ;;  %v2177_v42 = vld [vmem:[#allocation2 + $0x98] sm:$0xff]  ;;  %v2388_v43 = vsel %vm792_vm8, %v2386_v12, %v2387_v39 }
 0x3bc   : > { %v2201_v0 = vsub.f32 %v2177_v42, %v6677_v19  ;;  %v2224_v19 = vand.u32 2147483647, %v2200_v18  ;;  %v2202_v42 = vsub.f32 %v2178_v4, %v6692_v6  ;;  %v2180_v18 = vld [vmem:[#allocation2 + $0xb0] sm:$0xff] }
 0x3bd   : > { %v6737_v14 = vsel %vm399_vm6, %v2113_v3, 0.0  ;;  %v2223_v3 = vand.u32 2147483647, %v2199_v27  ;;  %v2258_v27 = vsel %vm661_vm5, %v2222_v10, 0.0  ;;  %v2204_v16 = vsub.f32 %v2180_v18, %v6721_v22  ;;  %v5296_v22 = vld [vmem:[%s8067_s5 + $0x98] sm:$0xff] }
 0x3be   : > { %v2312_v52 = vmax.f32 %v6737_v14, 0.0  ;;  %v2259_v10 = vadd.f32 %v2258_v27, %v2257_v9  ;;  %v2262_v4 = vsel %vm661_vm5, %v2224_v19, 0.0  ;;  %v2226_v6 = vand.u32 2147483647, %v2202_v42  ;;  %v2531_v17 = vpop.f32.mrf.mxu1 }
 0x3bf   : > { %5051 = vmatmul.msk.bf16.gmra.mxu3 %vm661_vm5, %v6683_v60 }
 0x3c0   : > { %v2389_v35 = vrot.slane %v2312_v52, 1  ;;  %v2599_v33 = vrot.slane %v2312_v52, 2  ;;  %v6769_v20 = vpop.f32.mrf.mxu2  ;;  %v2266_v19 = vsel %vm661_vm5, %v2226_v6, 0.0 }
 0x3c2   : > { %v2115_v51 = vpop.f32.mrf.mxu3  ;;  %v2390_v32 = vsel %vm792_vm8, %v2387_v39, %v2389_v35  ;;  %v2600_v28 = vsel %vm1060_vm9, %v2597_v23, %v2599_v33  ;;  %v2260_v39 = vsel %vm661_vm5, %v2223_v3, 0.0  ;;  %v2203_v23 = vsub.f32 %v2179_v56, %v6718_v34  ;;  %v2181_v33 = vld [vmem:[#allocation2 + $0xb8] sm:$0xff] }
 0x3c3   : > { %v6753_v52 = vpack.c.bf16 %v2390_v32, %v2388_v43  ;;  %v6755_v57 = vpack.c.bf16 %v2600_v28, %v2598_v62  ;;  %v2116_v12 = vadd.f32 %v6452_v15, %v2115_v51  ;;  %v2225_v62 = vand.u32 2147483647, %v2201_v0  ;;  %v2182_v32 = vld [vmem:[#allocation2 + $0xc0] sm:$0xff] }
 0x3c4   : > { %v2261_v35 = vadd.f32 %v2260_v39, %v2259_v10  ;;  %v2227_v0 = vand.u32 2147483647, %v2203_v23  ;;  %v2205_v9 = vsub.f32 %v2181_v33, %v6737_v14  ;;  %v2183_v39 = vld [vmem:[#allocation2 + $0xc8] sm:$0xff]  ;;  %v5297_v10 = vld [vmem:[%s8067_s5 + $0x90] sm:$0xff] }
 0x3c5   : > { %5029 = vmatmul.msk.bf16.gmra.mxu0 %vm661_vm5, %v6753_v52  ;;  %5045 = vmatmul.msk.bf16.gmra.mxu2 %vm661_vm5, %v6755_v57  ;;  %v2154_v51 = vsel %vm394_vm3, %v2116_v12, 0.0  ;;  %v2264_v56 = vsel %vm661_vm5, %v2225_v62, 0.0 }
 0x3c6   : > { %v2263_v43 = vadd.f32 %v2262_v4, %v2261_v35  ;;  %v2206_v42 = vsub.f32 %v2182_v32, %v2154_v51  ;;  %v2268_v14 = vsel %vm661_vm5, %v2227_v0, 0.0  ;;  %v2229_v62 = vand.u32 2147483647, %v2205_v9  ;;  %v5298_v9 = vld [vmem:[%s8067_s5 + $0x88] sm:$0xff]  ;;  %v2184_v32 = vld [vmem:[#allocation2 + $0xd0] sm:$0xff] }
 0x3c8   : > { %v2265_v12 = vadd.f32 %v2264_v56, %v2263_v43  ;;  %v2230_v6 = vand.u32 2147483647, %v2206_v42  ;;  %v2272_v0 = vsel %vm661_vm5, %v2229_v62, 0.0  ;;  %v5299_v42 = vld [vmem:[%s8067_s5 + $0x58] sm:$0xff] }
 0x3c9   : > { %5062 = vmatmul.msk.bf16.vlgmr.msra.gmra.mxu1 %vm661_vm5, %v6521_v36  ;;  %v2228_v36 = vand.u32 2147483647, %v2204_v16 }
 0x3ca   : > { %v2117_v34 = vpop.f32.mrf.mxu3  ;;  %v2458_v3 = vpop.f32.mrf.mxu0  ;;  %4070 = vmatpush.bf16.msra.mxu1 %v5296_v22  ;;  %v2267_v18 = vadd.f32 %v2266_v19, %v2265_v12  ;;  %v2274_v22 = vsel %vm661_vm5, %v2230_v6, 0.0  ;;  %v5300_v12 = vld [vmem:[%s8067_s5 + $0x78] sm:$0xff]  ;;  %v5303_v6 = vld [vmem:[%s8067_s5 + $0x70] sm:$0xff] }
 0x3cb   : > { %v2118_v28 = vadd.f32 %v6452_v15, %v2117_v34  ;;  %v2532_v27 = vadd.f32 %v2531_v17, %v2458_v3  ;;  %v2270_v4 = vsel %vm661_vm5, %v2228_v36, 0.0 }
 0x3cc   : > { %v2269_v35 = vadd.f32 %v2268_v14, %v2267_v18  ;;  %v5301_v14 = vld [vmem:[%s8067_s5 + $0x80] sm:$0xff] }
 0x3cd   : > { %v2207_v23 = vsub.f32 %v2183_v39, %v2118_v28  ;;  %v6815_v39 = vmax.f32 %v2118_v28, 0.0  ;;  %v5302_v28 = vld [vmem:[%s8067_s5 + $0x50] sm:$0xff] }
 0x3ce   : > { %4071 = vmatpush.bf16.msra.mxu1 %v5297_v10  ;;  %v2271_v34 = vadd.f32 %v2270_v4, %v2269_v35 }
 0x3cf   : > { %5052 = vmatmul.msk.bf16.gmra.mxu3 %vm661_vm5, %v6725_v54  ;;  %v2231_v17 = vand.u32 2147483647, %v2207_v23  ;;  %v6820_v23 = vpop.f32.mrf.mxu1 }
 0x3d0   : > { %v2668_v16 = vpop.f32.mrf.mxu2 }
 0x3d1   : > { %v6789_v33 = vadd.f32 %v2668_v16, %v2532_v27  ;;  %v2273_v27 = vadd.f32 %v2272_v0, %v2271_v34  ;;  %v2276_v36 = vsel %vm661_vm5, %v2231_v17, 0.0  ;;  %v5304_v17 = vld [vmem:[%s8067_s5 + $0x48] sm:$0xff] }
 0x3d2   : > { %v2120_v56 = vpop.f32.mrf.mxu3  ;;  %4072 = vmatpush.bf16.msra.mxu1 %v5298_v9  ;;  %v6824_v18 = vpop.f32.mrf.mxu0 }
 0x3d3   : > { %v2121_v3 = vadd.f32 %v6452_v15, %v2120_v56  ;;  %v5305_v56 = vld [vmem:[%s8067_s5 + $0x68] sm:$0xff] }
 0x3d5   : > { %v6799_v43 = vsel %vm399_vm6, %v2121_v3, 0.0  ;;  %5054 = vmatmul.msk.bf16.vlgmr.msra.gmra.mxu0 %vm661_vm5, %v6519_v46  ;;  %5070 = vmatmul.msk.bf16.vlgmr.msra.gmra.mxu2 %vm661_vm5, %v6534_v49  ;;  %v6813_v46 = vmax.f32 %v2154_v51, 0.0  ;;  %v2275_v49 = vadd.f32 %v2274_v22, %v2273_v27  ;;  %v5306_v22 = vld [vmem:[%s8067_s5 + $0x40] sm:$0xff] }
 0x3d6   : > { %v2208_v19 = vsub.f32 %v2184_v32, %v6799_v43  ;;  %3922 = vmatpush.bf16.msra.mxu0 %v5299_v42  ;;  %3991 = vmatpush.bf16.msra.mxu2 %v5300_v12  ;;  %v5307_v32 = vld [vmem:[%s8067_s5 + $0x60] sm:$0xff]  ;;  %v5308_v12 = vld [vmem:[%s8067_s5 + $0xb8] sm:$0xff] }
 0x3d7   : > { %4073 = vmatpush.bf16.msra.mxu1 %v5301_v14  ;;  %v2277_v10 = vadd.f32 %v2276_v36, %v2275_v49  ;;  %v6837_v35 = vpack.c.bf16 %v6815_v39, %v6813_v46  ;;  %v2536_v9 = vpop.f32.mrf.mxu1 }
 0x3d8   : > { %v2232_v62 = vand.u32 2147483647, %v2208_v19  ;;  %v6847_v0 = vpop.f32.mrf.mxu2 }
 0x3d9   : > { %5063 = vmatmul.msk.bf16.gmra.mxu1 %vm661_vm5, %v6552_v61 }
 0x3da   : > { %v6826_v4 = vpop.f32.mrf.mxu3  ;;  %v2278_v51 = vsel %vm661_vm5, %v2232_v62, 0.0  ;;  %3923 = vmatpush.bf16.msra.mxu0 %v5302_v28  ;;  %3992 = vmatpush.bf16.msra.mxu2 %v5303_v6 }
 0x3db   : > { %v2279_v16 = vadd.f32 %v2278_v51, %v2277_v10  ;;  %v5309_v10 = vld [vmem:[%s8067_s5 + $0xb0] sm:$0xff]  ;;  %v5310_v51 = vld [vmem:[%s8067_s5 + $0xa8] sm:$0xff] }
 0x3dd   : > { %2280 = vadd.xlane.f32.xlu0 %v2279_v16 }
 0x3de   : > { %3924 = vmatpush.bf16.msra.mxu0 %v5304_v17  ;;  %3993 = vmatpush.bf16.msra.mxu2 %v5305_v56  ;;  %v5311_v17 = vld [vmem:[%s8067_s5 + $0xa0] sm:$0xff] }
 0x3df   : > { %5053 = vmatmul.msk.bf16.gmra.mxu3 %vm661_vm5, %v6837_v35  ;;  %v6868_v49 = vpop.f32.mrf.mxu1 }
 0x3e2   : > { %v2125_v34 = vpop.f32.mrf.mxu3  ;;  %v2463_v3 = vpop.f32.mrf.mxu0  ;;  %3925 = vmatpush.bf16.msra.mxu0 %v5306_v22  ;;  %3994 = vmatpush.bf16.msra.mxu2 %v5307_v32  ;;  %v2787_v32 = vrot.slane %v6815_v39, 1 }
 0x3e3   : > { %v2537_v27 = vadd.f32 %v2536_v9, %v2463_v3  ;;  %v2786_v9 = vrot.slane %v6813_v46, 1  ;;  %v2862_v3 = vrot.slane %v6813_v46, 2 }
 0x3e5   : > { %5055 = vmatmul.msk.bf16.gmra.mxu0 %vm661_vm5, %v6550_v40  ;;  %5071 = vmatmul.msk.bf16.gmra.mxu2 %vm661_vm5, %v6563_v37  ;;  %v2788_v46 = vsel %vm792_vm8, %v2786_v9, %v2787_v32 }
 0x3e8   : > { %v2673_v19 = vpop.f32.mrf.mxu2 }
 0x3e9   : > { %v6859_v36 = vadd.f32 %v2673_v19, %v2537_v27  ;;  %5064 = vmatmul.msk.bf16.gmra.mxu1 %vm661_vm5, %v6582_v29  ;;  %v2863_v27 = vrot.slane %v6815_v39, 2 }
 0x3ea   : > { %v2127_v42 = vpop.f32.mrf.mxu3  ;;  %v6870_v14 = vpop.f32.mrf.mxu0 }
 0x3ef   : > { %5078 = vmatmul.msk.bf16.vlgmr.msrb.gmra.mxu3 %vm661_vm5, %v6550_v40 }
 0x3f0   : > { %4146 = vmatpush.bf16.msrb.mxu3 %v5308_v12  ;;  %v6882_v40 = vpop.f32.mrf.mxu2 }
 0x3f2   : > { %v2727_v37 = vpop.f32.mrf.mxu3 }
 0x3f3   : > { %v6873_v62 = vadd.f32 %v2727_v37, %v6685_v48  ;;  %v2541_v48 = vpop.f32.mrf.mxu1 }
 0x3f4   : > { %4147 = vmatpush.bf16.msrb.mxu3 %v5309_v10 }
 0x3f5   : > { %5056 = vmatmul.msk.bf16.gmra.mxu0 %vm661_vm5, %v6580_v24  ;;  %5072 = vmatmul.msk.bf16.gmra.mxu2 %vm661_vm5, %v6594_v8  ;;  %v2315_v8 = vmax.f32 %v6799_v43, 0.0 }
 0x3f7   : > { %v2789_v19 = vrot.slane %v2315_v8, 1  ;;  %v2865_v12 = vrot.slane %v2315_v8, 2 }
 0x3f8   : > { %4148 = vmatpush.bf16.msrb.mxu3 %v5310_v51  ;;  %v2123_v51 = vadd.f32 %v6452_v15, %v6826_v4 }
 0x3f9   : > { %5065 = vmatmul.msk.bf16.gmra.mxu1 %vm661_vm5, %v6620_v30  ;;  %v2866_v43 = vsel %vm1060_vm9, %v2863_v27, %v2865_v12  ;;  %v2790_v39 = vsel %vm792_vm8, %v2787_v32, %v2789_v19 }
 0x3fa   : > { %v2468_v28 = vpop.f32.mrf.mxu0  ;;  %v6889_v6 = vpop.f32.mrf.mxu3  ;;  %v2157_v4 = vsel %vm5979_vm11, %v2123_v51, 0.0 }
 0x3fb   : > { %v2542_v16 = vadd.f32 %v2541_v48, %v2468_v28  ;;  %v2126_v28 = vadd.f32 %v6452_v15, %v2125_v34 }
 0x3fc   : > { %4149 = vmatpush.bf16.msrb.mxu3 %v5311_v17 }
 0x3ff   : > { %5079 = vmatmul.msk.bf16.gmra.mxu3 %vm661_vm5, %v6580_v24  ;;  %v2864_v24 = vsel %vm1060_vm9, %v2862_v3, %v2863_v27  ;;  %v2158_v3 = vsel %vm5971_vm10, %v2126_v28, 0.0  ;;  %v6936_v27 = vmax.f32 %v2157_v4, 0.0 }
 0x400   : > { %v2678_v56 = vpop.f32.mrf.mxu2  ;;  %v6916_v48 = vpack.c.bf16 %v2866_v43, %v2864_v24 }
 0x401   : > { %v6899_v22 = vadd.f32 %v2678_v56, %v2542_v16  ;;  %v2128_v16 = vadd.f32 %v6452_v15, %v2127_v42  ;;  %v6938_v15 = vmax.f32 %v2158_v3, 0.0  ;;  %v3010_v31 = vrot.slane %v6936_v27, 1 }
 0x402   : > { %v2732_v37 = vpop.f32.mrf.mxu3  ;;  %v6926_v17 = vpop.f32.mrf.mxu0 }
 0x403   : > { %v6904_v10 = vadd.f32 %v2732_v37, %v6728_v25  ;;  %v6918_v25 = vpack.c.bf16 %v2790_v39, %v2788_v46  ;;  %8176 = vst [vmem:[#allocation13_spill] sm:$0xff] %v6926_v17  ;;  %v2159_v34 = vsel %vm6023_vm12, %v2128_v16, 0.0  ;;  %v3086_v37 = vrot.slane %v6936_v27, 2 }
 0x404   : > { %v6940_v42 = vmax.f32 %v2159_v34, 0.0  ;;  %v3087_v46 = vrot.slane %v6938_v15, 2  ;;  %v2938_v9 = vpack.c.bf16 %v6938_v15, %v6936_v27  ;;  %v3011_v53 = vrot.slane %v6938_v15, 1 }
 0x405   : > { %5057 = vmatmul.msk.bf16.gmra.mxu0 %vm661_vm5, %v6618_v26  ;;  %5073 = vmatmul.msk.bf16.gmra.mxu2 %vm661_vm5, %v6641_v50  ;;  %v6922_v50 = vpop.f32.mrf.mxu1 }
 0x406   : > { %8175 = vst [vmem:[#allocation12_spill] sm:$0xff] %v6922_v50  ;;  %v3089_v39 = vrot.slane %v6940_v42, 2 }
 0x408   : > { %v6944_v19 = vpop.f32.mrf.mxu2  ;;  %v6960_v16 = vsel %vm1060_vm9, %v3087_v46, %v3089_v39 }
 0x409   : > { %5066 = vmatmul.msk.bf16.gmra.mxu1 %vm661_vm5, %v6663_v13  ;;  %8180 = vst [vmem:[#allocation52_spill] sm:$0xff] %v6944_v19 }
 0x40a   : > { %v6928_v8 = vpop.f32.mrf.mxu3 }
 0x40d   : > { %v2546_v12 = vpop.f32.mrf.mxu1 }
 0x40f   : > { %5080 = vmatmul.msk.bf16.gmra.mxu3 %vm661_vm5, %v6618_v26  ;;  %v6957_v26 = vsel %vm1060_vm9, %v3086_v37, %v3087_v46 }
 0x412   : > { %v2473_v24 = vpop.f32.mrf.mxu0  ;;  %v2737_v43 = vpop.f32.mrf.mxu3 }
 0x413   : > { %v2547_v51 = vadd.f32 %v2546_v12, %v2473_v24  ;;  %v6950_v28 = vadd.f32 %v2737_v43, %v6789_v33 }
 0x415   : > { %5058 = vmatmul.msk.bf16.gmra.mxu0 %vm661_vm5, %v6661_v55  ;;  %5074 = vmatmul.msk.bf16.gmra.mxu2 %vm661_vm5, %v6683_v60  ;;  %v6968_v12 = vpop.f32.mrf.mxu1 }
 0x418   : > { %v2683_v4 = vpop.f32.mrf.mxu2 }
 0x419   : > { %v2708_v34 = vadd.f32 %v2683_v4, %v2547_v51  ;;  %5067 = vmatmul.msk.bf16.gmra.mxu1 %vm661_vm5, %v6705_v5 }
 0x41a   : > { %v6966_v33 = vpop.f32.mrf.mxu3  ;;  %v6972_v60 = vpop.f32.mrf.mxu0 }
 0x41e   : > { %v2551_v43 = vpop.f32.mrf.mxu1 }
 0x41f   : > { %5081 = vmatmul.msk.bf16.gmra.mxu3 %vm661_vm5, %v6661_v55 }
 0x420   : > { %v6981_v46 = vpop.f32.mrf.mxu2 }
 0x422   : > { %v2742_v37 = vpop.f32.mrf.mxu3 }
 0x423   : > { %v6975_v24 = vadd.f32 %v2742_v37, %v6859_v36 }
 0x425   : > { %5059 = vmatmul.msk.bf16.gmra.mxu0 %vm661_vm5, %v6703_v59  ;;  %5075 = vmatmul.msk.bf16.gmra.mxu2 %vm661_vm5, %v6725_v54 }
 0x426   : > { %v6987_v4 = vpop.f32.mrf.mxu1 }
 0x429   : > { %5068 = vmatmul.msk.bf16.gmra.mxu1 %vm661_vm5, %v6755_v57 }
 0x42a   : > { %v2478_v39 = vpop.f32.mrf.mxu0  ;;  %v6985_v55 = vpop.f32.mrf.mxu3 }
 0x42b   : > { %v2552_v51 = vadd.f32 %v2551_v43, %v2478_v39 }
 0x42f   : > { %5082 = vmatmul.msk.bf16.gmra.mxu3 %vm661_vm5, %v6703_v59 }
 0x430   : > { %v2688_v36 = vpop.f32.mrf.mxu2 }
 0x431   : > { %v2710_v37 = vadd.f32 %v2688_v36, %v2552_v51  ;;  %v3250_v51 = vld [vmem:[%s7008_s21] sm:$0xff]  ;;  %v3251_v36 = vld [vmem:[%s7008_s21 + $0x8] sm:$0xff] }
 0x432   : > { %v2747_v3 = vpop.f32.mrf.mxu3  ;;  %v7000_v43 = vpop.f32.mrf.mxu0  ;;  %v3280_v19 = vpack.c.bf16 %v3251_v36, %v3250_v51 }
 0x433   : > { %v6992_v54 = vadd.f32 %v2747_v3, %v6899_v22 }
 0x435   : > { %5060 = vmatmul.msk.bf16.gmra.mxu0 %vm661_vm5, %v6753_v52  ;;  %5076 = vmatmul.msk.bf16.gmra.mxu2 %vm661_vm5, %v6837_v35 }
 0x436   : > { %v2556_v32 = vpop.f32.mrf.mxu1 }
 0x438   : > { %v7012_v35 = vpop.f32.mrf.mxu2 }
 0x439   : > { %5069 = vmatmul.msk.bf16.gmra.mxu1 %vm661_vm5, %v6916_v48 }
 0x43a   : > { %v7002_v39 = vpop.f32.mrf.mxu3 }
 0x43b   : > { %8181 = vst [vmem:[#allocation53_spill] sm:$0xff] %v7002_v39 }
 0x43e   : > { %v2558_v59 = vpop.f32.mrf.mxu1 }
 0x43f   : > { %5083 = vmatmul.msk.bf16.gmra.mxu3 %vm661_vm5, %v6753_v52 }
 0x442   : > { %v2483_v22 = vpop.f32.mrf.mxu0  ;;  %v2752_v3 = vpop.f32.mrf.mxu3 }
 0x443   : > { %v2557_v56 = vadd.f32 %v2556_v32, %v2483_v22  ;;  %v7018_v39 = vadd.f32 %v2752_v3, %v2708_v34  ;;  %v5312_v32 = vld [vmem:[%s8067_s5 + $0x118] sm:$0xff] }
 0x445   : > { %5061 = vmatmul.msk.bf16.gmra.mxu0 %vm661_vm5, %v6918_v25  ;;  %5077 = vmatmul.msk.bf16.gmra.mxu2 %vm661_vm5, %v2938_v9 }
 0x446   : > { %v2882_v50 = vpop.f32.mrf.mxu1 }
 0x448   : > { %v2693_v52 = vpop.f32.mrf.mxu2 }
 0x449   : > { %v7023_v17 = vadd.f32 %v2693_v52, %v2557_v56  ;;  %5094 = vmatmul.msk.bf16.vlgmr.msrb.gmra.mxu1 %vm497_vm1, %v3280_v19  ;;  %v5313_v56 = vld [vmem:[%s8067_s5 + $0x110] sm:$0xff] }
 0x44a   : > { %v2485_v11 = vpop.f32.mrf.mxu0  ;;  %v7026_v63 = vpop.f32.mrf.mxu3  ;;  %4370 = vmatpush.bf16.msrb.mxu1 %v5312_v32  ;;  %v3252_v52 = vld [vmem:[%s7008_s21 + $0x10] sm:$0xff] }
 0x44b   : > { %v7031_v34 = vadd.f32 %v2558_v59, %v2485_v11  ;;  %v5314_v11 = vld [vmem:[%s8067_s5 + $0x108] sm:$0xff]  ;;  %v3281_v41 = vpack.c.bf16 %v3253_v21, %v3252_v52 }
 0x44e   : > { %v2884_v9 = vpop.f32.mrf.mxu1  ;;  %4371 = vmatpush.bf16.msrb.mxu1 %v5313_v56 }
 0x44f   : > { %5084 = vmatmul.msk.bf16.gmra.mxu3 %vm661_vm5, %v6918_v25  ;;  %v2524_v25 = vadd.f32 %v6695_v7, %v6697_v1  ;;  %v5316_v7 = vld [vmem:[%s8067_s5 + $0x100] sm:$0xff] }
 0x450   : > { %v2281_v19 = vpop.xlane.xlu0 %2280  ;;  %v7038_v22 = vpop.f32.mrf.mxu2 }
 0x451   : > { %v2282_v3 = vrot.slane %v2281_v19, 4 }
 0x452   : > { %v2757_v51 = vpop.f32.mrf.mxu3  ;;  %v2806_v36 = vpop.f32.mrf.mxu0  ;;  %4372 = vmatpush.bf16.msrb.mxu1 %v5314_v11  ;;  %v3013_v11 = vrot.slane %v6940_v42, 1 }
 0x453   : > { %v2283_v59 = vadd.f32 %v2282_v3, %v2281_v19  ;;  %v7045_v32 = vadd.f32 %v2757_v51, %v2710_v37  ;;  %v2846_v56 = vadd.f32 %v2806_v36, %v6873_v62  ;;  %v5315_v62 = vld [vmem:[%s8067_s5 + $0xd8] sm:$0xff]  ;;  %v3012_v3 = vsel %vm792_vm8, %v3010_v31, %v3011_v53  ;;  %v5318_v31 = vld [vmem:[%s8067_s5 + $0xc8] sm:$0xff] }
 0x454   : > { %v3014_v51 = vsel %vm792_vm8, %v3011_v53, %v3013_v11  ;;  %v5319_v11 = vld [vmem:[%s8067_s5 + $0xc0] sm:$0xff] }
 0x455   : > { %v2284_v58 = vrot.slane %v2283_v59, 2  ;;  %5086 = vmatmul.msk.bf16.vlgmr.msrb.gmra.mxu0 %vm661_vm5, %v6552_v61  ;;  %v2922_v47 = vadd.f32 %v2882_v50, %v2846_v56  ;;  %v2699_v61 = vadd.f32 %v6714_v2, %v2524_v25  ;;  %v3254_v56 = vld [vmem:[%s7008_s21 + $0x20] sm:$0xff]  ;;  %v3255_v25 = vld [vmem:[%s7008_s21 + $0x28] sm:$0xff] }
 0x456   : > { %v2887_v19 = vpop.f32.mrf.mxu1  ;;  %4215 = vmatpush.bf16.msrb.mxu0 %v5315_v62  ;;  %4373 = vmatpush.bf16.msrb.mxu1 %v5316_v7  ;;  %v2529_v7 = vadd.f32 %v6745_v38, %v6747_v45 }
 0x457   : > { %v2285_v21 = vadd.f32 %v2284_v58, %v2283_v59  ;;  %v2768_v50 = vadd.f32 %v6889_v6, %v2699_v61  ;;  %v5317_v58 = vld [vmem:[%s8067_s5 + $0xd0] sm:$0xff] }
 0x458   : > { %v2951_v1 = vpop.f32.mrf.mxu2 }
 0x459   : > { %v2991_v27 = vadd.f32 %v2951_v1, %v2922_v47  ;;  %5095 = vmatmul.msk.bf16.gmra.mxu1 %vm497_vm1, %v3281_v41  ;;  %v2286_v15 = vrot.slane %v2285_v21, 1  ;;  %v3017_v47 = vpack.c.bf16 %v3014_v51, %v3012_v3 }
 0x45a   : > { %v7064_v42 = vpop.f32.mrf.mxu3  ;;  %v2808_v37 = vpop.f32.mrf.mxu0  ;;  %4216 = vmatpush.bf16.msrb.mxu0 %v5317_v58 }
 0x45b   : > { %v2847_v2 = vadd.f32 %v2808_v37, %v2768_v50  ;;  %v2287_v6 = vadd.f32 %v2286_v15, %v2285_v21  ;;  %v3282_v21 = vpack.c.bf16 %v3255_v25, %v3254_v56  ;;  %v2701_v50 = vadd.f32 %v6769_v20, %v2529_v7 }
 0x45d   : > { %5237 = vpush %v2287_v6  ;;  %v7071_v41 = vadd.f32 %v2884_v9, %v2847_v2  ;;  %v2770_v37 = vadd.f32 %v6928_v8, %v2701_v50  ;;  %v3256_v2 = vld [vmem:[%s7008_s21 + $0x30] sm:$0xff]  ;;  %v3257_v6 = vld [vmem:[%s7008_s21 + $0x38] sm:$0xff]  ;;  %v2534_v8 = vadd.f32 %v6820_v23, %v6824_v18 }
 0x45e   : > { %v2889_v36 = vpop.f32.mrf.mxu1  ;;  %4217 = vmatpush.bf16.msrb.mxu0 %v5318_v31  ;;  %v3283_v31 = vpack.c.bf16 %v3257_v6, %v3256_v2  ;;  %v3261_v2 = vld [vmem:[%s7008_s21 + $0x58] sm:$0xff] }
 0x45f   : > { %5085 = vmatmul.msk.bf16.gmra.mxu3 %vm661_vm5, %v3017_v47 }
 0x460   : > { %v7077_v53 = vpop.f32.mrf.mxu2 }
 0x462   : > { %v2762_v52 = vpop.f32.mrf.mxu3  ;;  %v2811_v59 = vpop.f32.mrf.mxu0  ;;  %4218 = vmatpush.bf16.msrb.mxu0 %v5319_v11 }
 0x463   : > { %v7085_v9 = vadd.f32 %v2762_v52, %v7023_v17  ;;  %v2848_v62 = vadd.f32 %v2811_v59, %v6904_v10  ;;  %v2703_v59 = vadd.f32 %v6847_v0, %v2534_v8 }
 0x465   : > { %5087 = vmatmul.msk.bf16.gmra.mxu0 %vm661_vm5, %v6582_v29  ;;  %v2924_v61 = vadd.f32 %v2887_v19, %v2848_v62  ;;  %v2772_v25 = vadd.f32 %v6966_v33, %v2703_v59  ;;  %v2539_v33 = vadd.f32 %v6868_v49, %v6870_v14  ;;  %v3262_v59 = vld [vmem:[%s7008_s21 + $0x60] sm:$0xff] }
 0x466   : > { %v2892_v1 = vpop.f32.mrf.mxu1 }
 0x468   : > { %v2956_v15 = vpop.f32.mrf.mxu2 }
 0x469   : > { %v2993_v17 = vadd.f32 %v2956_v15, %v2924_v61  ;;  %5096 = vmatmul.msk.bf16.gmra.mxu1 %vm497_vm1, %v3282_v21  ;;  %v3258_v61 = vld [vmem:[%s7008_s21 + $0x40] sm:$0xff]  ;;  %v3259_v21 = vld [vmem:[%s7008_s21 + $0x48] sm:$0xff] }
 0x46a   : > { %v7095_v10 = vpop.f32.mrf.mxu3  ;;  %v2813_v3 = vpop.f32.mrf.mxu0  ;;  %v3284_v15 = vpack.c.bf16 %v3259_v21, %v3258_v61 }
 0x46b   : > { %v2849_v38 = vadd.f32 %v2813_v3, %v2770_v37  ;;  %v2705_v3 = vadd.f32 %v6882_v40, %v2539_v33 }
 0x46d   : > { %v7097_v45 = vadd.f32 %v2889_v36, %v2849_v38  ;;  %v2774_v38 = vadd.f32 %v6985_v55, %v2705_v3 }
 0x46e   : > { %v2894_v29 = vpop.f32.mrf.mxu1 }
 0x470   : > { %v7099_v19 = vpop.f32.mrf.mxu2 }
 0x472   : > { %v2816_v51 = vpop.f32.mrf.mxu0  ;;  %v3030_v58 = vpop.f32.mrf.mxu3 }
 0x473   : > { %v2850_v20 = vadd.f32 %v2816_v51, %v6950_v28  ;;  %v7104_v47 = vadd.f32 %v3030_v58, %v2991_v27  ;;  %v3260_v58 = vld [vmem:[%s7008_s21 + $0x50] sm:$0xff] }
 0x475   : > { %5088 = vmatmul.msk.bf16.gmra.mxu0 %vm661_vm5, %v6620_v30  ;;  %v2926_v36 = vadd.f32 %v2892_v1, %v2850_v20  ;;  %v3285_v20 = vpack.c.bf16 %v3261_v2, %v3260_v58  ;;  %v2713_v58 = vadd.f32 %v7038_v22, %v7031_v34 }
 0x476   : > { %v2897_v52 = vpop.f32.mrf.mxu1 }
 0x477   : > { %v2782_v2 = vadd.f32 %v7095_v10, %v2713_v58  ;;  %v8183_v10 = vld [vmem:[#allocation21_spill] sm:$0xff] }
 0x478   : > { %v2961_v56 = vpop.f32.mrf.mxu2 }
 0x479   : > { %v2995_v11 = vadd.f32 %v2961_v56, %v2926_v36  ;;  %5097 = vmatmul.msk.bf16.gmra.mxu1 %vm497_vm1, %v3283_v31  ;;  %v3263_v56 = vld [vmem:[%s7008_s21 + $0x68] sm:$0xff] }
 0x47a   : > { %v2818_v28 = vpop.f32.mrf.mxu0  ;;  %v7113_v27 = vpop.f32.mrf.mxu3 }
 0x47b   : > { %v2851_v23 = vadd.f32 %v2818_v28, %v2772_v25  ;;  %v2549_v25 = vadd.f32 %v6968_v12, %v6972_v60  ;;  %v3264_v12 = vld [vmem:[%s7008_s21 + $0x70] sm:$0xff]  ;;  %v3265_v60 = vld [vmem:[%s7008_s21 + $0x78] sm:$0xff] }
 0x47d   : > { %v7115_v18 = vadd.f32 %v2894_v29, %v2851_v23  ;;  %v2709_v23 = vadd.f32 %v6981_v46, %v2549_v25  ;;  %v3287_v46 = vpack.c.bf16 %v3265_v60, %v3264_v12 }
 0x47e   : > { %v2899_v30 = vpop.f32.mrf.mxu1 }
 0x482   : > { %v2821_v62 = vpop.f32.mrf.mxu0  ;;  %v3035_v7 = vpop.f32.mrf.mxu3 }
 0x483   : > { %v2852_v1 = vadd.f32 %v2821_v62, %v6975_v24  ;;  %v7120_v0 = vadd.f32 %v3035_v7, %v2993_v17 }
 0x485   : > { %5089 = vmatmul.msk.bf16.gmra.mxu0 %vm661_vm5, %v6663_v13  ;;  %v7126_v50 = vadd.f32 %v2897_v52, %v2852_v1  ;;  %v2554_v1 = vadd.f32 %v6987_v4, %v7000_v43  ;;  %v3266_v4 = vld [vmem:[%s7008_s21 + $0x80] sm:$0xff]  ;;  %v3267_v43 = vld [vmem:[%s7008_s21 + $0x88] sm:$0xff] }
 0x486   : > { %v2902_v37 = vpop.f32.mrf.mxu1 }
 0x489   : > { %5098 = vmatmul.msk.bf16.gmra.mxu1 %vm497_vm1, %v3284_v15  ;;  %v2711_v15 = vadd.f32 %v7012_v35, %v2554_v1 }
 0x48a   : > { %v2823_v24 = vpop.f32.mrf.mxu0  ;;  %v7131_v17 = vpop.f32.mrf.mxu3 }
 0x48b   : > { %v2853_v29 = vadd.f32 %v2823_v24, %v2774_v38 }
 0x48d   : > { %v7133_v51 = vadd.f32 %v2899_v30, %v2853_v29  ;;  %v2778_v30 = vadd.f32 %v7026_v63, %v2709_v23  ;;  %v3269_v23 = vld [vmem:[%s7008_s21 + $0x98] sm:$0xff] }
 0x48e   : > { %v7135_v49 = vpop.f32.mrf.mxu1  ;;  %s5238_s8 = spop %5237 }
 0x492   : > { %v2826_v13 = vpop.f32.mrf.mxu0  ;;  %v3040_v14 = vpop.f32.mrf.mxu3 }
 0x493   : > { %v2854_v40 = vadd.f32 %v2826_v13, %v6992_v54  ;;  %v7140_v6 = vadd.f32 %v3040_v14, %v2995_v11  ;;  %v3286_v11 = vpack.c.bf16 %v3263_v56, %v3262_v59  ;;  %v8182_v13 = vpack.c.bf16 %v6960_v16, %v6957_v26  ;;  %v7193_v26 = vld [vmem:[%s8066_s4] ss:$0 sm:$0xff]  ;;  %v7239_v59 = vpop.f32.mrf.mxu2 }
 0x495   : > { %5090 = vmatmul.msk.bf16.gmra.mxu0 %vm661_vm5, %v6705_v5  ;;  %v7144_v55 = vadd.f32 %v2902_v37, %v2854_v40  ;;  %v2780_v37 = vadd.f32 %v7064_v42, %v2711_v15  ;;  %v3288_v42 = vpack.c.bf16 %v3267_v43, %v3266_v4 }
 0x496   : > { %v2907_v8 = vpop.f32.mrf.mxu1 }
 0x499   : > { %5099 = vmatmul.msk.bf16.gmra.mxu1 %vm497_vm1, %v3285_v20 }
 0x49a   : > { %v7147_v36 = vpop.f32.mrf.mxu0 }
 0x49e   : > { %v2909_v31 = vpop.f32.mrf.mxu1 }
 0x4a2   : > { %v2831_v52 = vpop.f32.mrf.mxu0 }
 0x4a3   : > { %v2856_v54 = vadd.f32 %v2831_v52, %v7018_v39 }
 0x4a5   : > { %5091 = vmatmul.msk.bf16.gmra.mxu0 %vm661_vm5, %v6755_v57  ;;  %v7156_v5 = vadd.f32 %v2907_v8, %v2856_v54 }
 0x4a6   : > { %v2912_v28 = vpop.f32.mrf.mxu1 }
 0x4a9   : > { %5100 = vmatmul.msk.bf16.gmra.mxu1 %vm497_vm1, %v3286_v11 }
 0x4aa   : > { %v2833_v62 = vpop.f32.mrf.mxu0 }
 0x4ab   : > { %v2857_v7 = vadd.f32 %v2833_v62, %v2778_v30 }
 0x4ad   : > { %v7161_v61 = vadd.f32 %v2909_v31, %v2857_v7  ;;  %v8184_v31 = vld [vmem:[#allocation15_spill] sm:$0xff]  ;;  %v8186_v7 = vld [vmem:[#allocation16_spill] sm:$0xff] }
 0x4ae   : > { %v2914_v39 = vpop.f32.mrf.mxu1  ;;  %v1657_v52 = vadd.f32 %v8184_v31, %v8183_v10 }
 0x4b2   : > { %v2836_v21 = vpop.f32.mrf.mxu0 }
 0x4b3   : > { %v2858_v57 = vadd.f32 %v2836_v21, %v7045_v32 }
 0x4b5   : > { %5092 = vmatmul.msk.bf16.gmra.mxu0 %vm661_vm5, %v6916_v48  ;;  %v7170_v63 = vadd.f32 %v2912_v28, %v2858_v57  ;;  %v3268_v28 = vld [vmem:[%s7008_s21 + $0x90] sm:$0xff]  ;;  %v2992_v57 = vadd.f32 %v7077_v53, %v7071_v41 }
 0x4b6   : > { %v2917_v33 = vpop.f32.mrf.mxu1  ;;  %v3289_v21 = vpack.c.bf16 %v3269_v23, %v3268_v28 }
 0x4b9   : > { %5101 = vmatmul.msk.bf16.gmra.mxu1 %vm497_vm1, %v3287_v46 }
 0x4ba   : > { %v2838_v3 = vpop.f32.mrf.mxu0 }
 0x4bb   : > { %v2859_v38 = vadd.f32 %v2838_v3, %v2780_v37  ;;  %v3071_v37 = vadd.f32 %v7113_v27, %v2992_v57 }
 0x4bd   : > { %v7175_v24 = vadd.f32 %v2914_v39, %v2859_v38  ;;  %v1769_v39 = vadd.f32 %v8186_v7, %v1657_v52  ;;  %v3271_v7 = vld [vmem:[%s7008_s21 + $0xa8] sm:$0xff] }
 0x4be   : > { %v2919_v32 = vpop.f32.mrf.mxu1 }
 0x4c2   : > { %v2841_v29 = vpop.f32.mrf.mxu0 }
 0x4c3   : > { %v2860_v48 = vadd.f32 %v2841_v29, %v7085_v9 }
 0x4c5   : > { %5093 = vmatmul.msk.bf16.gmra.mxu0 %vm661_vm5, %v8182_v13  ;;  %v7184_v35 = vadd.f32 %v2917_v33, %v2860_v48  ;;  %v8188_v33 = vld [vmem:[#allocation17_spill] sm:$0xff] }
 0x4c6   : > { %v3349_v14 = vpop.f32.mrf.mxu1  ;;  %v1878_v15 = vadd.f32 %v8188_v33, %v1769_v39  ;;  %v5321_v39 = vld [vmem:[%s8067_s5 + $0xf8] sm:$0xff] }
 0x4c7   : > { %v3350_v16 = vadd.f32 %v7193_v26, %v3349_v14 }
 0x4c8   : > { %v7231_v27 = vadd.f32 %v7211_v44, %v1878_v15  ;;  %v8193_v15 = vld [vmem:[#allocation23_spill] sm:$0xff] }
 0x4c9   : > { %5102 = vmatmul.msk.bf16.gmra.mxu1 %vm497_vm1, %v3288_v42  ;;  %v3424_v34 = vsel %vm5565_vm4, %v3350_v16, 0.0 }
 0x4ca   : > { %v2843_v40 = vpop.f32.mrf.mxu0  ;;  %v3558_v54 = vmax.f32 %v3424_v34, 0.0 }
 0x4cb   : > { %v2861_v9 = vadd.f32 %v2843_v40, %v2782_v2 }
 0x4cc   : > { %v3620_v43 = vrot.slane %v3558_v54, 1  ;;  %v3830_v13 = vrot.slane %v3558_v54, 2 }
 0x4cd   : > { %v7196_v20 = vadd.f32 %v2919_v32, %v2861_v9 }
 0x4ce   : > { %v3351_v8 = vpop.f32.mrf.mxu1 }
 0x4cf   : > { %v3352_v22 = vadd.f32 %v7193_v26, %v3351_v8 }
 0x4d1   : > { %v3425_v56 = vsel %vm5551_vm2, %v3352_v22, 0.0 }
 0x4d2   : > { %v3559_v25 = vmax.f32 %v3425_v56, 0.0  ;;  %v3106_v11 = vpop.f32.mrf.mxu0 }
 0x4d3   : > { %v3146_v30 = vadd.f32 %v3106_v11, %v7104_v47  ;;  %v8187_v47 = vld [vmem:[#allocation19_spill] sm:$0xff] }
 0x4d4   : > { %v3588_v62 = vpack.c.bf16 %v3559_v25, %v3558_v54  ;;  %v7221_v46 = vadd.f32 %v7211_v44, %v8187_v47  ;;  %v3621_v3 = vrot.slane %v3559_v25, 1  ;;  %v3831_v29 = vrot.slane %v3559_v25, 2  ;;  %v8190_v54 = vld [vmem:[#allocation24_spill] sm:$0xff]  ;;  %v8191_v25 = vld [vmem:[#allocation18_spill] sm:$0xff] }
 0x4d5   : > { %v3162_v12 = vadd.f32 %v7211_v44, %v3146_v30  ;;  %v1659_v11 = vadd.f32 %v8191_v25, %v8190_v54  ;;  %v5322_v47 = vld [vmem:[#allocation2 + $0x18] sm:$0xff]  ;;  %v8197_v54 = vld [vmem:[#allocation25_spill] sm:$0xff] }
 0x4d6   : > { %v3354_v60 = vpop.f32.mrf.mxu1  ;;  %5117 = vmatmul.msk.bf16.vlgmr.msra.gmra.mxu3 %vm661_vm5, %v3588_v62  ;;  %v3622_v58 = vsel %vm792_vm8, %v3620_v43, %v3621_v3  ;;  %v3832_v9 = vsel %vm1060_vm9, %v3830_v13, %v3831_v29  ;;  %v3270_v62 = vld [vmem:[%s7008_s21 + $0xa0] sm:$0xff]  ;;  %v2994_v43 = vadd.f32 %v7099_v19, %v7097_v45 }
 0x4d7   : > { %v3355_v1 = vadd.f32 %v7193_v26, %v3354_v60  ;;  %v3178_v4 = vsub.f32 %v7221_v46, %v3162_v12  ;;  %v3290_v38 = vpack.c.bf16 %v3271_v7, %v3270_v62 }
 0x4d9   : > { %v3426_v32 = vsel %vm5588_vm7, %v3355_v1, 0.0  ;;  %5103 = vmatmul.msk.bf16.gmra.mxu1 %vm497_vm1, %v3289_v21  ;;  %v3194_v40 = vand.u32 2147483647, %v3178_v4  ;;  %v7252_v21 = vpop.f32.mrf.mxu3 }
 0x4da   : > { %v3560_v41 = vmax.f32 %v3426_v32, 0.0  ;;  %v3108_v53 = vpop.f32.mrf.mxu0  ;;  %v8194_v32 = vld [vmem:[#allocation20_spill] sm:$0xff] }
 0x4db   : > { %v3147_v48 = vadd.f32 %v3108_v53, %v3071_v37  ;;  %v3210_v12 = vsel %vm661_vm5, %v3194_v40, 0.0  ;;  %v7259_v37 = vadd.f32 %v7211_v44, %v8193_v15  ;;  %v8195_v40 = vld [vmem:[#allocation22_spill] sm:$0xff] }
 0x4dc   : > { %v3623_v42 = vrot.slane %v3560_v41, 1  ;;  %v3833_v14 = vrot.slane %v3560_v41, 2  ;;  %v5323_v41 = vld [vmem:[%s8067_s5 + $0xf0] sm:$0xff] }
 0x4dd   : > { %v3163_v2 = vadd.f32 %v7211_v44, %v3147_v48 }
 0x4de   : > { %v3624_v16 = vsel %vm792_vm8, %v3621_v3, %v3623_v42  ;;  %v3834_v8 = vsel %vm1060_vm9, %v3831_v29, %v3833_v14  ;;  %v3356_v34 = vpop.f32.mrf.mxu1  ;;  %v1771_v29 = vadd.f32 %v8194_v32, %v1659_v11  ;;  %v5324_v14 = vld [vmem:[#allocation2 + $0x20] sm:$0xff] }
 0x4df   : > { %v3676_v22 = vpack.c.bf16 %v3624_v16, %v3622_v58  ;;  %v3886_v10 = vpack.c.bf16 %v3834_v8, %v3832_v9  ;;  %v3179_v31 = vsub.f32 %v7231_v27, %v3163_v2  ;;  %v3357_v52 = vadd.f32 %v7193_v26, %v3356_v34  ;;  %v7272_v9 = vpop.f32.mrf.mxu2 }
 0x4e0   : > { %v1880_v16 = vadd.f32 %v8195_v40, %v1771_v29  ;;  %v3073_v8 = vadd.f32 %v7131_v17, %v2994_v43 }
 0x4e1   : > { %v3195_v56 = vand.u32 2147483647, %v3179_v31  ;;  %5109 = vmatmul.msk.bf16.vlgmr.msrb.gmra.mxu2 %vm661_vm5, %v3676_v22  ;;  %5125 = vmatmul.msk.bf16.vlgmr.msra.gmra.mxu0 %vm661_vm5, %v3886_v10  ;;  %v3427_v23 = vsel %vm394_vm3, %v3357_v52, 0.0  ;;  %v5325_v22 = vld [vmem:[%s8067_s5 + $0xe8] sm:$0xff]  ;;  %v7283_v11 = vpop.f32.mrf.mxu3 }
 0x4e2   : > { %v3111_v30 = vpop.f32.mrf.mxu0  ;;  %4294 = vmatpush.bf16.msrb.mxu2 %v5321_v39  ;;  %v3454_v33 = vsub.f32 %v5322_v47, %v3427_v23  ;;  %v3561_v48 = vmax.f32 %v3427_v23, 0.0  ;;  %v7290_v62 = vadd.f32 %v7211_v44, %v1880_v16 }
 0x4e3   : > { %v3211_v60 = vsel %vm661_vm5, %v3195_v56, 0.0  ;;  %v3148_v57 = vadd.f32 %v3111_v30, %v7120_v0  ;;  %v8196_v56 = vld [vmem:[#allocation29_spill] sm:$0xff] }
 0x4e4   : > { %v3212_v1 = vadd.f32 %v3211_v60, %v3210_v12  ;;  %v3478_v13 = vand.u32 2147483647, %v3454_v33  ;;  %v1661_v25 = vadd.f32 %v8197_v54, %v8196_v56  ;;  %v5326_v12 = vld [vmem:[%s8067_s5 + $0xe0] sm:$0xff]  ;;  %v3835_v40 = vrot.slane %v3561_v48, 2 }
 0x4e5   : > { %v3164_v3 = vadd.f32 %v7211_v44, %v3148_v57 }
 0x4e6   : > { %v3359_v4 = vpop.f32.mrf.mxu1  ;;  %4295 = vmatpush.bf16.msrb.mxu2 %v5323_v41  ;;  %v3502_v17 = vsel %vm661_vm5, %v3478_v13, 0.0  ;;  %v5327_v41 = vld [vmem:[#allocation2 + $0x28] sm:$0xff]  ;;  %v3272_v13 = vld [vmem:[%s7008_s21 + $0xb0] sm:$0xff] }
 0x4e7   : > { %v3180_v0 = vsub.f32 %v7259_v37, %v3164_v3  ;;  %v3360_v53 = vadd.f32 %v7193_v26, %v3359_v4 }
 0x4e9   : > { %v3196_v42 = vand.u32 2147483647, %v3180_v0  ;;  %v3455_v58 = vsub.f32 %v5324_v14, %v3360_v53  ;;  %v3562_v2 = vmax.f32 %v3360_v53, 0.0  ;;  %5104 = vmatmul.msk.bf16.gmra.mxu1 %vm497_vm1, %v3290_v38  ;;  %v8200_v38 = vld [vmem:[#allocation28_spill] sm:$0xff]  ;;  %v2996_v14 = vadd.f32 %v7239_v59, %v7115_v18 }
 0x4ea   : > { %v3113_v34 = vpop.f32.mrf.mxu0  ;;  %4296 = vmatpush.bf16.msrb.mxu2 %v5325_v22  ;;  %v7303_v32 = vadd.f32 %v7211_v44, %v8200_v38 }
 0x4eb   : > { %v3213_v45 = vsel %vm661_vm5, %v3196_v42, 0.0  ;;  %v3479_v19 = vand.u32 2147483647, %v3455_v58  ;;  %v7279_v10 = vpack.c.bf16 %v3562_v2, %v3561_v48  ;;  %v3149_v52 = vadd.f32 %v3113_v34, %v3073_v8  ;;  %v3273_v42 = vld [vmem:[%s7008_s21 + $0xb8] sm:$0xff]  ;;  %v7310_v8 = vpop.f32.mrf.mxu2 }
 0x4ec   : > { %v3214_v31 = vadd.f32 %v3213_v45, %v3212_v1  ;;  %v8198_v1 = vld [vmem:[#allocation26_spill] sm:$0xff]  ;;  %v3626_v33 = vrot.slane %v3562_v2, 1  ;;  %v3836_v29 = vrot.slane %v3562_v2, 2  ;;  %v3625_v58 = vrot.slane %v3561_v48, 1 }
 0x4ed   : > { %v3503_v23 = vsel %vm661_vm5, %v3479_v19, 0.0  ;;  %5118 = vmatmul.msk.bf16.gmra.mxu3 %vm661_vm5, %v7279_v10  ;;  %v3165_v7 = vadd.f32 %v7211_v44, %v3149_v52  ;;  %v1773_v47 = vadd.f32 %v8198_v1, %v1661_v25  ;;  %v3291_v56 = vpack.c.bf16 %v3273_v42, %v3272_v13 }
 0x4ee   : > { %v3504_v30 = vadd.f32 %v3503_v23, %v3502_v17  ;;  %v3361_v39 = vpop.f32.mrf.mxu1  ;;  %4297 = vmatpush.bf16.msrb.mxu2 %v5326_v12  ;;  %v3627_v54 = vsel %vm792_vm8, %v3625_v58, %v3626_v33  ;;  %v3047_v17 = vpop.f32.mrf.mxu3  ;;  %v3075_v1 = vadd.f32 %v7252_v21, %v2996_v14  ;;  %v8203_v21 = vld [vmem:[#allocation30_spill] sm:$0xff] }
 0x4ef   : > { %v3362_v60 = vadd.f32 %v7193_v26, %v3361_v39  ;;  %v3181_v57 = vsub.f32 %v7290_v62, %v3165_v7 }
 0x4f1   : > { %v3429_v3 = vsel %vm399_vm6, %v3362_v60, 0.0  ;;  %v3197_v4 = vand.u32 2147483647, %v3181_v57  ;;  %v8201_v60 = vld [vmem:[#allocation27_spill] sm:$0xff] }
 0x4f2   : > { %v3456_v0 = vsub.f32 %v5327_v41, %v3429_v3  ;;  %v3563_v53 = vmax.f32 %v3429_v3, 0.0  ;;  %v3116_v43 = vpop.f32.mrf.mxu0  ;;  %v1882_v57 = vadd.f32 %v8201_v60, %v1773_v47  ;;  %v8202_v41 = vld [vmem:[#allocation34_spill] sm:$0xff] }
 0x4f3   : > { %v3150_v16 = vadd.f32 %v3116_v43, %v7140_v6  ;;  %v3215_v34 = vsel %vm661_vm5, %v3197_v4, 0.0  ;;  %v3837_v6 = vsel %vm1060_vm9, %v3835_v40, %v3836_v29  ;;  %v2971_v14 = vpop.f32.mrf.mxu2 }
 0x4f4   : > { %v3480_v22 = vand.u32 2147483647, %v3456_v0  ;;  %v3628_v2 = vrot.slane %v3563_v53, 1  ;;  %v3838_v45 = vrot.slane %v3563_v53, 2  ;;  %v3216_v19 = vadd.f32 %v3215_v34, %v3214_v31 }
 0x4f5   : > { %v3166_v52 = vadd.f32 %v7211_v44, %v3150_v16  ;;  %v1663_v0 = vadd.f32 %v8203_v21, %v8202_v41  ;;  %v7338_v13 = vadd.f32 %v7211_v44, %v1882_v57  ;;  %v8206_v57 = vld [vmem:[#allocation32_spill] sm:$0xff]  ;;  %v2998_v41 = vadd.f32 %v7310_v8, %v7133_v51 }
 0x4f6   : > { %v3505_v25 = vsel %vm661_vm5, %v3480_v22, 0.0  ;;  %v3364_v18 = vpop.f32.mrf.mxu1  ;;  %v3629_v59 = vsel %vm792_vm8, %v3626_v33, %v3628_v2  ;;  %v3839_v48 = vsel %vm1060_vm9, %v3836_v29, %v3838_v45  ;;  %v8205_v2 = vld [vmem:[#allocation31_spill] sm:$0xff] }
 0x4f7   : > { %v3506_v23 = vadd.f32 %v3505_v25, %v3504_v30  ;;  %v3182_v7 = vsub.f32 %v7303_v32, %v3166_v52  ;;  %v3365_v31 = vadd.f32 %v7193_v26, %v3364_v18  ;;  %v7321_v39 = vpack.c.bf16 %v3629_v59, %v3627_v54  ;;  %v5328_v30 = vld [vmem:[#allocation2 + $0x30] sm:$0xff]  ;;  %8204 = vst [vmem:[#allocation21_spill] sm:$0xff] %v7338_v13  ;;  %v7347_v52 = vpop.f32.mrf.mxu3  ;;  %v5329_v54 = vld [vmem:[#allocation2 + $0x38] sm:$0xff] }
 0x4f8   : > { %v7323_v12 = vpack.c.bf16 %v3839_v48, %v3837_v6  ;;  %v1775_v45 = vadd.f32 %v8205_v2, %v1663_v0  ;;  %v5330_v2 = vld [vmem:[#allocation2 + $0x40] sm:$0xff] }
 0x4f9   : > { %v3198_v3 = vand.u32 2147483647, %v3182_v7  ;;  %v3430_v33 = vsel %vm394_vm3, %v3365_v31, 0.0  ;;  %5105 = vmatmul.msk.bf16.gmra.mxu1 %vm497_vm1, %v3291_v56  ;;  %5110 = vmatmul.msk.bf16.gmra.mxu2 %vm661_vm5, %v7321_v39  ;;  %v3275_v7 = vld [vmem:[%s7008_s21 + $0xc8] sm:$0xff] }
 0x4fa   : > { %v3457_v38 = vsub.f32 %v5328_v30, %v3430_v33  ;;  %5126 = vmatmul.msk.bf16.gmra.mxu0 %vm661_vm5, %v7323_v12  ;;  %v3118_v29 = vpop.f32.mrf.mxu0  ;;  %v3564_v6 = vmax.f32 %v3430_v33, 0.0 }
 0x4fb   : > { %v3217_v4 = vsel %vm661_vm5, %v3198_v3, 0.0  ;;  %v3151_v47 = vadd.f32 %v3118_v29, %v3075_v1  ;;  %v1884_v1 = vadd.f32 %v8206_v57, %v1775_v45  ;;  %v7367_v0 = vpop.f32.mrf.mxu2 }
 0x4fc   : > { %v3218_v53 = vadd.f32 %v3217_v4, %v3216_v19  ;;  %v3481_v43 = vand.u32 2147483647, %v3457_v38  ;;  %v2997_v19 = vadd.f32 %v7272_v9, %v7126_v50  ;;  %v8207_v4 = vld [vmem:[#allocation33_spill] sm:$0xff] }
 0x4fd   : > { %v3167_v42 = vadd.f32 %v7211_v44, %v3151_v47 }
 0x4fe   : > { %v3507_v58 = vsel %vm661_vm5, %v3481_v43, 0.0  ;;  %v3366_v40 = vpop.f32.mrf.mxu1  ;;  %v3076_v59 = vadd.f32 %v7283_v11, %v2997_v19  ;;  %v7359_v11 = vadd.f32 %v7211_v44, %v8207_v4  ;;  %v7371_v43 = vadd.f32 %v7211_v44, %v1884_v1 }
 0x4ff   : > { %v3508_v16 = vadd.f32 %v3507_v58, %v3506_v23  ;;  %v3183_v34 = vsub.f32 %v7338_v13, %v3167_v42  ;;  %v3367_v22 = vadd.f32 %v7193_v26, %v3366_v40  ;;  %v3274_v23 = vld [vmem:[%s7008_s21 + $0xc0] sm:$0xff]  ;;  %v8211_v58 = vld [vmem:[#allocation12_spill] sm:$0xff]  ;;  %v2999_v1 = vadd.f32 %v2971_v14, %v7144_v55 }
 0x500   : > { %v3292_v38 = vpack.c.bf16 %v3275_v7, %v3274_v23  ;;  %8208 = vst [vmem:[#allocation15_spill] sm:$0xff] %v7359_v11  ;;  %v8210_v42 = vld [vmem:[#allocation13_spill] sm:$0xff]  ;;  %v3840_v23 = vrot.slane %v3564_v6, 2 }
 0x501   : > { %v3199_v56 = vand.u32 2147483647, %v3183_v34  ;;  %v3458_v25 = vsub.f32 %v5329_v54, %v3367_v22  ;;  %v3565_v18 = vmax.f32 %v3367_v22, 0.0  ;;  %8209 = vst [vmem:[#allocation4_spill] sm:$0xff] %v7371_v43  ;;  %v2544_v40 = vadd.f32 %v8211_v58, %v8210_v42  ;;  %v8212_v54 = vld [vmem:[#allocation52_spill] sm:$0xff] }
 0x502   : > { %v3121_v48 = vpop.f32.mrf.mxu0  ;;  %v3078_v58 = vadd.f32 %v7347_v52, %v2999_v1  ;;  %v3276_v52 = vld [vmem:[%s7008_s21 + $0xd0] sm:$0xff] }
 0x503   : > { %v3219_v31 = vsel %vm661_vm5, %v3199_v56, 0.0  ;;  %v3482_v60 = vand.u32 2147483647, %v3458_v25  ;;  %v3152_v30 = vadd.f32 %v3121_v48, %v3076_v59  ;;  %v7354_v50 = vpack.c.bf16 %v3565_v18, %v3564_v6  ;;  %v3052_v59 = vpop.f32.mrf.mxu3 }
 0x504   : > { %v3220_v3 = vadd.f32 %v3219_v31, %v3218_v53  ;;  %v3631_v34 = vrot.slane %v3565_v18, 1  ;;  %v3841_v51 = vrot.slane %v3565_v18, 2  ;;  %v2707_v25 = vadd.f32 %v8212_v54, %v2544_v40 }
 0x505   : > { %v3509_v9 = vsel %vm661_vm5, %v3482_v60, 0.0  ;;  %v3168_v33 = vadd.f32 %v7211_v44, %v3152_v30  ;;  %5119 = vmatmul.msk.bf16.gmra.mxu3 %vm661_vm5, %v7354_v50  ;;  %v3630_v48 = vrot.slane %v3564_v6, 1 }
 0x506   : > { %v3510_v29 = vadd.f32 %v3509_v9, %v3508_v16  ;;  %v3369_v47 = vpop.f32.mrf.mxu1  ;;  %v3077_v16 = vadd.f32 %v3047_v17, %v2998_v41  ;;  %v3842_v6 = vsel %vm1060_vm9, %v3840_v23, %v3841_v51 }
 0x507   : > { %v3370_v21 = vadd.f32 %v7193_v26, %v3369_v47  ;;  %v3184_v53 = vsub.f32 %v7359_v11, %v3168_v33  ;;  %v3632_v9 = vsel %vm792_vm8, %v3630_v48, %v3631_v34 }
 0x509   : > { %v3432_v22 = vsel %vm399_vm6, %v3370_v21, 0.0  ;;  %5106 = vmatmul.msk.bf16.gmra.mxu1 %vm497_vm1, %v3292_v38  ;;  %v3200_v8 = vand.u32 2147483647, %v3184_v53 }
 0x50a   : > { %v3459_v45 = vsub.f32 %v5330_v2, %v3432_v22  ;;  %v3566_v19 = vmax.f32 %v3432_v22, 0.0  ;;  %v3123_v56 = vpop.f32.mrf.mxu0  ;;  %v5331_v2 = vld [vmem:[#allocation2 + $0x48] sm:$0xff] }
 0x50b   : > { %v3153_v7 = vadd.f32 %v3123_v56, %v3077_v16  ;;  %v3221_v17 = vsel %vm661_vm5, %v3200_v8, 0.0  ;;  %v2976_v8 = vpop.f32.mrf.mxu2  ;;  %v3277_v56 = vld [vmem:[%s7008_s21 + $0xd8] sm:$0xff] }
 0x50c   : > { %v3483_v31 = vand.u32 2147483647, %v3459_v45  ;;  %v3633_v60 = vrot.slane %v3566_v19, 1  ;;  %v3843_v57 = vrot.slane %v3566_v19, 2  ;;  %v3222_v30 = vadd.f32 %v3221_v17, %v3220_v3  ;;  %v8213_v3 = vld [vmem:[#allocation53_spill] sm:$0xff]  ;;  %v8216_v17 = vld [vmem:[#allocation38_spill] sm:$0xff] }
 0x50d   : > { %v3169_v18 = vadd.f32 %v7211_v44, %v3153_v7  ;;  %v2776_v53 = vadd.f32 %v8213_v3, %v2707_v25  ;;  %v3055_v7 = vpop.f32.mrf.mxu3 }
 0x50e   : > { %v3511_v38 = vsel %vm661_vm5, %v3483_v31, 0.0  ;;  %v3371_v4 = vpop.f32.mrf.mxu1  ;;  %v3634_v33 = vsel %vm792_vm8, %v3631_v34, %v3633_v60  ;;  %v3844_v47 = vsel %vm1060_vm9, %v3841_v51, %v3843_v57  ;;  %v8215_v34 = vld [vmem:[#allocation35_spill] sm:$0xff]  ;;  %v7409_v31 = vadd.f32 %v7211_v44, %v8216_v17  ;;  %v8218_v57 = vld [vmem:[#allocation36_spill] sm:$0xff] }
 0x50f   : > { %v3512_v41 = vadd.f32 %v3511_v38, %v3510_v29  ;;  %v3185_v21 = vsub.f32 %v7371_v43, %v3169_v18  ;;  %v3372_v55 = vadd.f32 %v7193_v26, %v3371_v4  ;;  %v7389_v14 = vpack.c.bf16 %v3634_v33, %v3632_v9  ;;  %v8214_v29 = vld [vmem:[#allocation39_spill] sm:$0xff] }
 0x510   : > { %v7392_v42 = vpack.c.bf16 %v3844_v47, %v3842_v6  ;;  %v1665_v22 = vadd.f32 %v8215_v34, %v8214_v29  ;;  %v2855_v51 = vadd.f32 %v7147_v36, %v2776_v53  ;;  %8217 = vst [vmem:[#allocation16_spill] sm:$0xff] %v7409_v31  ;;  %v3293_v60 = vpack.c.bf16 %v3277_v56, %v3276_v52 }
 0x511   : > { %v3201_v40 = vand.u32 2147483647, %v3185_v21  ;;  %v3433_v16 = vsel %vm394_vm3, %v3372_v55, 0.0  ;;  %5111 = vmatmul.msk.bf16.gmra.mxu2 %vm661_vm5, %v7389_v14  ;;  %v5332_v55 = vld [vmem:[#allocation2 + $0x50] sm:$0xff] }
 0x512   : > { %v3460_v45 = vsub.f32 %v5331_v2, %v3433_v16  ;;  %5127 = vmatmul.msk.bf16.gmra.mxu0 %vm661_vm5, %v7392_v42  ;;  %v3126_v19 = vpop.f32.mrf.mxu0  ;;  %v1777_v1 = vadd.f32 %v8218_v57, %v1665_v22  ;;  %v2931_v18 = vadd.f32 %v7135_v49, %v2855_v51  ;;  %v3567_v47 = vmax.f32 %v3433_v16, 0.0  ;;  %v8221_v16 = vld [vmem:[#allocation40_spill] sm:$0xff] }
 0x513   : > { %v3223_v54 = vsel %vm661_vm5, %v3201_v40, 0.0  ;;  %v3154_v25 = vadd.f32 %v3126_v19, %v3078_v58  ;;  %v8219_v58 = vld [vmem:[#allocation37_spill] sm:$0xff]  ;;  %v2978_v2 = vpop.f32.mrf.mxu2 }
 0x514   : > { %v3224_v48 = vadd.f32 %v3223_v54, %v3222_v30  ;;  %v3484_v23 = vand.u32 2147483647, %v3460_v45  ;;  %v3000_v6 = vadd.f32 %v7367_v0, %v2931_v18  ;;  %v1886_v40 = vadd.f32 %v8219_v58, %v1777_v1  ;;  %v8220_v0 = vld [vmem:[#allocation43_spill] sm:$0xff]  ;;  %v8225_v1 = vld [vmem:[#allocation42_spill] sm:$0xff] }
 0x515   : > { %v3170_v36 = vadd.f32 %v7211_v44, %v3154_v25  ;;  %v1667_v19 = vadd.f32 %v8221_v16, %v8220_v0  ;;  %v3002_v58 = vadd.f32 %v2978_v2, %v7161_v61 }
 0x516   : > { %v3513_v9 = vsel %vm661_vm5, %v3484_v23, 0.0  ;;  %v3374_v38 = vpop.f32.mrf.mxu1  ;;  %v3079_v49 = vadd.f32 %v3052_v59, %v3000_v6  ;;  %v7429_v59 = vadd.f32 %v7211_v44, %v1886_v40  ;;  %v3001_v23 = vadd.f32 %v2976_v8, %v7156_v5  ;;  %v5333_v5 = vld [vmem:[#allocation2 + $0x58] sm:$0xff] }
 0x517   : > { %v3186_v4 = vsub.f32 %v7409_v31, %v3170_v36  ;;  %v3375_v30 = vadd.f32 %v7193_v26, %v3374_v38  ;;  %v3514_v33 = vadd.f32 %v3513_v9, %v3512_v41  ;;  %v1779_v18 = vadd.f32 %v8225_v1, %v1667_v19  ;;  %v8226_v1 = vld [vmem:[#allocation44_spill] sm:$0xff] }
 0x518   : > { %8222 = vst [vmem:[#allocation19_spill] sm:$0xff] %v7429_v59  ;;  %v3080_v9 = vadd.f32 %v3055_v7, %v3001_v23  ;;  %v3635_v40 = vrot.slane %v3567_v47, 1 }
 0x519   : > { %v3202_v21 = vand.u32 2147483647, %v3186_v4  ;;  %v3461_v3 = vsub.f32 %v5332_v55, %v3375_v30  ;;  %v3568_v53 = vmax.f32 %v3375_v30, 0.0  ;;  %5107 = vmatmul.msk.bf16.gmra.mxu1 %vm497_vm1, %v3293_v60  ;;  %v8223_v60 = vld [vmem:[#allocation41_spill] sm:$0xff] }
 0x51a   : > { %v3128_v29 = vpop.f32.mrf.mxu0  ;;  %v7437_v57 = vadd.f32 %v7211_v44, %v8223_v60  ;;  %v3278_v55 = vld [vmem:[%s7008_s21 + $0xe0] sm:$0xff] }
 0x51b   : > { %v3225_v34 = vsel %vm661_vm5, %v3202_v21, 0.0  ;;  %v3485_v22 = vand.u32 2147483647, %v3461_v3  ;;  %v7421_v51 = vpack.c.bf16 %v3568_v53, %v3567_v47  ;;  %v3155_v45 = vadd.f32 %v3128_v29, %v3079_v49  ;;  %v3279_v3 = vld [vmem:[%s7008_s21 + $0xe8] sm:$0xff] }
 0x51c   : > { %v3226_v41 = vadd.f32 %v3225_v34, %v3224_v48  ;;  %v3057_v48 = vpop.f32.mrf.mxu3  ;;  %8224 = vst [vmem:[#allocation17_spill] sm:$0xff] %v7437_v57  ;;  %v3636_v38 = vrot.slane %v3568_v53, 1  ;;  %v3846_v30 = vrot.slane %v3568_v53, 2  ;;  %v3845_v49 = vrot.slane %v3567_v47, 2 }
 0x51d   : > { %v3515_v52 = vsel %vm661_vm5, %v3485_v22, 0.0  ;;  %5120 = vmatmul.msk.bf16.gmra.mxu3 %vm661_vm5, %v7421_v51  ;;  %v3171_v54 = vadd.f32 %v7211_v44, %v3155_v45  ;;  %v3294_v16 = vpack.c.bf16 %v3279_v3, %v3278_v55 }
 0x51e   : > { %v3516_v56 = vadd.f32 %v3515_v52, %v3514_v33  ;;  %v3376_v25 = vpop.f32.mrf.mxu1  ;;  %v3637_v19 = vsel %vm792_vm8, %v3635_v40, %v3636_v38  ;;  %v2981_v52 = vpop.f32.mrf.mxu2  ;;  %v3847_v47 = vsel %vm1060_vm9, %v3845_v49, %v3846_v30  ;;  %v8228_v49 = vld [vmem:[#allocation47_spill] sm:$0xff] }
 0x51f   : > { %v3377_v17 = vadd.f32 %v7193_v26, %v3376_v25  ;;  %v3187_v36 = vsub.f32 %v7429_v59, %v3171_v54 }
 0x521   : > { %v3435_v4 = vsel %vm399_vm6, %v3377_v17, 0.0  ;;  %v3203_v33 = vand.u32 2147483647, %v3187_v36 }
 0x522   : > { %v3462_v8 = vsub.f32 %v5333_v5, %v3435_v4  ;;  %v3569_v6 = vmax.f32 %v3435_v4, 0.0  ;;  %v3131_v21 = vpop.f32.mrf.mxu0  ;;  %v3081_v4 = vadd.f32 %v3057_v48, %v3002_v58 }
 0x523   : > { %v3156_v29 = vadd.f32 %v3131_v21, %v3080_v9  ;;  %v3227_v34 = vsel %vm661_vm5, %v3203_v33, 0.0  ;;  %v1888_v9 = vadd.f32 %v8226_v1, %v1779_v18 }
 0x524   : > { %v3486_v7 = vand.u32 2147483647, %v3462_v8  ;;  %v3638_v22 = vrot.slane %v3569_v6, 1  ;;  %v3848_v45 = vrot.slane %v3569_v6, 2  ;;  %v3228_v0 = vadd.f32 %v3227_v34, %v3226_v41  ;;  %v3060_v33 = vpop.f32.mrf.mxu3 }
 0x525   : > { %v3172_v53 = vadd.f32 %v7211_v44, %v3156_v29  ;;  %v7468_v55 = vadd.f32 %v7211_v44, %v1888_v9  ;;  %v8229_v29 = vld [vmem:[#allocation46_spill] sm:$0xff] }
 0x526   : > { %v3517_v54 = vsel %vm661_vm5, %v3486_v7, 0.0  ;;  %v3379_v25 = vpop.f32.mrf.mxu1  ;;  %v3639_v61 = vsel %vm792_vm8, %v3636_v38, %v3638_v22  ;;  %v3849_v2 = vsel %vm1060_vm9, %v3846_v30, %v3848_v45  ;;  %v1669_v34 = vadd.f32 %v8229_v29, %v8228_v49 }
 0x527   : > { %v3518_v23 = vadd.f32 %v3517_v54, %v3516_v56  ;;  %v3188_v17 = vsub.f32 %v7437_v57, %v3172_v53  ;;  %v3380_v41 = vadd.f32 %v7193_v26, %v3379_v25  ;;  %v7454_v36 = vpack.c.bf16 %v3639_v61, %v3637_v19  ;;  %v5334_v56 = vld [vmem:[#allocation2 + $0x60] sm:$0xff]  ;;  %8227 = vst [vmem:[#allocation6_spill] sm:$0xff] %v7468_v55  ;;  %v5335_v19 = vld [vmem:[#allocation2 + $0x68] sm:$0xff] }
 0x528   : > { %v7456_v60 = vpack.c.bf16 %v3849_v2, %v3847_v47  ;;  %v3003_v53 = vadd.f32 %v2981_v52, %v7170_v63 }
 0x529   : > { %v3204_v5 = vand.u32 2147483647, %v3188_v17  ;;  %v3436_v38 = vsel %vm394_vm3, %v3380_v41, 0.0  ;;  %5108 = vmatmul.msk.bf16.gmra.mxu1 %vm497_vm1, %v3294_v16  ;;  %5112 = vmatmul.msk.bf16.gmra.mxu2 %vm661_vm5, %v7454_v36  ;;  %v8230_v17 = vld [vmem:[#allocation48_spill] sm:$0xff] }
 0x52a   : > { %v3463_v30 = vsub.f32 %v5334_v56, %v3436_v38  ;;  %5128 = vmatmul.msk.bf16.gmra.mxu0 %vm661_vm5, %v7456_v60  ;;  %v3133_v8 = vpop.f32.mrf.mxu0  ;;  %v3082_v61 = vadd.f32 %v3060_v33, %v3003_v53  ;;  %v3570_v47 = vmax.f32 %v3436_v38, 0.0  ;;  %v1781_v41 = vadd.f32 %v8230_v17, %v1669_v34 }
 0x52b   : > { %v3229_v6 = vsel %vm661_vm5, %v3204_v5, 0.0  ;;  %v3157_v18 = vadd.f32 %v3133_v8, %v3081_v4 }
 0x52c   : > { %v3230_v48 = vadd.f32 %v3229_v6, %v3228_v0  ;;  %v3487_v21 = vand.u32 2147483647, %v3463_v30  ;;  %v2983_v0 = vpop.f32.mrf.mxu2  ;;  %v3062_v1 = vpop.f32.mrf.mxu3  ;;  %v8231_v30 = vld [vmem:[#allocation45_spill] sm:$0xff] }
 0x52d   : > { %v3173_v3 = vadd.f32 %v7211_v44, %v3157_v18  ;;  %v7484_v8 = vadd.f32 %v7211_v44, %v8231_v30  ;;  %v8233_v6 = vld [vmem:[#allocation49_spill] sm:$0xff] }
 0x52e   : > { %v3519_v58 = vsel %vm661_vm5, %v3487_v21, 0.0  ;;  %v3381_v40 = vpop.f32.mrf.mxu1  ;;  %v1890_v18 = vadd.f32 %v8233_v6, %v1781_v41 }
 0x52f   : > { %v3520_v7 = vadd.f32 %v3519_v58, %v3518_v23  ;;  %v3189_v22 = vsub.f32 %v7468_v55, %v3173_v3  ;;  %v3382_v45 = vadd.f32 %v7193_v26, %v3381_v40  ;;  %8232 = vst [vmem:[#allocation24_spill] sm:$0xff] %v7484_v8 }
 0x531   : > { %v3205_v16 = vand.u32 2147483647, %v3189_v22  ;;  %v3464_v54 = vsub.f32 %v5335_v19, %v3382_v45  ;;  %v3571_v25 = vmax.f32 %v3382_v45, 0.0 }
 0x532   : > { %v3136_v2 = vpop.f32.mrf.mxu0 }
 0x533   : > { %v3231_v9 = vsel %vm661_vm5, %v3205_v16, 0.0  ;;  %v3488_v23 = vand.u32 2147483647, %v3464_v54  ;;  %v3158_v5 = vadd.f32 %v3136_v2, %v3082_v61  ;;  %v7479_v56 = vpack.c.bf16 %v3571_v25, %v3570_v47 }
 0x534   : > { %v3232_v4 = vadd.f32 %v3231_v9, %v3230_v48  ;;  %v3004_v48 = vadd.f32 %v2983_v0, %v7175_v24  ;;  %v2986_v49 = vpop.f32.mrf.mxu2  ;;  %v3641_v29 = vrot.slane %v3571_v25, 1  ;;  %v3640_v16 = vrot.slane %v3570_v47, 1  ;;  %v3065_v41 = vpop.f32.mrf.mxu3 }
 0x535   : > { %v3521_v63 = vsel %vm661_vm5, %v3488_v23, 0.0  ;;  %v3174_v33 = vadd.f32 %v7211_v44, %v3158_v5  ;;  %5121 = vmatmul.msk.bf16.gmra.mxu3 %vm661_vm5, %v7479_v56  ;;  %v3851_v24 = vrot.slane %v3571_v25, 2  ;;  %v7498_v0 = vadd.f32 %v7211_v44, %v1890_v18 }
 0x536   : > { %v3522_v52 = vadd.f32 %v3521_v63, %v3520_v7  ;;  %v3384_v38 = vpop.f32.mrf.mxu1  ;;  %v3083_v58 = vadd.f32 %v3062_v1, %v3004_v48  ;;  %v5336_v7 = vld [vmem:[#allocation2 + $0x70] sm:$0xff]  ;;  %v3850_v1 = vrot.slane %v3570_v47, 2  ;;  %v3642_v25 = vsel %vm792_vm8, %v3640_v16, %v3641_v29  ;;  %v8239_v16 = vld [vmem:[#allocation14_spill] sm:$0xff] }
 0x537   : > { %v3385_v21 = vadd.f32 %v7193_v26, %v3384_v38  ;;  %v3190_v3 = vsub.f32 %v7484_v8, %v3174_v33  ;;  %8234 = vst [vmem:[#allocation18_spill] sm:$0xff] %v7498_v0  ;;  %v5340_v8 = vld [vmem:[#allocation2 + $0x90] sm:$0xff] }
 0x539   : > { %v3438_v40 = vsel %vm399_vm6, %v3385_v21, 0.0  ;;  %5141 = vmatmul.msk.bf16.vlgmr.msra.gmra.mxu1 %vm661_vm5, %v7321_v39  ;;  %v3206_v34 = vand.u32 2147483647, %v3190_v3  ;;  %v3005_v39 = vadd.f32 %v2986_v49, %v7184_v35  ;;  %v3852_v35 = vsel %vm1060_vm9, %v3850_v1, %v3851_v24  ;;  %v8235_v21 = vld [vmem:[#allocation51_spill] sm:$0xff]  ;;  %v8236_v3 = vld [vmem:[#allocation10_spill] sm:$0xff] }
 0x53a   : > { %v3465_v22 = vsub.f32 %v5336_v7, %v3438_v40  ;;  %v3572_v45 = vmax.f32 %v3438_v40, 0.0  ;;  %v3138_v53 = vpop.f32.mrf.mxu0 }
 0x53b   : > { %v3159_v19 = vadd.f32 %v3138_v53, %v3083_v58  ;;  %v3233_v54 = vsel %vm661_vm5, %v3206_v34, 0.0  ;;  %v1671_v58 = vadd.f32 %v8236_v3, %v8235_v21 }
 0x53c   : > { %v3489_v61 = vand.u32 2147483647, %v3465_v22  ;;  %v3643_v2 = vrot.slane %v3572_v45, 1  ;;  %v3853_v17 = vrot.slane %v3572_v45, 2  ;;  %v3234_v23 = vadd.f32 %v3233_v54, %v3232_v4  ;;  %v2988_v7 = vpop.f32.mrf.mxu2  ;;  %v8237_v22 = vld [vmem:[#allocation50_spill] sm:$0xff] }
 0x53d   : > { %v3175_v9 = vadd.f32 %v7211_v44, %v3159_v19  ;;  %v3084_v4 = vadd.f32 %v3065_v41, %v3005_v39  ;;  %v7525_v45 = vadd.f32 %v7211_v44, %v8237_v22  ;;  %v3006_v39 = vadd.f32 %v2988_v7, %v7196_v20 }
 0x53e   : > { %v3523_v5 = vsel %vm661_vm5, %v3489_v61, 0.0  ;;  %v3386_v63 = vpop.f32.mrf.mxu1  ;;  %v3644_v30 = vsel %vm792_vm8, %v3641_v29, %v3643_v2  ;;  %v3854_v33 = vsel %vm1060_vm9, %v3851_v24, %v3853_v17  ;;  %v1783_v24 = vadd.f32 %v8239_v16, %v1671_v58  ;;  %v3067_v61 = vpop.f32.mrf.mxu3 }
 0x53f   : > { %v7507_v38 = vadd.f32 %v3523_v5, %v3522_v52  ;;  %v3191_v6 = vsub.f32 %v7498_v0, %v3175_v9  ;;  %v7510_v18 = vpack.c.bf16 %v3644_v30, %v3642_v25  ;;  %v7513_v47 = vpack.c.bf16 %v3854_v33, %v3852_v35  ;;  %8238 = vst [vmem:[#allocation23_spill] sm:$0xff] %v7525_v45 }
 0x540   : > { %v3387_v40 = vadd.f32 %v7193_v26, %v3386_v63  ;;  %v3085_v63 = vadd.f32 %v3067_v61, %v3006_v39 }
 0x541   : > { %v3207_v48 = vand.u32 2147483647, %v3191_v6  ;;  %5113 = vmatmul.msk.bf16.gmra.mxu2 %vm661_vm5, %v7510_v18  ;;  %5129 = vmatmul.msk.bf16.gmra.mxu0 %vm661_vm5, %v7513_v47 }
 0x542   : > { %v3141_v52 = vpop.f32.mrf.mxu0  ;;  %v7531_v19 = vsel %vm394_vm3, %v3387_v40, 0.0 }
 0x543   : > { %v3160_v49 = vadd.f32 %v3141_v52, %v3084_v4  ;;  %v3235_v29 = vsel %vm661_vm5, %v3207_v48, 0.0  ;;  %v3573_v41 = vmax.f32 %v7531_v19, 0.0 }
 0x544   : > { %v3236_v34 = vadd.f32 %v3235_v29, %v3234_v23  ;;  %v8240_v23 = vld [vmem:[#allocation11_spill] sm:$0xff] }
 0x545   : > { %v3176_v53 = vadd.f32 %v7211_v44, %v3160_v49  ;;  %v1892_v5 = vadd.f32 %v8240_v23, %v1783_v24  ;;  %v3855_v7 = vrot.slane %v3573_v41, 2 }
 0x546   : > { %v3389_v54 = vpop.f32.mrf.mxu1 }
 0x547   : > { %v3192_v2 = vsub.f32 %v7525_v45, %v3176_v53  ;;  %v7535_v17 = vadd.f32 %v7193_v26, %v3389_v54  ;;  %v7550_v48 = vadd.f32 %v7211_v44, %v1892_v5 }
 0x549   : > { %v3208_v1 = vand.u32 2147483647, %v3192_v2  ;;  %v3574_v9 = vmax.f32 %v7535_v17, 0.0  ;;  %5142 = vmatmul.msk.bf16.gmra.mxu1 %vm661_vm5, %v7389_v14  ;;  %8241 = vst [vmem:[#allocation20_spill] sm:$0xff] %v7550_v48 }
 0x54a   : > { %v3143_v25 = vpop.f32.mrf.mxu0 }
 0x54b   : > { %v7543_v30 = vpack.c.bf16 %v3574_v9, %v3573_v41  ;;  %v3161_v33 = vadd.f32 %v3143_v25, %v3085_v63  ;;  %v3237_v6 = vsel %vm661_vm5, %v3208_v1, 0.0  ;;  %v3646_v40 = vrot.slane %v3574_v9, 1 }
 0x54c   : > { %v3238_v20 = vadd.f32 %v3237_v6, %v3236_v34  ;;  %v3856_v52 = vrot.slane %v3574_v9, 2  ;;  %v3645_v34 = vrot.slane %v3573_v41, 1 }
 0x54d   : > { %5122 = vmatmul.msk.bf16.gmra.mxu3 %vm661_vm5, %v7543_v30  ;;  %v3177_v35 = vadd.f32 %v7211_v44, %v3161_v33 }
 0x54e   : > { %v3391_v4 = vpop.f32.mrf.mxu1  ;;  %v3647_v54 = vsel %vm792_vm8, %v3645_v34, %v3646_v40  ;;  %v3857_v2 = vsel %vm1060_vm9, %v3855_v7, %v3856_v52 }
 0x54f   : > { %v3392_v21 = vadd.f32 %v7193_v26, %v3391_v4  ;;  %v3193_v3 = vsub.f32 %v7550_v48, %v3177_v35  ;;  %v5339_v48 = vld [vmem:[#allocation2 + $0x88] sm:$0xff] }
 0x551   : > { %v7556_v58 = vsel %vm399_vm6, %v3392_v21, 0.0  ;;  %v3209_v29 = vand.u32 2147483647, %v3193_v3 }
 0x552   : > { %v3575_v49 = vmax.f32 %v7556_v58, 0.0  ;;  %v3468_v45 = vsub.f32 %v5339_v48, %v7556_v58 }
 0x553   : > { %v3239_v44 = vsel %vm661_vm5, %v3209_v29, 0.0 }
 0x554   : > { %v3648_v22 = vrot.slane %v3575_v49, 1  ;;  %v3858_v53 = vrot.slane %v3575_v49, 2  ;;  %v3240_v16 = vadd.f32 %v3239_v44, %v3238_v20 }
 0x556   : > { %v3394_v24 = vpop.f32.mrf.mxu1  ;;  %v3649_v61 = vsel %vm792_vm8, %v3646_v40, %v3648_v22  ;;  %v3859_v39 = vsel %vm1060_vm9, %v3856_v52, %v3858_v53  ;;  %3241 = vadd.xlane.f32.xlu0 %v3240_v16 }
 0x557   : > { %v7564_v1 = vpack.c.bf16 %v3649_v61, %v3647_v54  ;;  %v7566_v9 = vpack.c.bf16 %v3859_v39, %v3857_v2  ;;  %v3395_v41 = vadd.f32 %v7193_v26, %v3394_v24 }
 0x559   : > { %5114 = vmatmul.msk.bf16.gmra.mxu2 %vm661_vm5, %v7564_v1  ;;  %5130 = vmatmul.msk.bf16.gmra.mxu0 %vm661_vm5, %v7566_v9  ;;  %v7577_v23 = vsel %vm394_vm3, %v3395_v41, 0.0  ;;  %v3790_v20 = vpop.f32.mrf.mxu3 }
 0x55a   : > { %5143 = vmatmul.msk.bf16.gmra.mxu1 %vm661_vm5, %v7454_v36  ;;  %v3576_v25 = vmax.f32 %v7577_v23, 0.0  ;;  %v3469_v55 = vsub.f32 %v5340_v8, %v7577_v23 }
 0x55c   : > { %v3650_v22 = vrot.slane %v3576_v25, 1  ;;  %v3860_v53 = vrot.slane %v3576_v25, 2 }
 0x55e   : > { %v3396_v5 = vpop.f32.mrf.mxu1  ;;  %v3927_v21 = vpop.f32.mrf.mxu0 }
 0x55f   : > { %v7580_v63 = vadd.f32 %v7193_v26, %v3396_v5 }
 0x561   : > { %v3577_v33 = vmax.f32 %v7580_v63, 0.0 }
 0x563   : > { %v7584_v6 = vpack.c.bf16 %v3577_v33, %v3576_v25  ;;  %v3651_v29 = vrot.slane %v3577_v33, 1  ;;  %v3861_v34 = vrot.slane %v3577_v33, 2  ;;  %v7611_v33 = vpop.f32.mrf.mxu3 }
 0x564   : > { %v3717_v35 = vpop.f32.mrf.mxu2 }
 0x565   : > { %v3791_v4 = vadd.f32 %v3790_v20, %v3717_v35  ;;  %5123 = vmatmul.msk.bf16.gmra.mxu3 %vm661_vm5, %v7584_v6  ;;  %v3652_v54 = vsel %vm792_vm8, %v3650_v22, %v3651_v29  ;;  %v3862_v2 = vsel %vm1060_vm9, %v3860_v53, %v3861_v34  ;;  %v5337_v53 = vld [vmem:[#allocation2 + $0x78] sm:$0xff] }
 0x566   : > { %v3399_v3 = vpop.f32.mrf.mxu1  ;;  %v7615_v35 = vpop.f32.mrf.mxu0 }
 0x567   : > { %v3400_v40 = vadd.f32 %v7193_v26, %v3399_v3  ;;  %v7589_v52 = vadd.f32 %v3927_v21, %v3791_v4 }
 0x569   : > { %v7593_v49 = vsel %vm399_vm6, %v3400_v40, 0.0 }
 0x56a   : > { %v3578_v7 = vmax.f32 %v7593_v49, 0.0  ;;  %5144 = vmatmul.msk.bf16.gmra.mxu1 %vm661_vm5, %v7510_v18 }
 0x56c   : > { %v3653_v44 = vrot.slane %v3578_v7, 1  ;;  %v3863_v16 = vrot.slane %v3578_v7, 2  ;;  %v7613_v20 = vpop.f32.mrf.mxu2 }
 0x56e   : > { %v3401_v24 = vpop.f32.mrf.mxu1  ;;  %v3654_v61 = vsel %vm792_vm8, %v3651_v29, %v3653_v44  ;;  %v3864_v39 = vsel %vm1060_vm9, %v3861_v34, %v3863_v16  ;;  %v3466_v44 = vsub.f32 %v5337_v53, %v7531_v19 }
 0x56f   : > { %v7602_v41 = vpack.c.bf16 %v3654_v61, %v3652_v54  ;;  %v7604_v5 = vpack.c.bf16 %v3864_v39, %v3862_v2  ;;  %v3402_v25 = vadd.f32 %v7193_v26, %v3401_v24  ;;  %v5338_v61 = vld [vmem:[#allocation2 + $0x80] sm:$0xff] }
 0x570   : > { %v3795_v7 = vpop.f32.mrf.mxu3  ;;  %v3467_v2 = vsub.f32 %v5338_v61, %v7535_v17 }
 0x571   : > { %5115 = vmatmul.msk.bf16.gmra.mxu2 %vm661_vm5, %v7602_v41  ;;  %5131 = vmatmul.msk.bf16.gmra.mxu0 %vm661_vm5, %v7604_v5  ;;  %v7619_v4 = vsel %vm394_vm3, %v3402_v25, 0.0 }
 0x572   : > { %v3579_v40 = vmax.f32 %v7619_v4, 0.0  ;;  %v3491_v0 = vand.u32 2147483647, %v3467_v2 }
 0x574   : > { %v3655_v57 = vrot.slane %v3579_v40, 1  ;;  %v3865_v17 = vrot.slane %v3579_v40, 2 }
 0x576   : > { %v3404_v21 = vpop.f32.mrf.mxu1 }
 0x577   : > { %v7622_v3 = vadd.f32 %v7193_v26, %v3404_v21  ;;  %v3932_v24 = vpop.f32.mrf.mxu0  ;;  %v3490_v21 = vand.u32 2147483647, %v3466_v44  ;;  %v3492_v44 = vand.u32 2147483647, %v3468_v45  ;;  %v5342_v45 = vld [vmem:[#allocation2 + $0xa0] sm:$0xff] }
 0x579   : > { %v3580_v29 = vmax.f32 %v7622_v3, 0.0 }
 0x57a   : > { %5145 = vmatmul.msk.bf16.gmra.mxu1 %vm661_vm5, %v7564_v1 }
 0x57b   : > { %v7628_v34 = vpack.c.bf16 %v3580_v29, %v3579_v40  ;;  %v3527_v40 = vsel %vm661_vm5, %v3491_v0, 0.0 }
 0x57c   : > { %v3722_v22 = vpop.f32.mrf.mxu2 }
 0x57d   : > { %v3796_v16 = vadd.f32 %v3795_v7, %v3722_v22  ;;  %5124 = vmatmul.msk.bf16.gmra.mxu3 %vm661_vm5, %v7628_v34  ;;  %v3656_v7 = vrot.slane %v3580_v29, 1  ;;  %v3866_v22 = vrot.slane %v3580_v29, 2 }
 0x57e   : > { %v3406_v54 = vpop.f32.mrf.mxu1 }
 0x57f   : > { %v3407_v39 = vadd.f32 %v7193_v26, %v3406_v54  ;;  %v7635_v25 = vadd.f32 %v3932_v24, %v3796_v16  ;;  %v3525_v16 = vsel %vm661_vm5, %v3490_v21, 0.0  ;;  %v5341_v24 = vld [vmem:[#allocation2 + $0x98] sm:$0xff]  ;;  %v3657_v54 = vsel %vm792_vm8, %v3655_v57, %v3656_v7  ;;  %v7657_v57 = vld [vmem:[%s8066_s4] ss:$0 sm:$0xff] }
 0x580   : > { %v3470_v48 = vsub.f32 %v5341_v24, %v7580_v63  ;;  %v3867_v2 = vsel %vm1060_vm9, %v3865_v17, %v3866_v22  ;;  %v3493_v21 = vand.u32 2147483647, %v3469_v55  ;;  %v3526_v63 = vadd.f32 %v3525_v16, %v7507_v38  ;;  %v7670_v24 = vpop.f32.mrf.mxu3 }
 0x581   : > { %v3447_v19 = vsel %vm399_vm6, %v3407_v39, 0.0  ;;  %v3529_v55 = vsel %vm661_vm5, %v3492_v44, 0.0 }
 0x582   : > { %v3581_v53 = vmax.f32 %v3447_v19, 0.0  ;;  %v3494_v0 = vand.u32 2147483647, %v3470_v48  ;;  %v3528_v38 = vadd.f32 %v3527_v40, %v3526_v63  ;;  %v3531_v17 = vsel %vm661_vm5, %v3493_v21, 0.0  ;;  %v5347_v63 = vld [vmem:[#allocation2 + $0xc0] sm:$0xff] }
 0x584   : > { %v3658_v61 = vrot.slane %v3581_v53, 1  ;;  %v3868_v26 = vrot.slane %v3581_v53, 2  ;;  %v3471_v53 = vsub.f32 %v5342_v45, %v7593_v49 }
 0x586   : > { %v3409_v58 = vpop.f32.mrf.mxu1  ;;  %v3659_v29 = vsel %vm792_vm8, %v3656_v7, %v3658_v61  ;;  %v3869_v39 = vsel %vm1060_vm9, %v3866_v22, %v3868_v26  ;;  %v5344_v22 = vld [vmem:[#allocation2 + $0xa8] sm:$0xff]  ;;  %v3495_v61 = vand.u32 2147483647, %v3471_v53  ;;  %v5345_v26 = vld [vmem:[#allocation2 + $0xb0] sm:$0xff] }
 0x587   : > { %v7647_v8 = vpack.c.bf16 %v3659_v29, %v3657_v54  ;;  %v7649_v23 = vpack.c.bf16 %v3869_v39, %v3867_v2  ;;  %v3410_v7 = vadd.f32 %v7657_v57, %v3409_v58  ;;  %v3472_v49 = vsub.f32 %v5344_v22, %v7619_v4  ;;  %v7672_v58 = vpop.f32.mrf.mxu2  ;;  %v5346_v29 = vld [vmem:[#allocation2 + $0xb8] sm:$0xff]  ;;  %v7679_v39 = vpop.f32.mrf.mxu0 }
 0x588   : > { %v3473_v16 = vsub.f32 %v5345_v26, %v7622_v3  ;;  %v3530_v54 = vadd.f32 %v3529_v55, %v3528_v38  ;;  %v3533_v4 = vsel %vm661_vm5, %v3494_v0, 0.0  ;;  %v3474_v2 = vsub.f32 %v5346_v29, %v3447_v19  ;;  %v5348_v38 = vld [vmem:[#allocation2 + $0xc8] sm:$0xff]  ;;  %v3800_v29 = vpop.f32.mrf.mxu3 }
 0x589   : > { %5116 = vmatmul.msk.bf16.gmra.mxu2 %vm661_vm5, %v7647_v8  ;;  %5132 = vmatmul.msk.bf16.gmra.mxu0 %vm661_vm5, %v7649_v23  ;;  %v3448_v44 = vsel %vm394_vm3, %v3410_v7, 0.0  ;;  %v3496_v48 = vand.u32 2147483647, %v3472_v49  ;;  %v3535_v45 = vsel %vm661_vm5, %v3495_v61, 0.0 }
 0x58a   : > { %5146 = vmatmul.msk.bf16.gmra.mxu1 %vm661_vm5, %v7602_v41  ;;  %v3532_v3 = vadd.f32 %v3531_v17, %v3530_v54  ;;  %v3497_v53 = vand.u32 2147483647, %v3473_v16  ;;  %v3475_v55 = vsub.f32 %v5347_v63, %v3448_v44 }
 0x58b   : > { %v3537_v22 = vsel %vm661_vm5, %v3496_v48, 0.0 }
 0x58c   : > { %v3534_v7 = vadd.f32 %v3533_v4, %v3532_v3  ;;  %v3539_v19 = vsel %vm661_vm5, %v3497_v53, 0.0  ;;  %v3499_v26 = vand.u32 2147483647, %v3475_v55  ;;  %v7702_v55 = vmax.f32 %v3448_v44, 0.0 }
 0x58d   : > { %5149 = vmatmul.msk.bf16.vlgmr.msrb.gmra.mxu3 %vm661_vm5, %v7323_v12  ;;  %v3498_v12 = vand.u32 2147483647, %v3474_v2 }
 0x58e   : > { %v3411_v40 = vpop.f32.mrf.mxu1  ;;  %v3536_v49 = vadd.f32 %v3535_v45, %v3534_v7  ;;  %v3543_v2 = vsel %vm661_vm5, %v3499_v26, 0.0  ;;  %v5349_v45 = vld [vmem:[#allocation2 + $0xd0] sm:$0xff] }
 0x58f   : > { %v3412_v21 = vadd.f32 %v7657_v57, %v3411_v40  ;;  %v3937_v59 = vpop.f32.mrf.mxu0  ;;  %v3541_v16 = vsel %vm661_vm5, %v3498_v12, 0.0 }
 0x590   : > { %v3538_v17 = vadd.f32 %v3537_v22, %v3536_v49 }
 0x591   : > { %v3476_v0 = vsub.f32 %v5348_v38, %v3412_v21  ;;  %v7704_v15 = vmax.f32 %v3412_v21, 0.0 }
 0x592   : > { %v3540_v63 = vadd.f32 %v3539_v19, %v3538_v17 }
 0x593   : > { %v3500_v40 = vand.u32 2147483647, %v3476_v0  ;;  %v4055_v0 = vrot.slane %v7702_v55, 1  ;;  %v4056_v49 = vrot.slane %v7704_v15, 1 }
 0x594   : > { %v3727_v28 = vpop.f32.mrf.mxu2 }
 0x595   : > { %v3801_v54 = vadd.f32 %v3800_v29, %v3727_v28  ;;  %v3542_v28 = vadd.f32 %v3541_v16, %v3540_v63  ;;  %v3545_v53 = vsel %vm661_vm5, %v3500_v40, 0.0  ;;  %v4057_v21 = vsel %vm792_vm8, %v4055_v0, %v4056_v49  ;;  %v7716_v29 = vpop.f32.mrf.mxu3 }
 0x596   : > { %v3414_v61 = vpop.f32.mrf.mxu1 }
 0x597   : > { %v3415_v4 = vadd.f32 %v7657_v57, %v3414_v61  ;;  %v7687_v48 = vadd.f32 %v3937_v59, %v3801_v54  ;;  %v3544_v22 = vadd.f32 %v3543_v2, %v3542_v28  ;;  %v7720_v54 = vpop.f32.mrf.mxu0 }
 0x599   : > { %v7692_v3 = vsel %vm399_vm6, %v3415_v4, 0.0  ;;  %5133 = vmatmul.msk.bf16.vlgmr.msra.gmra.mxu2 %vm661_vm5, %v7279_v10  ;;  %5157 = vmatmul.msk.bf16.vlgmr.msrb.gmra.mxu0 %vm661_vm5, %v7354_v50  ;;  %v3546_v12 = vadd.f32 %v3545_v53, %v3544_v22 }
 0x59a   : > { %5147 = vmatmul.msk.bf16.gmra.mxu1 %vm661_vm5, %v7647_v8  ;;  %v3477_v59 = vsub.f32 %v5349_v45, %v7692_v3  ;;  %v3584_v7 = vmax.f32 %v7692_v3, 0.0 }
 0x59c   : > { %v3501_v10 = vand.u32 2147483647, %v3477_v59  ;;  %v4058_v44 = vrot.slane %v3584_v7, 1  ;;  %v7718_v17 = vpop.f32.mrf.mxu2 }
 0x59d   : > { %5150 = vmatmul.msk.bf16.gmra.mxu3 %vm661_vm5, %v7392_v42 }
 0x59e   : > { %v3547_v38 = vsel %vm661_vm5, %v3501_v10, 0.0  ;;  %v4059_v26 = vsel %vm792_vm8, %v4056_v49, %v4058_v44  ;;  %v3416_v59 = vpop.f32.mrf.mxu1 }
 0x59f   : > { %v3548_v19 = vadd.f32 %v3547_v38, %v3546_v12  ;;  %v7722_v40 = vpack.c.bf16 %v4059_v26, %v4057_v21 }
 0x5a0   : > { %v3805_v61 = vpop.f32.mrf.mxu3 }
 0x5a1   : > { %3549 = vadd.xlane.f32.xlu1 %v3548_v19 }
 0x5a6   : > { %v3419_v38 = vpop.f32.mrf.mxu1 }
 0x5a7   : > { %v3942_v4 = vpop.f32.mrf.mxu0 }
 0x5a9   : > { %5134 = vmatmul.msk.bf16.gmra.mxu2 %vm661_vm5, %v7354_v50  ;;  %5158 = vmatmul.msk.bf16.gmra.mxu0 %vm661_vm5, %v7421_v51  ;;  %v7738_v50 = vpop.f32.mrf.mxu3 }
 0x5aa   : > { %5148 = vmatmul.msk.bf16.gmra.mxu1 %vm661_vm5, %v7722_v40 }
 0x5ac   : > { %v3732_v16 = vpop.f32.mrf.mxu2 }
 0x5ad   : > { %v3806_v63 = vadd.f32 %v3805_v61, %v3732_v16  ;;  %5151 = vmatmul.msk.bf16.gmra.mxu3 %vm661_vm5, %v7456_v60 }
 0x5af   : > { %v7732_v2 = vadd.f32 %v3942_v4, %v3806_v63  ;;  %v7742_v28 = vpop.f32.mrf.mxu0  ;;  %v3421_v4 = vpop.f32.mrf.mxu1 }
 0x5b4   : > { %v7744_v45 = vpop.f32.mrf.mxu2 }
 0x5b8   : > { %v3810_v53 = vpop.f32.mrf.mxu3 }
 0x5b9   : > { %5135 = vmatmul.msk.bf16.gmra.mxu2 %vm661_vm5, %v7421_v51  ;;  %5159 = vmatmul.msk.bf16.gmra.mxu0 %vm661_vm5, %v7479_v56 }
 0x5ba   : > { %5173 = vmatmul.msk.bf16.vlgmr.msrb.gmra.mxu1 %vm661_vm5, %v7392_v42 }
 0x5bd   : > { %5152 = vmatmul.msk.bf16.gmra.mxu3 %vm661_vm5, %v7513_v47 }
 0x5be   : > { %v3947_v22 = vpop.f32.mrf.mxu0 }
 0x5c0   : > { %v3812_v49 = vpop.f32.mrf.mxu3 }
 0x5c4   : > { %v3737_v10 = vpop.f32.mrf.mxu2 }
 0x5c5   : > { %v3811_v51 = vadd.f32 %v3810_v53, %v3737_v10  ;;  %v3422_v10 = vadd.f32 %v7657_v57, %v3421_v4 }
 0x5c6   : > { %v3949_v26 = vpop.f32.mrf.mxu0 }
 0x5c7   : > { %v7748_v12 = vadd.f32 %v3947_v22, %v3811_v51  ;;  %v3420_v22 = vadd.f32 %v7657_v57, %v3419_v38 }
 0x5c9   : > { %5136 = vmatmul.msk.bf16.gmra.mxu2 %vm661_vm5, %v7479_v56  ;;  %5160 = vmatmul.msk.bf16.gmra.mxu0 %vm661_vm5, %v7543_v30  ;;  %v3242_v42 = vpop.xlane.xlu0 %3241 }
 0x5ca   : > { %5174 = vmatmul.msk.bf16.gmra.mxu1 %vm661_vm5, %v7456_v60  ;;  %v3243_v0 = vrot.slane %v3242_v42, 4  ;;  %v3417_v60 = vadd.f32 %v7657_v57, %v3416_v59  ;;  %v3452_v59 = vsel %vm5971_vm10, %v3420_v22, 0.0  ;;  %v3453_v57 = vsel %vm6023_vm12, %v3422_v10, 0.0 }
 0x5cc   : > { %v3739_v44 = vpop.f32.mrf.mxu2  ;;  %v3244_v19 = vadd.f32 %v3243_v0, %v3242_v42  ;;  %v3451_v0 = vsel %vm5979_vm11, %v3417_v60, 0.0 }
 0x5cd   : > { %v3813_v21 = vadd.f32 %v3812_v49, %v3739_v44  ;;  %5153 = vmatmul.msk.bf16.gmra.mxu3 %vm661_vm5, %v7566_v9 }
 0x5ce   : > { %v3245_v61 = vrot.slane %v3244_v19, 2 }
 0x5cf   : > { %v7758_v16 = vadd.f32 %v3949_v26, %v3813_v21  ;;  %v7779_v26 = vmax.f32 %v3452_v59, 0.0 }
 0x5d0   : > { %v3246_v56 = vadd.f32 %v3245_v61, %v3244_v19  ;;  %v3815_v51 = vpop.f32.mrf.mxu3 }
 0x5d1   : > { %v4280_v4 = vrot.slane %v7779_v26, 1 }
 0x5d2   : > { %v3247_v63 = vrot.slane %v3246_v56, 1 }
 0x5d4   : > { %v3248_v53 = vadd.f32 %v3247_v63, %v3246_v56  ;;  %v7785_v56 = vmax.f32 %v3453_v57, 0.0  ;;  %v4131_v57 = vrot.slane %v7702_v55, 2 }
 0x5d6   : > { %5239 = vpush %v3248_v53  ;;  %v3952_v44 = vpop.f32.mrf.mxu0  ;;  %v4282_v53 = vrot.slane %v7785_v56, 1 }
 0x5d8   : > { %v3817_v60 = vpop.f32.mrf.mxu3  ;;  %v7796_v49 = vsel %vm792_vm8, %v4280_v4, %v4282_v53 }
 0x5d9   : > { %5137 = vmatmul.msk.bf16.gmra.mxu2 %vm661_vm5, %v7543_v30  ;;  %5161 = vmatmul.msk.bf16.gmra.mxu0 %vm661_vm5, %v7584_v6  ;;  %v7777_v30 = vmax.f32 %v3451_v0, 0.0 }
 0x5da   : > { %5175 = vmatmul.msk.bf16.gmra.mxu1 %vm661_vm5, %v7513_v47  ;;  %v7781_v47 = vpop.f32.mrf.mxu1 }
 0x5db   : > { %v4279_v63 = vrot.slane %v7777_v30, 1 }
 0x5dc   : > { %v3742_v38 = vpop.f32.mrf.mxu2 }
 0x5dd   : > { %v3816_v21 = vadd.f32 %v3815_v51, %v3742_v38  ;;  %5154 = vmatmul.msk.bf16.gmra.mxu3 %vm661_vm5, %v7604_v5  ;;  %v7793_v0 = vsel %vm792_vm8, %v4279_v63, %v4280_v4 }
 0x5de   : > { %v3954_v51 = vpop.f32.mrf.mxu0 }
 0x5df   : > { %v7783_v61 = vadd.f32 %v3952_v44, %v3816_v21  ;;  %v4132_v21 = vrot.slane %v7704_v15, 2 }
 0x5e2   : > { %v7798_v59 = vpop.f32.mrf.mxu1 }
 0x5e4   : > { %v3744_v22 = vpop.f32.mrf.mxu2 }
 0x5e5   : > { %v3818_v10 = vadd.f32 %v3817_v60, %v3744_v22  ;;  %v3983_v60 = vpack.c.bf16 %v7704_v15, %v7702_v55  ;;  %v4133_v22 = vsel %vm1060_vm9, %v4131_v57, %v4132_v21 }
 0x5e7   : > { %v7790_v42 = vadd.f32 %v3954_v51, %v3818_v10 }
 0x5e8   : > { %v3820_v38 = vpop.f32.mrf.mxu3 }
 0x5e9   : > { %5138 = vmatmul.msk.bf16.gmra.mxu2 %vm661_vm5, %v7584_v6  ;;  %5162 = vmatmul.msk.bf16.gmra.mxu0 %vm661_vm5, %v7628_v34  ;;  %v4134_v6 = vrot.slane %v3584_v7, 2 }
 0x5ea   : > { %5176 = vmatmul.msk.bf16.gmra.mxu1 %vm661_vm5, %v7566_v9  ;;  %v7810_v19 = vpop.f32.mrf.mxu1 }
 0x5eb   : > { %v4135_v10 = vsel %vm1060_vm9, %v4132_v21, %v4134_v6 }
 0x5ec   : > { %v4138_v3 = vpack.c.bf16 %v4135_v10, %v4133_v22 }
 0x5ed   : > { %5155 = vmatmul.msk.bf16.gmra.mxu3 %vm661_vm5, %v7649_v23 }
 0x5ee   : > { %v3957_v63 = vpop.f32.mrf.mxu0 }
 0x5f0   : > { %v3822_v7 = vpop.f32.mrf.mxu3 }
 0x5f2   : > { %v7828_v55 = vpop.f32.mrf.mxu1 }
 0x5f4   : > { %v3747_v4 = vpop.f32.mrf.mxu2 }
 0x5f5   : > { %v3821_v53 = vadd.f32 %v3820_v38, %v3747_v4 }
 0x5f6   : > { %v3959_v15 = vpop.f32.mrf.mxu0 }
 0x5f7   : > { %v7818_v9 = vadd.f32 %v3957_v63, %v3821_v53 }
 0x5f9   : > { %5139 = vmatmul.msk.bf16.gmra.mxu2 %vm661_vm5, %v7628_v34  ;;  %5163 = vmatmul.msk.bf16.gmra.mxu0 %vm661_vm5, %v3983_v60  ;;  %v4207_v34 = vpack.c.bf16 %v7779_v26, %v7777_v30 }
 0x5fa   : > { %5177 = vmatmul.msk.bf16.gmra.mxu1 %vm661_vm5, %v7604_v5  ;;  %v7834_v63 = vpop.f32.mrf.mxu1 }
 0x5fc   : > { %v3749_v51 = vpop.f32.mrf.mxu2 }
 0x5fd   : > { %v3823_v38 = vadd.f32 %v3822_v7, %v3749_v51  ;;  %5156 = vmatmul.msk.bf16.gmra.mxu3 %vm661_vm5, %v4138_v3 }
 0x5ff   : > { %v7830_v57 = vadd.f32 %v3959_v15, %v3823_v38 }
 0x600   : > { %v3825_v21 = vpop.f32.mrf.mxu3 }
 0x602   : > { %v7842_v7 = vpop.f32.mrf.mxu1 }
 0x606   : > { %v3962_v6 = vpop.f32.mrf.mxu0 }
 0x607   : > { %s5240_s9 = spop %5239 }
 0x608   : > { %v3827_v53 = vpop.f32.mrf.mxu3 }
 0x609   : > { %5140 = vmatmul.msk.bf16.gmra.mxu2 %vm661_vm5, %v3983_v60  ;;  %5164 = vmatmul.msk.bf16.gmra.mxu0 %vm661_vm5, %v4207_v34 }
 0x60a   : > { %5178 = vmatmul.msk.bf16.gmra.mxu1 %vm661_vm5, %v7649_v23 }
 0x60c   : > { %v3752_v5 = vpop.f32.mrf.mxu2 }
 0x60d   : > { %v3826_v4 = vadd.f32 %v3825_v21, %v3752_v5 }
 0x60e   : > { %v3964_v10 = vpop.f32.mrf.mxu0 }
 0x60f   : > { %v7840_v22 = vadd.f32 %v3962_v6, %v3826_v4  ;;  %v7849_v6 = vpop.f32.mrf.mxu1 }
 0x610   : > { %v4151_v60 = vpop.f32.mrf.mxu3 }
 0x614   : > { %v3550_v51 = vpop.xlane.xlu1 %3549  ;;  %v3754_v38 = vpop.f32.mrf.mxu2 }
 0x615   : > { %v3551_v15 = vrot.slane %v3550_v51, 4  ;;  %v3828_v44 = vadd.f32 %v3827_v53, %v3754_v38  ;;  %v3793_v53 = vadd.f32 %v7611_v33, %v7613_v20  ;;  %v4358_v38 = vrot.slane %v7785_v56, 2 }
 0x616   : > { %v4220_v23 = vpop.f32.mrf.mxu0 }
 0x617   : > { %v3552_v31 = vadd.f32 %v3551_v15, %v3550_v51  ;;  %v7844_v43 = vadd.f32 %v3964_v10, %v3828_v44  ;;  %v4355_v51 = vrot.slane %v7777_v30, 2  ;;  %v3968_v15 = vadd.f32 %v7615_v35, %v3793_v53  ;;  %v7863_v20 = vpop.f32.mrf.mxu1 }
 0x619   : > { %v3553_v34 = vrot.slane %v3552_v31, 2  ;;  %5165 = vmatmul.msk.bf16.vlgmr.msrb.gmra.mxu2 %vm661_vm5, %v7389_v14  ;;  %v4356_v14 = vrot.slane %v7779_v26, 2 }
 0x61a   : > { %5179 = vmatmul.msk.bf16.gmra.mxu1 %vm661_vm5, %v4138_v3  ;;  %v4153_v3 = vpop.f32.mrf.mxu3 }
 0x61b   : > { %v3554_v21 = vadd.f32 %v3553_v34, %v3552_v31  ;;  %v4357_v33 = vsel %vm1060_vm9, %v4355_v51, %v4356_v14 }
 0x61c   : > { %v3996_v5 = vpop.f32.mrf.mxu2 }
 0x61d   : > { %v4036_v4 = vadd.f32 %v3996_v5, %v7589_v52  ;;  %v3555_v11 = vrot.slane %v3554_v21, 1 }
 0x61e   : > { %v4222_v52 = vpop.f32.mrf.mxu0 }
 0x61f   : > { %v4115_v44 = vadd.f32 %v7781_v47, %v4036_v4  ;;  %v3556_v10 = vadd.f32 %v3555_v11, %v3554_v21  ;;  %v4359_v11 = vsel %vm1060_vm9, %v4356_v14, %v4358_v38  ;;  %v3798_v4 = vadd.f32 %v7670_v24, %v7672_v58 }
 0x620   : > { %v4362_v26 = vpack.c.bf16 %v4359_v11, %v4357_v33 }
 0x621   : > { %5241 = vpush %v3556_v10  ;;  %v4191_v31 = vadd.f32 %v4151_v60, %v4115_v44 }
 0x622   : > { %v4156_v56 = vpop.f32.mrf.mxu3 }
 0x623   : > { %v7859_v34 = vadd.f32 %v4220_v23, %v4191_v31 }
 0x624   : > { %v3998_v5 = vpop.f32.mrf.mxu2 }
 0x625   : > { %v4037_v13 = vadd.f32 %v3998_v5, %v3968_v15 }
 0x626   : > { %v4225_v21 = vpop.f32.mrf.mxu0 }
 0x627   : > { %v4116_v30 = vadd.f32 %v7798_v59, %v4037_v13  ;;  %v7875_v13 = vpop.f32.mrf.mxu1 }
 0x629   : > { %5166 = vmatmul.msk.bf16.gmra.mxu2 %vm661_vm5, %v7454_v36  ;;  %v4192_v47 = vadd.f32 %v4153_v3, %v4116_v30  ;;  %v3970_v36 = vadd.f32 %v7679_v39, %v3798_v4 }
 0x62a   : > { %5180 = vmatmul.msk.bf16.gmra.mxu1 %vm661_vm5, %v4362_v26  ;;  %v4158_v14 = vpop.f32.mrf.mxu3 }
 0x62b   : > { %v7869_v35 = vadd.f32 %v4222_v52, %v4192_v47 }
 0x62c   : > { %v4001_v60 = vpop.f32.mrf.mxu2 }
 0x62d   : > { %v4038_v23 = vadd.f32 %v4001_v60, %v7635_v25 }
 0x62e   : > { %v4227_v31 = vpop.f32.mrf.mxu0 }
 0x62f   : > { %v4117_v53 = vadd.f32 %v7810_v19, %v4038_v23  ;;  %v7883_v24 = vpop.f32.mrf.mxu1 }
 0x631   : > { %v4193_v59 = vadd.f32 %v4156_v56, %v4117_v53 }
 0x632   : > { %v4161_v15 = vpop.f32.mrf.mxu3 }
 0x633   : > { %v7878_v44 = vadd.f32 %v4225_v21, %v4193_v59 }
 0x634   : > { %v4003_v10 = vpop.f32.mrf.mxu2 }
 0x635   : > { %v4039_v51 = vadd.f32 %v4003_v10, %v3970_v36 }
 0x636   : > { %v4230_v5 = vpop.f32.mrf.mxu0 }
 0x637   : > { %v4118_v38 = vadd.f32 %v7828_v55, %v4039_v51  ;;  %v7891_v55 = vpop.f32.mrf.mxu1 }
 0x639   : > { %5167 = vmatmul.msk.bf16.gmra.mxu2 %vm661_vm5, %v7510_v18  ;;  %v4194_v25 = vadd.f32 %v4158_v14, %v4118_v38 }
 0x63b   : > { %v7885_v58 = vadd.f32 %v4227_v31, %v4194_v25 }
 0x63c   : > { %v4006_v19 = vpop.f32.mrf.mxu2 }
 0x63d   : > { %v4040_v3 = vadd.f32 %v4006_v19, %v7687_v48 }
 0x63f   : > { %v4119_v39 = vadd.f32 %v7834_v63, %v4040_v3  ;;  %v7900_v26 = vpop.f32.mrf.mxu1 }
 0x641   : > { %v4195_v52 = vadd.f32 %v4161_v15, %v4119_v39 }
 0x643   : > { %v7889_v33 = vadd.f32 %v4230_v5, %v4195_v52  ;;  %v4163_v5 = vpop.f32.mrf.mxu3 }
 0x644   : > { %v7893_v11 = vpop.f32.mrf.mxu2 }
 0x647   : > { %v7904_v63 = vpop.f32.mrf.mxu1 }
 0x649   : > { %5168 = vmatmul.msk.bf16.gmra.mxu2 %vm661_vm5, %v7564_v1 }
 0x64c   : > { %v4011_v18 = vpop.f32.mrf.mxu2 }
 0x64d   : > { %v7898_v30 = vadd.f32 %v4011_v18, %v7732_v2 }
 0x64f   : > { %v7911_v60 = vpop.f32.mrf.mxu1 }
 0x652   : > { %s5242_s11 = spop %5241 }
 0x654   : > { %v7902_v48 = vpop.f32.mrf.mxu2 }
 0x657   : > { %v7918_v2 = vpop.f32.mrf.mxu1 }
 0x659   : > { %5169 = vmatmul.msk.bf16.gmra.mxu2 %vm661_vm5, %v7602_v41 }
 0x65c   : > { %v4016_v47 = vpop.f32.mrf.mxu2 }
 0x65d   : > { %v7909_v56 = vadd.f32 %v4016_v47, %v7748_v12 }
 0x65f   : > { %v7926_v12 = vpop.f32.mrf.mxu1 }
 0x664   : > { %v4018_v1 = vpop.f32.mrf.mxu2 }
 0x665   : > { %v7914_v23 = vadd.f32 %v4018_v1, %v7758_v16 }
 0x669   : > { %5170 = vmatmul.msk.bf16.gmra.mxu2 %vm661_vm5, %v7647_v8  ;;  %v4375_v8 = vpop.f32.mrf.mxu1 }
 0x66c   : > { %v4021_v21 = vpop.f32.mrf.mxu2 }
 0x66d   : > { %v7921_v4 = vadd.f32 %v4021_v21, %v7783_v61  ;;  %v8245_v61 = vpack.c.bf16 %v7796_v49, %v7793_v0  ;;  %v7950_v0 = vld [vmem:[%s8068_s6] ss:$0 sm:$0xff] }
 0x674   : > { %v4023_v41 = vpop.f32.mrf.mxu2 }
 0x675   : > { %v7924_v53 = vadd.f32 %v4023_v41, %v7790_v42  ;;  %v4377_v42 = vpop.f32.mrf.mxu1  ;;  %v4232_v41 = vpop.f32.mrf.mxu0 }
 0x679   : > { %5171 = vmatmul.msk.bf16.gmra.mxu2 %vm661_vm5, %v7722_v40 }
 0x67c   : > { %v4026_v16 = vpop.f32.mrf.mxu2 }
 0x67d   : > { %v7931_v59 = vadd.f32 %v4026_v16, %v7818_v9  ;;  %v4380_v40 = vpop.f32.mrf.mxu1 }
 0x684   : > { %v4028_v36 = vpop.f32.mrf.mxu2 }
 0x685   : > { %v7934_v10 = vadd.f32 %v4028_v36, %v7830_v57  ;;  %v4382_v57 = vpop.f32.mrf.mxu1 }
 0x689   : > { %5172 = vmatmul.msk.bf16.gmra.mxu2 %vm661_vm5, %v8245_v61 }
 0x68c   : > { %v4031_v51 = vpop.f32.mrf.mxu2 }
 0x68d   : > { %v7941_v14 = vadd.f32 %v4031_v51, %v7840_v22 }
 0x694   : > { %v4033_v38 = vpop.f32.mrf.mxu2 }
 0x695   : > { %v7944_v9 = vadd.f32 %v4033_v38, %v7844_v43  ;;  %v4385_v43 = vpop.f32.mrf.mxu1 }
 0x69c   : > { %v4299_v31 = vpop.f32.mrf.mxu2 }
 0x69d   : > { %v4339_v25 = vadd.f32 %v4299_v31, %v7859_v34 }
 0x69f   : > { %v4415_v19 = vadd.f32 %v4375_v8, %v4339_v25 }
 0x6a1   : > { %v4431_v49 = vadd.f32 %v7950_v0, %v4415_v19 }
 0x6a3   : > { %v4447_v39 = vsub.f32 %v7221_v46, %v4431_v49  ;;  %v3803_v46 = vadd.f32 %v7716_v29, %v7718_v17 }
 0x6a4   : > { %v4301_v3 = vpop.f32.mrf.mxu2 }
 0x6a5   : > { %v4340_v22 = vadd.f32 %v4301_v3, %v7869_v35  ;;  %v4463_v34 = vand.u32 2147483647, %v4447_v39  ;;  %v3972_v31 = vadd.f32 %v7720_v54, %v3803_v46  ;;  %v4235_v3 = vpop.f32.mrf.mxu0 }
 0x6a7   : > { %v4416_v15 = vadd.f32 %v4377_v42, %v4340_v22  ;;  %v4479_v16 = vsel %vm661_vm5, %v4463_v34, 0.0  ;;  %v4387_v42 = vpop.f32.mrf.mxu1  ;;  %v4041_v19 = vadd.f32 %v7893_v11, %v3972_v31 }
 0x6a9   : > { %v4432_v52 = vadd.f32 %v7950_v0, %v4416_v15  ;;  %v4120_v17 = vadd.f32 %v7842_v7, %v4041_v19 }
 0x6ab   : > { %v4448_v18 = vsub.f32 %v7231_v27, %v4432_v52  ;;  %v4166_v27 = vpop.f32.mrf.mxu3 }
 0x6ac   : > { %v4304_v47 = vpop.f32.mrf.mxu2 }
 0x6ad   : > { %v4464_v1 = vand.u32 2147483647, %v4448_v18  ;;  %v4341_v21 = vadd.f32 %v4304_v47, %v7878_v44  ;;  %v4196_v18 = vadd.f32 %v4163_v5, %v4120_v17 }
 0x6af   : > { %v4480_v8 = vsel %vm661_vm5, %v4464_v1, 0.0  ;;  %v4417_v35 = vadd.f32 %v4380_v40, %v4341_v21  ;;  %v4390_v39 = vpop.f32.mrf.mxu1  ;;  %v4237_v21 = vpop.f32.mrf.mxu0 }
 0x6b0   : > { %v4481_v36 = vadd.f32 %v4480_v8, %v4479_v16  ;;  %v4265_v16 = vadd.f32 %v4232_v41, %v4196_v18 }
 0x6b1   : > { %v4433_v61 = vadd.f32 %v7950_v0, %v4417_v35 }
 0x6b3   : > { %v4449_v51 = vsub.f32 %v7259_v37, %v4433_v61  ;;  %v4168_v34 = vpop.f32.mrf.mxu3 }
 0x6b4   : > { %v4306_v38 = vpop.f32.mrf.mxu2 }
 0x6b5   : > { %v4465_v44 = vand.u32 2147483647, %v4449_v51  ;;  %v4342_v25 = vadd.f32 %v4306_v38, %v7885_v58 }
 0x6b7   : > { %v4482_v40 = vsel %vm661_vm5, %v4465_v44, 0.0  ;;  %v4418_v49 = vadd.f32 %v4382_v57, %v4342_v25  ;;  %v3808_v57 = vadd.f32 %v7738_v50, %v7744_v45  ;;  %v4240_v31 = vpop.f32.mrf.mxu0 }
 0x6b8   : > { %v4483_v22 = vadd.f32 %v4482_v40, %v4481_v36 }
 0x6b9   : > { %v4434_v29 = vadd.f32 %v7950_v0, %v4418_v49 }
 0x6bb   : > { %v4450_v37 = vsub.f32 %v7290_v62, %v4434_v29  ;;  %v4121_v62 = vadd.f32 %v7849_v6, %v7898_v30  ;;  %v4171_v61 = vpop.f32.mrf.mxu3  ;;  %v4123_v29 = vadd.f32 %v7875_v13, %v7909_v56 }
 0x6bc   : > { %v4309_v15 = vpop.f32.mrf.mxu2 }
 0x6bd   : > { %v4466_v52 = vand.u32 2147483647, %v4450_v37  ;;  %v4343_v54 = vadd.f32 %v4309_v15, %v7889_v33  ;;  %v3974_v33 = vadd.f32 %v7742_v28, %v3808_v57  ;;  %v4197_v45 = vadd.f32 %v4166_v27, %v4121_v62 }
 0x6be   : > { %v4124_v57 = vadd.f32 %v7883_v24, %v7914_v23 }
 0x6bf   : > { %v4484_v58 = vsel %vm661_vm5, %v4466_v52, 0.0  ;;  %v4419_v11 = vadd.f32 %v4385_v43, %v4343_v54  ;;  %v4392_v43 = vpop.f32.mrf.mxu1  ;;  %v4043_v5 = vadd.f32 %v7902_v48, %v3974_v33  ;;  %v4266_v41 = vadd.f32 %v4235_v3, %v4197_v45  ;;  %v4242_v54 = vpop.f32.mrf.mxu0 }
 0x6c0   : > { %v4485_v47 = vadd.f32 %v4484_v58, %v4483_v22 }
 0x6c1   : > { %v4435_v1 = vadd.f32 %v7950_v0, %v4419_v11  ;;  %v4122_v6 = vadd.f32 %v7863_v20, %v4043_v5  ;;  %v8247_v20 = vld [vmem:[#allocation15_spill] sm:$0xff] }
 0x6c3   : > { %v4451_v7 = vsub.f32 %v7303_v32, %v4435_v1  ;;  %v8246_v32 = vld [vmem:[#allocation21_spill] sm:$0xff]  ;;  %v4198_v40 = vadd.f32 %v4168_v34, %v4122_v6  ;;  %v4173_v22 = vpop.f32.mrf.mxu3  ;;  %v8248_v1 = vld [vmem:[#allocation4_spill] sm:$0xff] }
 0x6c4   : > { %v4311_v8 = vpop.f32.mrf.mxu2 }
 0x6c5   : > { %v4467_v35 = vand.u32 2147483647, %v4451_v7  ;;  %v4344_v36 = vadd.f32 %v4311_v8, %v4265_v16  ;;  %v4267_v37 = vadd.f32 %v4237_v21, %v4198_v40 }
 0x6c7   : > { %v4486_v46 = vsel %vm661_vm5, %v4467_v35, 0.0  ;;  %v4420_v50 = vadd.f32 %v4387_v42, %v4344_v36  ;;  %v4395_v49 = vpop.f32.mrf.mxu1  ;;  %v4200_v35 = vadd.f32 %v4173_v22, %v4124_v57  ;;  %v4245_v36 = vpop.f32.mrf.mxu0 }
 0x6c8   : > { %v4487_v51 = vadd.f32 %v4486_v46, %v4485_v47  ;;  %v4125_v46 = vadd.f32 %v7891_v55, %v7921_v4  ;;  %v8250_v55 = vld [vmem:[#allocation19_spill] sm:$0xff] }
 0x6c9   : > { %v4436_v38 = vadd.f32 %v7950_v0, %v4420_v50  ;;  %v8249_v50 = vld [vmem:[#allocation16_spill] sm:$0xff]  ;;  %v4269_v23 = vadd.f32 %v4242_v54, %v4200_v35 }
 0x6cb   : > { %v4452_v30 = vsub.f32 %v8246_v32, %v4436_v38  ;;  %v4176_v62 = vpop.f32.mrf.mxu3 }
 0x6cc   : > { %v4314_v28 = vpop.f32.mrf.mxu2 }
 0x6cd   : > { %v4468_v44 = vand.u32 2147483647, %v4452_v30  ;;  %v4345_v25 = vadd.f32 %v4314_v28, %v4266_v41  ;;  %v4201_v41 = vadd.f32 %v4176_v62, %v4125_v46 }
 0x6cf   : > { %v4488_v19 = vsel %vm661_vm5, %v4468_v44, 0.0  ;;  %v4421_v48 = vadd.f32 %v4390_v39, %v4345_v25  ;;  %v4199_v39 = vadd.f32 %v4171_v61, %v4123_v29  ;;  %v4397_v47 = vpop.f32.mrf.mxu1  ;;  %v4247_v44 = vpop.f32.mrf.mxu0  ;;  %v4126_v25 = vadd.f32 %v7900_v26, %v7924_v53 }
 0x6d0   : > { %v4489_v42 = vadd.f32 %v4488_v19, %v4487_v51  ;;  %v4270_v19 = vadd.f32 %v4245_v36, %v4201_v41 }
 0x6d1   : > { %v4437_v27 = vadd.f32 %v7950_v0, %v4421_v48  ;;  %v4268_v56 = vadd.f32 %v4240_v31, %v4199_v39 }
 0x6d3   : > { %v4453_v17 = vsub.f32 %v8247_v20, %v4437_v27  ;;  %v4178_v6 = vpop.f32.mrf.mxu3 }
 0x6d4   : > { %v4316_v3 = vpop.f32.mrf.mxu2  ;;  %v4202_v29 = vadd.f32 %v4178_v6, %v4126_v25 }
 0x6d5   : > { %v4469_v15 = vand.u32 2147483647, %v4453_v17  ;;  %v4346_v52 = vadd.f32 %v4316_v3, %v4267_v37  ;;  %v4127_v3 = vadd.f32 %v7904_v63, %v7931_v59  ;;  %v8252_v63 = vld [vmem:[#allocation6_spill] sm:$0xff] }
 0x6d6   : > { %v4271_v53 = vadd.f32 %v4247_v44, %v4202_v29  ;;  %v8254_v44 = vld [vmem:[#allocation18_spill] sm:$0xff] }
 0x6d7   : > { %v4490_v58 = vsel %vm661_vm5, %v4469_v15, 0.0  ;;  %v4422_v11 = vadd.f32 %v4392_v43, %v4346_v52  ;;  %v4400_v45 = vpop.f32.mrf.mxu1  ;;  %v8251_v15 = vld [vmem:[#allocation17_spill] sm:$0xff]  ;;  %v4250_v52 = vpop.f32.mrf.mxu0 }
 0x6d8   : > { %v4491_v34 = vadd.f32 %v4490_v58, %v4489_v42 }
 0x6d9   : > { %v4438_v18 = vadd.f32 %v7950_v0, %v4422_v11 }
 0x6db   : > { %v4454_v13 = vsub.f32 %v8248_v1, %v4438_v18  ;;  %v4181_v20 = vpop.f32.mrf.mxu3 }
 0x6dc   : > { %v4319_v21 = vpop.f32.mrf.mxu2  ;;  %v4203_v18 = vadd.f32 %v4181_v20, %v4127_v3  ;;  %v8255_v20 = vld [vmem:[#allocation23_spill] sm:$0xff] }
 0x6dd   : > { %v4470_v7 = vand.u32 2147483647, %v4454_v13  ;;  %v4347_v16 = vadd.f32 %v4319_v21, %v4268_v56  ;;  %v4128_v56 = vadd.f32 %v7911_v60, %v7934_v10 }
 0x6de   : > { %v4272_v62 = vadd.f32 %v4250_v52, %v4203_v18 }
 0x6df   : > { %v4492_v8 = vsel %vm661_vm5, %v4470_v7, 0.0  ;;  %v4423_v33 = vadd.f32 %v4395_v49, %v4347_v16  ;;  %v4402_v42 = vpop.f32.mrf.mxu1 }
 0x6e0   : > { %v4493_v43 = vadd.f32 %v4492_v8, %v4491_v34  ;;  %v4252_v8 = vpop.f32.mrf.mxu0 }
 0x6e1   : > { %v4439_v5 = vadd.f32 %v7950_v0, %v4423_v33 }
 0x6e3   : > { %v4455_v24 = vsub.f32 %v8249_v50, %v4439_v5  ;;  %v4183_v13 = vpop.f32.mrf.mxu3  ;;  %v4129_v50 = vadd.f32 %v7918_v2, %v7941_v14 }
 0x6e4   : > { %v4321_v61 = vpop.f32.mrf.mxu2  ;;  %v4204_v36 = vadd.f32 %v4183_v13, %v4128_v56 }
 0x6e5   : > { %v4471_v51 = vand.u32 2147483647, %v4455_v24  ;;  %v4348_v38 = vadd.f32 %v4321_v61, %v4269_v23  ;;  %v8253_v24 = vld [vmem:[#allocation24_spill] sm:$0xff] }
 0x6e6   : > { %v4273_v10 = vadd.f32 %v4252_v8, %v4204_v36  ;;  %v4536_v36 = vstv %s5238_s8 }
 0x6e7   : > { %v4494_v32 = vsel %vm661_vm5, %v4471_v51, 0.0  ;;  %v4424_v30 = vadd.f32 %v4397_v47, %v4348_v38  ;;  %v4405_v47 = vpop.f32.mrf.mxu1 }
 0x6e8   : > { %v4495_v31 = vadd.f32 %v4494_v32, %v4493_v43 }
 0x6e9   : > { %v4440_v28 = vadd.f32 %v7950_v0, %v4424_v30  ;;  %v4255_v30 = vpop.f32.mrf.mxu0 }
 0x6eb   : > { %v4456_v4 = vsub.f32 %v8250_v55, %v4440_v28  ;;  %v4186_v23 = vpop.f32.mrf.mxu3  ;;  %v4130_v28 = vadd.f32 %v7926_v12, %v7944_v9 }
 0x6ec   : > { %v4324_v48 = vpop.f32.mrf.mxu2  ;;  %v4205_v6 = vadd.f32 %v4186_v23, %v4129_v50 }
 0x6ed   : > { %v4472_v40 = vand.u32 2147483647, %v4456_v4  ;;  %v4349_v49 = vadd.f32 %v4324_v48, %v4270_v19 }
 0x6ee   : > { %v4274_v14 = vadd.f32 %v4255_v30, %v4205_v6 }
 0x6ef   : > { %v4496_v27 = vsel %vm661_vm5, %v4472_v40, 0.0  ;;  %v4425_v22 = vadd.f32 %v4400_v45, %v4349_v49  ;;  %v4407_v46 = vpop.f32.mrf.mxu1 }
 0x6f0   : > { %v4497_v17 = vadd.f32 %v4496_v27, %v4495_v31 }
 0x6f1   : > { %v4441_v37 = vadd.f32 %v7950_v0, %v4425_v22  ;;  %v4257_v29 = vpop.f32.mrf.mxu0 }
 0x6f3   : > { %v4457_v26 = vsub.f32 %v8251_v15, %v4441_v37  ;;  %v4188_v48 = vpop.f32.mrf.mxu3 }
 0x6f4   : > { %v4326_v54 = vpop.f32.mrf.mxu2  ;;  %v4206_v49 = vadd.f32 %v4188_v48, %v4130_v28 }
 0x6f5   : > { %v4473_v58 = vand.u32 2147483647, %v4457_v26  ;;  %v4350_v11 = vadd.f32 %v4326_v54, %v4271_v53 }
 0x6f6   : > { %v4275_v37 = vadd.f32 %v4257_v29, %v4206_v49 }
 0x6f7   : > { %v4498_v39 = vsel %vm661_vm5, %v4473_v58, 0.0  ;;  %v4426_v34 = vadd.f32 %v4402_v42, %v4350_v11  ;;  %v4410_v25 = vpop.f32.mrf.mxu1  ;;  %v8256_v58 = vld [vmem:[#allocation20_spill] sm:$0xff] }
 0x6f8   : > { %v4499_v57 = vadd.f32 %v4498_v39, %v4497_v17 }
 0x6f9   : > { %v4442_v1 = vadd.f32 %v7950_v0, %v4426_v34 }
 0x6fb   : > { %v4458_v59 = vsub.f32 %v8252_v63, %v4442_v1 }
 0x6fc   : > { %v4329_v21 = vpop.f32.mrf.mxu2 }
 0x6fd   : > { %v4474_v7 = vand.u32 2147483647, %v4458_v59  ;;  %v4351_v16 = vadd.f32 %v4329_v21, %v4272_v62  ;;  %v8257_v62 = vlaneseq }
 0x6ff   : > { %v4500_v33 = vsel %vm661_vm5, %v4474_v7, 0.0  ;;  %v4427_v35 = vadd.f32 %v4405_v47, %v4351_v16  ;;  %v4412_v15 = vpop.f32.mrf.mxu1  ;;  %v4520_v21 = vand.u32 127, %v8257_v62  ;;  %v4532_v16 = vstv %s5242_s11 }
 0x700   : > { %v4501_v43 = vadd.f32 %v4500_v33, %v4499_v57  ;;  %v4534_v33 = vstv %s5240_s9 }
 0x701   : > { %v4443_v5 = vadd.f32 %v7950_v0, %v4427_v35  ;;  %vm4528_vm14 = vcmp.eq.s32.totalorder %v4520_v21, 3  ;;  %vm4526_vm15 = vcmp.eq.s32.totalorder %v4520_v21, 2  ;;  %vm4524_vm0 = vcmp.eq.s32.totalorder %v4520_v21, 1 }
 0x702   : > { %vm4522_vm1 = vcmp.eq.s32.totalorder %v4520_v21, 0 }
 0x703   : > { %v4459_v60 = vsub.f32 %v8253_v24, %v4443_v5 }
 0x704   : > { %v4331_v45 = vpop.f32.mrf.mxu2 }
 0x705   : > { %v4475_v61 = vand.u32 2147483647, %v4459_v60  ;;  %v4352_v51 = vadd.f32 %v4331_v45, %v4273_v10 }
 0x707   : > { %v4428_v38 = vadd.f32 %v4407_v46, %v4352_v51  ;;  %v4502_v32 = vsel %vm661_vm5, %v4475_v61, 0.0 }
 0x708   : > { %v4503_v41 = vadd.f32 %v4502_v32, %v4501_v43 }
 0x709   : > { %v4444_v31 = vadd.f32 %v7950_v0, %v4428_v38 }
 0x70b   : > { %v4460_v2 = vsub.f32 %v8254_v44, %v4444_v31 }
 0x70c   : > { %v4334_v55 = vpop.f32.mrf.mxu2 }
 0x70d   : > { %v4476_v4 = vand.u32 2147483647, %v4460_v2  ;;  %v4353_v19 = vadd.f32 %v4334_v55, %v4274_v14 }
 0x70f   : > { %v4429_v40 = vadd.f32 %v4410_v25, %v4353_v19  ;;  %v4504_v42 = vsel %vm661_vm5, %v4476_v4, 0.0 }
 0x710   : > { %v4505_v27 = vadd.f32 %v4504_v42, %v4503_v41 }
 0x711   : > { %v4445_v22 = vadd.f32 %v7950_v0, %v4429_v40 }
 0x713   : > { %v4461_v17 = vsub.f32 %v8255_v20, %v4445_v22 }
 0x714   : > { %v4336_v12 = vpop.f32.mrf.mxu2 }
 0x715   : > { %v4354_v9 = vadd.f32 %v4336_v12, %v4275_v37  ;;  %v4477_v3 = vand.u32 2147483647, %v4461_v17 }
 0x717   : > { %v4430_v26 = vadd.f32 %v4412_v15, %v4354_v9  ;;  %v4506_v53 = vsel %vm661_vm5, %v4477_v3, 0.0 }
 0x718   : > { %v4507_v52 = vadd.f32 %v4506_v53, %v4505_v27 }
 0x719   : > { %v4446_v54 = vadd.f32 %v7950_v0, %v4430_v26  ;;  %v8258_v0 = vld [vmem:[#allocation3_spill] sm:$0xff] }
 0x71a   : > { %vm4521_vm13 = vcmp.eq.s32.totalorder %v8258_v0, 0 }
 0x71b   : > { %v4462_v11 = vsub.f32 %v8256_v58, %v4446_v54  ;;  %vm4529_vm2 = vmand %vm4521_vm13, %vm4528_vm14 }
 0x71c   : > { %vm4527_vm3 = vmand %vm4521_vm13, %vm4526_vm15 }
 0x71d   : > { %v4478_v39 = vand.u32 2147483647, %v4462_v11  ;;  %vm4525_vm4 = vmand %vm4521_vm13, %vm4524_vm0 }
 0x71f   : > { %v4508_v34 = vsel %vm661_vm5, %v4478_v39, 0.0  ;;  %vm4523_vm5 = vmand %vm4521_vm13, %vm4522_vm1 }
 0x720   : > { %v4509_v18 = vadd.f32 %v4508_v34, %v4507_v52 }
 0x722   : > { %4510 = vadd.xlane.f32.xlu1 %v4509_v18 }
 0x795   : > { %v4511_v47 = vpop.xlane.xlu1 %4510 }
 0x796   : > { %v4512_v57 = vrot.slane %v4511_v47, 4 }
 0x798   : > { %v4513_v1 = vadd.f32 %v4512_v57, %v4511_v47 }
 0x79a   : > { %v4514_v13 = vrot.slane %v4513_v1, 2 }
 0x79c   : > { %v4515_v56 = vadd.f32 %v4514_v13, %v4513_v1 }
 0x79e   : > { %v4516_v63 = vrot.slane %v4515_v56, 1 }
 0x7a0   : > { %v4517_v59 = vadd.f32 %v4516_v63, %v4515_v56 }
 0x7a2   : > { %5243 = vpush %v4517_v59 }
 0x7d3   : > { %s5244_s13 = spop %5243 }
 0x7d4   : > { %v4530_v7 = vstv %s5244_s13 }
 0x7d5   : > { %v4531_v8 = vsel %vm4529_vm2, %v4530_v7, 0.0 }
 0x7d6   : > { %v4533_v35 = vsel %vm4527_vm3, %v4532_v16, %v4531_v8 }
 0x7d7   : > { %v4535_v43 = vsel %vm4525_vm4, %v4534_v33, %v4533_v35 }
 0x7d8   : > { %v4537_v5 = vsel %vm4523_vm5, %v4536_v36, %v4535_v43 }
 0x7d9   : > { %4538 = vst [vmem:[%s380_s14] sm:$0xff] %v4537_v5 }
 0x7da PF: > { %s17_s28 = sadd.s32 1, %s5389_s28   ;;  %s8259_s24 = smov %s5381_s26 }
 0x7db   : > { %p14_p8 = scmp.ge.s32.totalorder %s17_s28, 6   ;;  %s8260_s25 = smov %s5385_s27 }
 0x7dc   : > { %s8261_s26 = smov %s8264_s29  ;;  %s8262_s27 = smov %s8268_s30 }
 0x7dd   :  { %16 = sbr.rel (!%p14_p8) target bundleno = 3 (0x3), region = 93 }

</bundles_post_ra>
